<compile_context>
chip_gen: v7x
topology: tpu7x:2x2x1
jax: 0.10.0
libtpu: 0.0.40
codegen_flags: <defaults>
</compile_context>

<pallas_src>
import jax
import jax.numpy as jnp
from jax import lax
from jax.experimental import pallas as pl
from jax.experimental.pallas import tpu as pltpu

# ----------------------------- config (scaled) ------------------------------
INTERNAL_DIM = 128          # stand-in for 4096
FINAL_OUTPUT_DIM = 16
SUB_NETWORK_DIM = 32
NUM_SUBNETWORKS = INTERNAL_DIM // SUB_NETWORK_DIM   # 4
NUM_MEM_LAYERS = 2
IMG_SIZE = 48               # stand-in for 1920
CROP_SIZE = 16              # stand-in for 512
FE_CHANNELS = [4, 8, 16]    # stand-in for [16, 64, 256, 512, 1024]
FE_KERNEL = 3               # stand-in for 5
FE_STRIDE = 2               # stand-in for 3
FC_HIDDEN = [32]            # stand-in for [2048]
BN_EPS = 1e-5
NUM_BRANCHES = 6            # 3 encoders x (fovea, peripheral)
N_FC_LAYERS = len(FC_HIDDEN) + 1        # 2
N_DEC_LAYERS = 3 + 5                    # abstract + reduction


def _has_two_tensorcores():
    # v7x has 2 TensorCores/chip -> shard the branch grid; v5e/v6e are 1-TC,
    # where a grid is just a sequential loop paying per-step prologue cost.
    try:
        kind = jax.devices()[0].device_kind.lower()
    except Exception:
        return False
    return "v7" in kind


BRANCH_PARALLEL = _has_two_tensorcores()


# ------------------------------ Pallas kernels ------------------------------
def _conv_bn_relu_kernel(p_ref, w_ref, scale_ref, shift_ref, o_ref):
    # Conv-as-matmul on im2col patches + eval-mode BN (conv bias folded into
    # shift) + ReLU.  Works both gridless (leading dim = 6 branches, unrolled
    # here) and with a branch-parallel grid (leading dim = 1).
    for b in range(p_ref.shape[0]):
        y = jnp.dot(p_ref[b].astype(jnp.bfloat16), w_ref[b],
                    preferred_element_type=jnp.float32)
        o_ref[b] = jnp.maximum(y * scale_ref[b] + shift_ref[b], 0.0)


def _fused_tail_kernel(*refs):
    # Fused: last conv layer + BN + ReLU, per-branch FC stacks (block-diag),
    # accel adaptor, 7-way elementwise max, Hebbian memory (block-diag),
    # residual add, 8-layer action decoder.  Activations stay in VMEM/vregs.
    it = iter(refs)
    x6_ref = next(it)          # (6, 72)  conv3 input features (reshape im2col)
    accel_ref = next(it)       # (1, 3)
    wc_ref = next(it)          # (72, 6*16)  conv3 weights, column-packed
    sc_ref = next(it)          # (1, 6*16)
    sh_ref = next(it)          # (1, 6*16)
    fc_refs = [(next(it), next(it)) for _ in range(N_FC_LAYERS)]   # block-diag
    aw_ref = next(it)          # (3, 128)
    ab_ref = next(it)          # (1, 128)
    prev_ref = next(it)        # (1, 128)
    hr_ref = next(it)          # (2, 128, 128) block-diag recurrent weights
    hw_ref = next(it)          # (2, 128, 128) block-diag forward weights (W^T)
    mow_ref = next(it)         # (128, 128)
    mob_ref = next(it)         # (1, 128)
    dec_refs = [(next(it), next(it)) for _ in range(N_DEC_LAYERS)]
    out_ref = next(it)         # (1, 16)
    state_ref = next(it)       # (1, 128)

    # --- conv3 + BN + ReLU for all 6 branches in one matmul -----------------
    h = jnp.dot(x6_ref[...].astype(jnp.bfloat16), wc_ref[...],
                preferred_element_type=jnp.float32)
    h = jnp.maximum(h * sc_ref[...] + sh_ref[...], 0.0)          # (6, 96)

    # --- per-branch FC stack via block-diagonal weights ----------------------
    # Row b's diagonal block stays exactly branch b's Linear stack; the
    # off-diagonal blocks (other branches' weights applied to branch b's
    # activations) never feed back into the diagonal because every weight
    # matrix here is block-diagonal.
    for l, (w_ref, b_ref) in enumerate(fc_refs):
        h = jnp.dot(h.astype(jnp.bfloat16), w_ref[...],
                    preferred_element_type=jnp.float32) + b_ref[...]
        if l < N_FC_LAYERS - 1:
            h = jnp.maximum(h, 0.0)          # Linear+ReLU (+Dropout = identity)
    # h: (6, 6*INTERNAL_DIM); branch b's encoding is its diagonal 128-block.

    # --- NumericFeatureAdaptor: relu(accel @ W^T + b) ------------------------
    enc = jnp.maximum(
        jnp.dot(accel_ref[...].astype(jnp.bfloat16), aw_ref[...],
                preferred_element_type=jnp.float32) + ab_ref[...], 0.0)

    # --- torch.max over the stacked 7 encodings (order irrelevant) ----------
    for b in range(NUM_BRANCHES):
        enc = jnp.maximum(
            enc, h[b:b + 1, b * INTERNAL_DIM:(b + 1) * INTERNAL_DIM])

    # --- NeuralMemoryNetwork: 4 subnetworks x 2 HebbianLayers, block-diag ---
    state = prev_ref[...]                                        # (1, 128)
    for j in range(NUM_MEM_LAYERS):
        combined = enc + jnp.dot(state.astype(jnp.bfloat16), hr_ref[j],
                                 preferred_element_type=jnp.float32)
        state = jnp.maximum(
            jnp.dot(combined.astype(jnp.bfloat16), hw_ref[j],
                    preferred_element_type=jnp.float32), 0.0)
    state_ref[...] = state
    mem_out = jnp.dot(state.astype(jnp.bfloat16), mow_ref[...],
                      preferred_element_type=jnp.float32) + mob_ref[...]

    # --- residual add + ActionDecoder (ReLU after all but the last layer) ---
    x = enc + mem_out
    for l, (w_ref, b_ref) in enumerate(dec_refs):
        x = jnp.dot(x.astype(jnp.bfloat16), w_ref[...],
                    preferred_element_type=jnp.float32) + b_ref[...]
        if l < N_DEC_LAYERS - 1:
            x = jnp.maximum(x, 0.0)
    out_ref[...] = x


# ---------------------------- Pallas call wrappers ---------------------------
def im2col_nhwc(x, k, s):
    # XLA-glue patch extraction (static strided slices), batched over branches.
    B, H, W, C = x.shape
    ho = (H - k) // s + 1
    wo = (W - k) // s + 1
    cols = []
    for di in range(k):
        for dj in range(k):
            cols.append(x[:, di:di + s * (ho - 1) + 1:s,
                          dj:dj + s * (wo - 1) + 1:s, :])
    p = jnp.concatenate(cols, axis=-1)          # (B, ho, wo, k*k*C), (ki,kj,c)
    return p.reshape(B, ho * wo, k * k * C), ho, wo


def pallas_conv_bn_relu(x_nhwc, lp, k, s, branch_parallel):
    # One pallas_call per conv layer for ALL 6 branches.
    B = x_nhwc.shape[0]
    p, ho, wo = im2col_nhwc(x_nhwc, k, s)
    M, K = p.shape[1], p.shape[2]
    cout = lp["w"].shape[-1]
    out_shape = jax.ShapeDtypeStruct((B, M, cout), jnp.float32)
    if branch_parallel:
        out = pl.pallas_call(
            _conv_bn_relu_kernel,
            grid=(B,),
            in_specs=[pl.BlockSpec((1, M, K), lambda b: (b, 0, 0)),
                      pl.BlockSpec((1, K, cout), lambda b: (b, 0, 0)),
                      pl.BlockSpec((1, 1, cout), lambda b: (b, 0, 0)),
                      pl.BlockSpec((1, 1, cout), lambda b: (b, 0, 0))],
            out_specs=pl.BlockSpec((1, M, cout), lambda b: (b, 0, 0)),
            out_shape=out_shape,
            compiler_params=pltpu.CompilerParams(
                dimension_semantics=("parallel",)),
        )(p, lp["w"], lp["scale"], lp["shift"])
    else:
        # Single-TC chips: everything (<40 KiB) as one block, branch loop
        # unrolled in-kernel -> no per-step pipeline overhead.
        out = pl.pallas_call(
            _conv_bn_relu_kernel,
            out_shape=out_shape,
        )(p, lp["w"], lp["scale"], lp["shift"])
    return out.reshape(B, ho, wo, cout)


def pallas_fused_tail(x6, accel, tail, prev_state):
    args = [x6, accel, tail["conv_w"], tail["conv_scale"], tail["conv_shift"]]
    for w, b in zip(tail["fc_w"], tail["fc_b"]):
        args += [w, b]
    args += [tail["adapt_w"], tail["adapt_b"], prev_state,
             tail["heb_r"], tail["heb_w"], tail["mem_out_w"], tail["mem_out_b"]]
    for w, b in zip(tail["dec_w"], tail["dec_b"]):
        args += [w, b]
    return pl.pallas_call(
        _fused_tail_kernel,
        out_shape=(jax.ShapeDtypeStruct((1, FINAL_OUTPUT_DIM), jnp.float32),
                   jax.ShapeDtypeStruct((1, INTERNAL_DIM), jnp.float32)),
    )(*args)


# ------------------------------ parameter init -------------------------------
def _block_diag(mats):
    rows = sum(m.shape[0] for m in mats)
    cols = sum(m.shape[1] for m in mats)
    out = jnp.zeros((rows, cols), jnp.float32)
    r = c = 0
    for m in mats:
        out = out.at[r:r + m.shape[0], c:c + m.shape[1]].set(m)
        r += m.shape[0]
        c += m.shape[1]
    return out


def init_linear(key, in_dim, out_dim):
    kw, kb = jax.random.split(key)
    bound = 1.0 / float(in_dim) ** 0.5
    # stored pre-transposed as W^T: (in, out) -> no per-call transpose
    w = jax.random.uniform(kw, (in_dim, out_dim), jnp.float32, -bound, bound)
    b = jax.random.uniform(kb, (1, out_dim), jnp.float32, -bound, bound)
    return w, b


def init_conv_bn(key, cin, cout, k):
    kw, kb = jax.random.split(key)
    fan_in = cin * k * k
    bound = 1.0 / float(fan_in) ** 0.5
    w = jax.random.uniform(kw, (cout, cin, k, k), jnp.float32, -bound, bound)
    b = jax.random.uniform(kb, (cout,), jnp.float32, -bound, bound)
    gamma = jnp.ones((cout,), jnp.float32)
    beta = jnp.zeros((cout,), jnp.float32)
    run_mean = jnp.zeros((cout,), jnp.float32)
    run_var = jnp.ones((cout,), jnp.float32)
    scale = gamma / jnp.sqrt(run_var + BN_EPS)
    shift = beta + (b - run_mean) * scale          # conv bias folded into shift
    wt = w.transpose(2, 3, 1, 0).reshape(k * k * cin, cout)  # (ki,kj,cin) x cout
    return {"w": wt, "scale": scale.reshape(1, cout), "shift": shift.reshape(1, cout)}


def init_neural_memory(key):
    # TODO(synk): DopamineNetwork / hebbian_update are not used in forward(); omitted.
    ksub, kout = jax.random.split(key)
    sub_keys = jax.random.split(ksub, NUM_SUBNETWORKS)
    hw = [[] for _ in range(NUM_MEM_LAYERS)]
    hr = [[] for _ in range(NUM_MEM_LAYERS)]
    for i in range(NUM_SUBNETWORKS):
        lkeys = jax.random.split(sub_keys[i], NUM_MEM_LAYERS)
        for j in range(NUM_MEM_LAYERS):
            kw, kr = jax.random.split(lkeys[j])
            hw[j].append(jax.random.normal(
                kw, (SUB_NETWORK_DIM, SUB_NETWORK_DIM), jnp.float32))  # W^T layout
            hr[j].append(jax.random.normal(
                kr, (SUB_NETWORK_DIM, SUB_NETWORK_DIM), jnp.float32))
    # block-diag over the 4 subnetworks -> one full-width matmul per layer
    hw_bd = jnp.stack([_block_diag(hw[j]) for j in range(NUM_MEM_LAYERS)])
    hr_bd = jnp.stack([_block_diag(hr[j]) for j in range(NUM_MEM_LAYERS)])
    ow, ob = init_linear(kout, SUB_NETWORK_DIM * NUM_SUBNETWORKS, INTERNAL_DIM)
    return {"hw": hw_bd.astype(jnp.bfloat16), "hr": hr_bd.astype(jnp.bfloat16),
            "out_w": ow.astype(jnp.bfloat16), "out_b": ob}


def init_action_decoder(key):
    d = INTERNAL_DIM
    # 3 abstract layers + 5 reduction layers.
    # TODO(synk): scaled config ends 8 -> 16 (d//16 < FINAL_OUTPUT_DIM); an
    # expansion artifact of the shrunken INTERNAL_DIM, not present at 4096.
    dims = [d, d, d, d, d // 2, d // 4, d // 8, d // 16, FINAL_OUTPUT_DIM]
    lkeys = jax.random.split(key, len(dims) - 1)
    return [init_linear(lkeys[i], dims[i], dims[i + 1])
            for i in range(len(dims) - 1)]


def init_brain_params(key):
    k = jax.random.split(key, 5)

    # --- stacked feature extractors (6 branches) ---
    branch_keys = jax.random.split(k[0], NUM_BRANCHES)
    per_branch_convs = []
    for bk in branch_keys:
        cin = 3
        lkeys = jax.random.split(bk, len(FE_CHANNELS))
        layers = []
        for i, cout in enumerate(FE_CHANNELS):
            layers.append(init_conv_bn(lkeys[i], cin, cout, FE_KERNEL))
            cin = cout
        per_branch_convs.append(layers)
    fe = []
    for l in range(len(FE_CHANNELS) - 1):       # first two conv layers, stacked
        fe.append({
            "w": jnp.stack([per_branch_convs[b][l]["w"]
                            for b in range(NUM_BRANCHES)]).astype(jnp.bfloat16),
            "scale": jnp.stack([per_branch_convs[b][l]["scale"]
                                for b in range(NUM_BRANCHES)]),
            "shift": jnp.stack([per_branch_convs[b][l]["shift"]
                                for b in range(NUM_BRANCHES)]),
        })
    # last conv layer (1x1 spatial): weights packed column-wise across branches
    conv3 = [per_branch_convs[b][-1] for b in range(NUM_BRANCHES)]
    conv_w = jnp.concatenate([c["w"] for c in conv3], axis=1)      # (72, 96)
    conv_scale = jnp.concatenate([c["scale"] for c in conv3], axis=1)
    conv_shift = jnp.concatenate([c["shift"] for c in conv3], axis=1)

    # --- per-branch FC stacks -> block-diagonal weights ---
    fc_dims = [FE_CHANNELS[-1]] + list(FC_HIDDEN) + [INTERNAL_DIM]
    fbkeys = jax.random.split(k[1], NUM_BRANCHES)
    per_branch_fc = []
    for bk in fbkeys:
        lkeys = jax.random.split(bk, len(fc_dims) - 1)
        per_branch_fc.append([init_linear(lkeys[i], fc_dims[i], fc_dims[i + 1])
                              for i in range(len(fc_dims) - 1)])
    fc_w, fc_b = [], []
    for l in range(len(fc_dims) - 1):
        fc_w.append(_block_diag([per_branch_fc[b][l][0]
                                 for b in range(NUM_BRANCHES)]).astype(jnp.bfloat16))
        fc_b.append(jnp.concatenate([per_branch_fc[b][l][1]
                                     for b in range(NUM_BRANCHES)], axis=1))

    aw, ab = init_linear(k[2], 3, INTERNAL_DIM)
    mem = init_neural_memory(k[3])
    dec = init_action_decoder(k[4])

    tail = {
        "conv_w": conv_w.astype(jnp.bfloat16),
        "conv_scale": conv_scale, "conv_shift": conv_shift,
        "fc_w": fc_w, "fc_b": fc_b,
        "adapt_w": aw.astype(jnp.bfloat16), "adapt_b": ab,
        "heb_r": mem["hr"], "heb_w": mem["hw"],
        "mem_out_w": mem["out_w"], "mem_out_b": mem["out_b"],
        "dec_w": [w.astype(jnp.bfloat16) for w, _ in dec],
        "dec_b": [b for _, b in dec],
    }
    return {"fe": fe, "tail": tail}


# -------------------------------- forward pass -------------------------------
def _crop_and_resize(image_nchw, cx, cy):
    img = jnp.transpose(image_nchw, (0, 2, 3, 1))               # NHWC up front
    half = CROP_SIZE // 2
    cx = jnp.clip(cx, half, IMG_SIZE - half)                    # traced clamp
    cy = jnp.clip(cy, half, IMG_SIZE - half)
    fovea = lax.dynamic_slice(
        img, (0, cy - half, cx - half, 0),
        (img.shape[0], CROP_SIZE, CROP_SIZE, img.shape[3]))
    periph = jax.image.resize(
        img, (img.shape[0], CROP_SIZE, CROP_SIZE, img.shape[3]),
        method="bilinear", antialias=False)   # F.interpolate(align_corners=False)
    return fovea, periph


def brain_forward(params, image_1, image_2, image_3, accel_data, fovea_coords,
                  prev_state):
    # prev_state is kept as one lane-dense (1, INTERNAL_DIM) slab (the
    # concatenation of the 4 per-subnetwork (1,32) states of the reference).
    fx1, fy1, fx2, fy2, fx3, fy3 = fovea_coords
    crops = []
    for img, (cx, cy) in zip((image_1, image_2, image_3),
                             ((fx1, fy1), (fx2, fy2), (fx3, fy3))):
        fovea, periph = _crop_and_resize(img, cx, cy)
        crops += [fovea, periph]
    x = jnp.concatenate(crops, axis=0)                          # (6, 16, 16, 3)

    # Conv2d -> BN(eval) -> ReLU -> Dropout(id), first two layers, all branches.
    # TODO(synk): training-mode Dropout RNG not implemented (eval identity).
    for lp in params["fe"]:
        x = pallas_conv_bn_relu(x, lp, FE_KERNEL, FE_STRIDE, BRANCH_PARALLEL)

    # Last conv layer ends at 1x1 spatial: its im2col is a plain reshape in
    # the same (ki, kj, c) order -> feed straight into the fused tail kernel.
    x6 = x.reshape(NUM_BRANCHES, FE_KERNEL * FE_KERNEL * FE_CHANNELS[-2])

    final_output, new_state = pallas_fused_tail(
        x6, accel_data, params["tail"], prev_state)
    return final_output, new_state


brain_forward_jit = jax.jit(brain_forward)   # coords traced -> no recompiles


# ------------------------------------ main ------------------------------------
if __name__ == "__main__":
    key = jax.random.PRNGKey(0)
    k1, k2, k3, k4 = jax.random.split(key, 4)
    image_1 = jax.random.normal(k1, (1, 3, IMG_SIZE, IMG_SIZE), jnp.float32)
    image_2 = jax.random.normal(k2, (1, 3, IMG_SIZE, IMG_SIZE), jnp.float32)
    image_3 = jax.random.normal(k3, (1, 3, IMG_SIZE, IMG_SIZE), jnp.float32)
    accel_data = jax.random.normal(k4, (1, 3), jnp.float32)
    # (x1, y1, x2, y2, x3, y3); some values exercise the clamp-to-border path.
    fovea_coords = (20, 9, 5, 30, 44, 25)

    params = init_brain_params(jax.random.PRNGKey(42))
    prev_state = jnp.zeros((1, INTERNAL_DIM), jnp.float32)

    final_output, new_state = brain_forward_jit(
        params, image_1, image_2, image_3, accel_data, fovea_coords, prev_state)
    final_output = jax.block_until_ready(final_output)

    assert final_output.shape == (1, FINAL_OUTPUT_DIM)
    assert final_output.dtype == jnp.float32
    assert new_state.shape == (1, INTERNAL_DIM)
    assert bool(jnp.all(jnp.isfinite(final_output)))
    assert bool(jnp.all(jnp.isfinite(new_state)))

    # Second step with new coords + carried state: same compiled program
    # (dynamic crop), exercises the recurrent-state path.
    final_output2, _ = brain_forward_jit(
        params, image_1, image_2, image_3, accel_data, (8, 40, 30, 8, 12, 12),
        new_state)
    final_output2 = jax.block_until_ready(final_output2)
    assert bool(jnp.all(jnp.isfinite(final_output2)))

    print("KERNEL_OK")
</pallas_src>

<mosaic_0001>
module attributes {stable_mosaic.version = 11 : i64} {
  func.func @_conv_bn_relu_kernel(%arg0: memref<6x49x27xf32, #tpu.memory_space<vmem>>, %arg1: memref<6x27x4xbf16, #tpu.memory_space<vmem>>, %arg2: memref<6x1x4xf32, #tpu.memory_space<vmem>>, %arg3: memref<6x1x4xf32, #tpu.memory_space<vmem>>, %arg4: memref<6x49x4xf32, #tpu.memory_space<vmem>>) attributes {dimension_semantics = [], scalar_prefetch = 0 : i64, scratch_operands = 0 : i64, tpu.core_type = #tpu.core_type<tc>} {
    %c0 = arith.constant 0 : index
    %c0_0 = arith.constant 0 : index
    %c0_1 = arith.constant 0 : index
    %0 = vector.load %arg0[%c0, %c0_0, %c0_1] : memref<6x49x27xf32, #tpu.memory_space<vmem>>, vector<1x49x27xf32>
    %1 = vector.shape_cast %0 : vector<1x49x27xf32> to vector<49x27xf32>
    %2 = arith.truncf %1 : vector<49x27xf32> to vector<49x27xbf16>
    %c0_2 = arith.constant 0 : index
    %c0_3 = arith.constant 0 : index
    %c0_4 = arith.constant 0 : index
    %3 = vector.load %arg1[%c0_2, %c0_3, %c0_4] : memref<6x27x4xbf16, #tpu.memory_space<vmem>>, vector<1x27x4xbf16>
    %4 = vector.shape_cast %3 : vector<1x27x4xbf16> to vector<27x4xbf16>
    %cst = arith.constant dense<0.000000e+00> : vector<49x4xf32>
    %5 = tpu.matmul %2, %4, %cst {dimension_numbers = #tpu.dot_dimension_numbers<[1], [0], [0], [1], [0, 0, 1, 1], [], []>} : vector<49x27xbf16>, vector<27x4xbf16>, vector<49x4xf32> -> vector<49x4xf32>
    %c0_5 = arith.constant 0 : index
    %c0_6 = arith.constant 0 : index
    %c0_7 = arith.constant 0 : index
    %6 = vector.load %arg2[%c0_5, %c0_6, %c0_7] : memref<6x1x4xf32, #tpu.memory_space<vmem>>, vector<1x1x4xf32>
    %7 = vector.shape_cast %6 : vector<1x1x4xf32> to vector<1x4xf32>
    %8 = vector.broadcast %7 : vector<1x4xf32> to vector<49x4xf32>
    %9 = arith.mulf %5, %8 : vector<49x4xf32>
    %c0_8 = arith.constant 0 : index
    %c0_9 = arith.constant 0 : index
    %c0_10 = arith.constant 0 : index
    %10 = vector.load %arg3[%c0_8, %c0_9, %c0_10] : memref<6x1x4xf32, #tpu.memory_space<vmem>>, vector<1x1x4xf32>
    %11 = vector.shape_cast %10 : vector<1x1x4xf32> to vector<1x4xf32>
    %12 = vector.broadcast %11 : vector<1x4xf32> to vector<49x4xf32>
    %13 = arith.addf %9, %12 : vector<49x4xf32>
    %cst_11 = arith.constant 0.000000e+00 : f32
    %14 = vector.broadcast %cst_11 : f32 to vector<49x4xf32>
    %15 = arith.maximumf %13, %14 : vector<49x4xf32>
    %c0_12 = arith.constant 0 : index
    %c0_13 = arith.constant 0 : index
    %c0_14 = arith.constant 0 : index
    %16 = vector.load %arg4[%c0_12, %c0_13, %c0_14] : memref<6x49x4xf32, #tpu.memory_space<vmem>>, vector<1x49x4xf32>
    %17 = vector.shape_cast %16 : vector<1x49x4xf32> to vector<49x4xf32>
    %18 = vector.shape_cast %15 : vector<49x4xf32> to vector<1x49x4xf32>
    tpu.vector_store %arg4[%c0_12, %c0_13, %c0_14], %18 {strides = array<i32>} : memref<6x49x4xf32, #tpu.memory_space<vmem>>, vector<1x49x4xf32>,
    %c1 = arith.constant 1 : index
    %c0_15 = arith.constant 0 : index
    %c0_16 = arith.constant 0 : index
    %19 = vector.load %arg0[%c1, %c0_15, %c0_16] : memref<6x49x27xf32, #tpu.memory_space<vmem>>, vector<1x49x27xf32>
    %20 = vector.shape_cast %19 : vector<1x49x27xf32> to vector<49x27xf32>
    %21 = arith.truncf %20 : vector<49x27xf32> to vector<49x27xbf16>
    %c1_17 = arith.constant 1 : index
    %c0_18 = arith.constant 0 : index
    %c0_19 = arith.constant 0 : index
    %22 = vector.load %arg1[%c1_17, %c0_18, %c0_19] : memref<6x27x4xbf16, #tpu.memory_space<vmem>>, vector<1x27x4xbf16>
    %23 = vector.shape_cast %22 : vector<1x27x4xbf16> to vector<27x4xbf16>
    %cst_20 = arith.constant dense<0.000000e+00> : vector<49x4xf32>
    %24 = tpu.matmul %21, %23, %cst_20 {dimension_numbers = #tpu.dot_dimension_numbers<[1], [0], [0], [1], [0, 0, 1, 1], [], []>} : vector<49x27xbf16>, vector<27x4xbf16>, vector<49x4xf32> -> vector<49x4xf32>
    %c1_21 = arith.constant 1 : index
    %c0_22 = arith.constant 0 : index
    %c0_23 = arith.constant 0 : index
    %25 = vector.load %arg2[%c1_21, %c0_22, %c0_23] : memref<6x1x4xf32, #tpu.memory_space<vmem>>, vector<1x1x4xf32>
    %26 = vector.shape_cast %25 : vector<1x1x4xf32> to vector<1x4xf32>
    %27 = vector.broadcast %26 : vector<1x4xf32> to vector<49x4xf32>
    %28 = arith.mulf %24, %27 : vector<49x4xf32>
    %c1_24 = arith.constant 1 : index
    %c0_25 = arith.constant 0 : index
    %c0_26 = arith.constant 0 : index
    %29 = vector.load %arg3[%c1_24, %c0_25, %c0_26] : memref<6x1x4xf32, #tpu.memory_space<vmem>>, vector<1x1x4xf32>
    %30 = vector.shape_cast %29 : vector<1x1x4xf32> to vector<1x4xf32>
    %31 = vector.broadcast %30 : vector<1x4xf32> to vector<49x4xf32>
    %32 = arith.addf %28, %31 : vector<49x4xf32>
    %cst_27 = arith.constant 0.000000e+00 : f32
    %33 = vector.broadcast %cst_27 : f32 to vector<49x4xf32>
    %34 = arith.maximumf %32, %33 : vector<49x4xf32>
    %c1_28 = arith.constant 1 : index
    %c0_29 = arith.constant 0 : index
    %c0_30 = arith.constant 0 : index
    %35 = vector.load %arg4[%c1_28, %c0_29, %c0_30] : memref<6x49x4xf32, #tpu.memory_space<vmem>>, vector<1x49x4xf32>
    %36 = vector.shape_cast %35 : vector<1x49x4xf32> to vector<49x4xf32>
    %37 = vector.shape_cast %34 : vector<49x4xf32> to vector<1x49x4xf32>
    tpu.vector_store %arg4[%c1_28, %c0_29, %c0_30], %37 {strides = array<i32>} : memref<6x49x4xf32, #tpu.memory_space<vmem>>, vector<1x49x4xf32>,
    %c2 = arith.constant 2 : index
    %c0_31 = arith.constant 0 : index
    %c0_32 = arith.constant 0 : index
    %38 = vector.load %arg0[%c2, %c0_31, %c0_32] : memref<6x49x27xf32, #tpu.memory_space<vmem>>, vector<1x49x27xf32>
    %39 = vector.shape_cast %38 : vector<1x49x27xf32> to vector<49x27xf32>
    %40 = arith.truncf %39 : vector<49x27xf32> to vector<49x27xbf16>
    %c2_33 = arith.constant 2 : index
    %c0_34 = arith.constant 0 : index
    %c0_35 = arith.constant 0 : index
    %41 = vector.load %arg1[%c2_33, %c0_34, %c0_35] : memref<6x27x4xbf16, #tpu.memory_space<vmem>>, vector<1x27x4xbf16>
    %42 = vector.shape_cast %41 : vector<1x27x4xbf16> to vector<27x4xbf16>
    %cst_36 = arith.constant dense<0.000000e+00> : vector<49x4xf32>
    %43 = tpu.matmul %40, %42, %cst_36 {dimension_numbers = #tpu.dot_dimension_numbers<[1], [0], [0], [1], [0, 0, 1, 1], [], []>} : vector<49x27xbf16>, vector<27x4xbf16>, vector<49x4xf32> -> vector<49x4xf32>
    %c2_37 = arith.constant 2 : index
    %c0_38 = arith.constant 0 : index
    %c0_39 = arith.constant 0 : index
    %44 = vector.load %arg2[%c2_37, %c0_38, %c0_39] : memref<6x1x4xf32, #tpu.memory_space<vmem>>, vector<1x1x4xf32>
    %45 = vector.shape_cast %44 : vector<1x1x4xf32> to vector<1x4xf32>
    %46 = vector.broadcast %45 : vector<1x4xf32> to vector<49x4xf32>
    %47 = arith.mulf %43, %46 : vector<49x4xf32>
    %c2_40 = arith.constant 2 : index
    %c0_41 = arith.constant 0 : index
    %c0_42 = arith.constant 0 : index
    %48 = vector.load %arg3[%c2_40, %c0_41, %c0_42] : memref<6x1x4xf32, #tpu.memory_space<vmem>>, vector<1x1x4xf32>
    %49 = vector.shape_cast %48 : vector<1x1x4xf32> to vector<1x4xf32>
    %50 = vector.broadcast %49 : vector<1x4xf32> to vector<49x4xf32>
    %51 = arith.addf %47, %50 : vector<49x4xf32>
    %cst_43 = arith.constant 0.000000e+00 : f32
    %52 = vector.broadcast %cst_43 : f32 to vector<49x4xf32>
    %53 = arith.maximumf %51, %52 : vector<49x4xf32>
    %c2_44 = arith.constant 2 : index
    %c0_45 = arith.constant 0 : index
    %c0_46 = arith.constant 0 : index
    %54 = vector.load %arg4[%c2_44, %c0_45, %c0_46] : memref<6x49x4xf32, #tpu.memory_space<vmem>>, vector<1x49x4xf32>
    %55 = vector.shape_cast %54 : vector<1x49x4xf32> to vector<49x4xf32>
    %56 = vector.shape_cast %53 : vector<49x4xf32> to vector<1x49x4xf32>
    tpu.vector_store %arg4[%c2_44, %c0_45, %c0_46], %56 {strides = array<i32>} : memref<6x49x4xf32, #tpu.memory_space<vmem>>, vector<1x49x4xf32>,
    %c3 = arith.constant 3 : index
    %c0_47 = arith.constant 0 : index
    %c0_48 = arith.constant 0 : index
    %57 = vector.load %arg0[%c3, %c0_47, %c0_48] : memref<6x49x27xf32, #tpu.memory_space<vmem>>, vector<1x49x27xf32>
    %58 = vector.shape_cast %57 : vector<1x49x27xf32> to vector<49x27xf32>
    %59 = arith.truncf %58 : vector<49x27xf32> to vector<49x27xbf16>
    %c3_49 = arith.constant 3 : index
    %c0_50 = arith.constant 0 : index
    %c0_51 = arith.constant 0 : index
    %60 = vector.load %arg1[%c3_49, %c0_50, %c0_51] : memref<6x27x4xbf16, #tpu.memory_space<vmem>>, vector<1x27x4xbf16>
    %61 = vector.shape_cast %60 : vector<1x27x4xbf16> to vector<27x4xbf16>
    %cst_52 = arith.constant dense<0.000000e+00> : vector<49x4xf32>
    %62 = tpu.matmul %59, %61, %cst_52 {dimension_numbers = #tpu.dot_dimension_numbers<[1], [0], [0], [1], [0, 0, 1, 1], [], []>} : vector<49x27xbf16>, vector<27x4xbf16>, vector<49x4xf32> -> vector<49x4xf32>
    %c3_53 = arith.constant 3 : index
    %c0_54 = arith.constant 0 : index
    %c0_55 = arith.constant 0 : index
    %63 = vector.load %arg2[%c3_53, %c0_54, %c0_55] : memref<6x1x4xf32, #tpu.memory_space<vmem>>, vector<1x1x4xf32>
    %64 = vector.shape_cast %63 : vector<1x1x4xf32> to vector<1x4xf32>
    %65 = vector.broadcast %64 : vector<1x4xf32> to vector<49x4xf32>
    %66 = arith.mulf %62, %65 : vector<49x4xf32>
    %c3_56 = arith.constant 3 : index
    %c0_57 = arith.constant 0 : index
    %c0_58 = arith.constant 0 : index
    %67 = vector.load %arg3[%c3_56, %c0_57, %c0_58] : memref<6x1x4xf32, #tpu.memory_space<vmem>>, vector<1x1x4xf32>
    %68 = vector.shape_cast %67 : vector<1x1x4xf32> to vector<1x4xf32>
    %69 = vector.broadcast %68 : vector<1x4xf32> to vector<49x4xf32>
    %70 = arith.addf %66, %69 : vector<49x4xf32>
    %cst_59 = arith.constant 0.000000e+00 : f32
    %71 = vector.broadcast %cst_59 : f32 to vector<49x4xf32>
    %72 = arith.maximumf %70, %71 : vector<49x4xf32>
    %c3_60 = arith.constant 3 : index
    %c0_61 = arith.constant 0 : index
    %c0_62 = arith.constant 0 : index
    %73 = vector.load %arg4[%c3_60, %c0_61, %c0_62] : memref<6x49x4xf32, #tpu.memory_space<vmem>>, vector<1x49x4xf32>
    %74 = vector.shape_cast %73 : vector<1x49x4xf32> to vector<49x4xf32>
    %75 = vector.shape_cast %72 : vector<49x4xf32> to vector<1x49x4xf32>
    tpu.vector_store %arg4[%c3_60, %c0_61, %c0_62], %75 {strides = array<i32>} : memref<6x49x4xf32, #tpu.memory_space<vmem>>, vector<1x49x4xf32>,
    %c4 = arith.constant 4 : index
    %c0_63 = arith.constant 0 : index
    %c0_64 = arith.constant 0 : index
    %76 = vector.load %arg0[%c4, %c0_63, %c0_64] : memref<6x49x27xf32, #tpu.memory_space<vmem>>, vector<1x49x27xf32>
    %77 = vector.shape_cast %76 : vector<1x49x27xf32> to vector<49x27xf32>
    %78 = arith.truncf %77 : vector<49x27xf32> to vector<49x27xbf16>
    %c4_65 = arith.constant 4 : index
    %c0_66 = arith.constant 0 : index
    %c0_67 = arith.constant 0 : index
    %79 = vector.load %arg1[%c4_65, %c0_66, %c0_67] : memref<6x27x4xbf16, #tpu.memory_space<vmem>>, vector<1x27x4xbf16>
    %80 = vector.shape_cast %79 : vector<1x27x4xbf16> to vector<27x4xbf16>
    %cst_68 = arith.constant dense<0.000000e+00> : vector<49x4xf32>
    %81 = tpu.matmul %78, %80, %cst_68 {dimension_numbers = #tpu.dot_dimension_numbers<[1], [0], [0], [1], [0, 0, 1, 1], [], []>} : vector<49x27xbf16>, vector<27x4xbf16>, vector<49x4xf32> -> vector<49x4xf32>
    %c4_69 = arith.constant 4 : index
    %c0_70 = arith.constant 0 : index
    %c0_71 = arith.constant 0 : index
    %82 = vector.load %arg2[%c4_69, %c0_70, %c0_71] : memref<6x1x4xf32, #tpu.memory_space<vmem>>, vector<1x1x4xf32>
    %83 = vector.shape_cast %82 : vector<1x1x4xf32> to vector<1x4xf32>
    %84 = vector.broadcast %83 : vector<1x4xf32> to vector<49x4xf32>
    %85 = arith.mulf %81, %84 : vector<49x4xf32>
    %c4_72 = arith.constant 4 : index
    %c0_73 = arith.constant 0 : index
    %c0_74 = arith.constant 0 : index
    %86 = vector.load %arg3[%c4_72, %c0_73, %c0_74] : memref<6x1x4xf32, #tpu.memory_space<vmem>>, vector<1x1x4xf32>
    %87 = vector.shape_cast %86 : vector<1x1x4xf32> to vector<1x4xf32>
    %88 = vector.broadcast %87 : vector<1x4xf32> to vector<49x4xf32>
    %89 = arith.addf %85, %88 : vector<49x4xf32>
    %cst_75 = arith.constant 0.000000e+00 : f32
    %90 = vector.broadcast %cst_75 : f32 to vector<49x4xf32>
    %91 = arith.maximumf %89, %90 : vector<49x4xf32>
    %c4_76 = arith.constant 4 : index
    %c0_77 = arith.constant 0 : index
    %c0_78 = arith.constant 0 : index
    %92 = vector.load %arg4[%c4_76, %c0_77, %c0_78] : memref<6x49x4xf32, #tpu.memory_space<vmem>>, vector<1x49x4xf32>
    %93 = vector.shape_cast %92 : vector<1x49x4xf32> to vector<49x4xf32>
    %94 = vector.shape_cast %91 : vector<49x4xf32> to vector<1x49x4xf32>
    tpu.vector_store %arg4[%c4_76, %c0_77, %c0_78], %94 {strides = array<i32>} : memref<6x49x4xf32, #tpu.memory_space<vmem>>, vector<1x49x4xf32>,
    %c5 = arith.constant 5 : index
    %c0_79 = arith.constant 0 : index
    %c0_80 = arith.constant 0 : index
    %95 = vector.load %arg0[%c5, %c0_79, %c0_80] : memref<6x49x27xf32, #tpu.memory_space<vmem>>, vector<1x49x27xf32>
    %96 = vector.shape_cast %95 : vector<1x49x27xf32> to vector<49x27xf32>
    %97 = arith.truncf %96 : vector<49x27xf32> to vector<49x27xbf16>
    %c5_81 = arith.constant 5 : index
    %c0_82 = arith.constant 0 : index
    %c0_83 = arith.constant 0 : index
    %98 = vector.load %arg1[%c5_81, %c0_82, %c0_83] : memref<6x27x4xbf16, #tpu.memory_space<vmem>>, vector<1x27x4xbf16>
    %99 = vector.shape_cast %98 : vector<1x27x4xbf16> to vector<27x4xbf16>
    %cst_84 = arith.constant dense<0.000000e+00> : vector<49x4xf32>
    %100 = tpu.matmul %97, %99, %cst_84 {dimension_numbers = #tpu.dot_dimension_numbers<[1], [0], [0], [1], [0, 0, 1, 1], [], []>} : vector<49x27xbf16>, vector<27x4xbf16>, vector<49x4xf32> -> vector<49x4xf32>
    %c5_85 = arith.constant 5 : index
    %c0_86 = arith.constant 0 : index
    %c0_87 = arith.constant 0 : index
    %101 = vector.load %arg2[%c5_85, %c0_86, %c0_87] : memref<6x1x4xf32, #tpu.memory_space<vmem>>, vector<1x1x4xf32>
    %102 = vector.shape_cast %101 : vector<1x1x4xf32> to vector<1x4xf32>
    %103 = vector.broadcast %102 : vector<1x4xf32> to vector<49x4xf32>
    %104 = arith.mulf %100, %103 : vector<49x4xf32>
    %c5_88 = arith.constant 5 : index
    %c0_89 = arith.constant 0 : index
    %c0_90 = arith.constant 0 : index
    %105 = vector.load %arg3[%c5_88, %c0_89, %c0_90] : memref<6x1x4xf32, #tpu.memory_space<vmem>>, vector<1x1x4xf32>
    %106 = vector.shape_cast %105 : vector<1x1x4xf32> to vector<1x4xf32>
    %107 = vector.broadcast %106 : vector<1x4xf32> to vector<49x4xf32>
    %108 = arith.addf %104, %107 : vector<49x4xf32>
    %cst_91 = arith.constant 0.000000e+00 : f32
    %109 = vector.broadcast %cst_91 : f32 to vector<49x4xf32>
    %110 = arith.maximumf %108, %109 : vector<49x4xf32>
    %c5_92 = arith.constant 5 : index
    %c0_93 = arith.constant 0 : index
    %c0_94 = arith.constant 0 : index
    %111 = vector.load %arg4[%c5_92, %c0_93, %c0_94] : memref<6x49x4xf32, #tpu.memory_space<vmem>>, vector<1x49x4xf32>
    %112 = vector.shape_cast %111 : vector<1x49x4xf32> to vector<49x4xf32>
    %113 = vector.shape_cast %110 : vector<49x4xf32> to vector<1x49x4xf32>
    tpu.vector_store %arg4[%c5_92, %c0_93, %c0_94], %113 {strides = array<i32>} : memref<6x49x4xf32, #tpu.memory_space<vmem>>, vector<1x49x4xf32>,
    return
  }
}

module attributes {stable_mosaic.version = 11 : i64} {
  func.func @_conv_bn_relu_kernel(%arg0: memref<6x9x36xf32, #tpu.memory_space<vmem>>, %arg1: memref<6x36x8xbf16, #tpu.memory_space<vmem>>, %arg2: memref<6x1x8xf32, #tpu.memory_space<vmem>>, %arg3: memref<6x1x8xf32, #tpu.memory_space<vmem>>, %arg4: memref<6x9x8xf32, #tpu.memory_space<vmem>>) attributes {dimension_semantics = [], scalar_prefetch = 0 : i64, scratch_operands = 0 : i64, tpu.core_type = #tpu.core_type<tc>} {
    %c0 = arith.constant 0 : index
    %c0_0 = arith.constant 0 : index
    %c0_1 = arith.constant 0 : index
    %0 = vector.load %arg0[%c0, %c0_0, %c0_1] : memref<6x9x36xf32, #tpu.memory_space<vmem>>, vector<1x9x36xf32>
    %1 = vector.shape_cast %0 : vector<1x9x36xf32> to vector<9x36xf32>
    %2 = arith.truncf %1 : vector<9x36xf32> to vector<9x36xbf16>
    %c0_2 = arith.constant 0 : index
    %c0_3 = arith.constant 0 : index
    %c0_4 = arith.constant 0 : index
    %3 = vector.load %arg1[%c0_2, %c0_3, %c0_4] : memref<6x36x8xbf16, #tpu.memory_space<vmem>>, vector<1x36x8xbf16>
    %4 = vector.shape_cast %3 : vector<1x36x8xbf16> to vector<36x8xbf16>
    %cst = arith.constant dense<0.000000e+00> : vector<9x8xf32>
    %5 = tpu.matmul %2, %4, %cst {dimension_numbers = #tpu.dot_dimension_numbers<[1], [0], [0], [1], [0, 0, 1, 1], [], []>} : vector<9x36xbf16>, vector<36x8xbf16>, vector<9x8xf32> -> vector<9x8xf32>
    %c0_5 = arith.constant 0 : index
    %c0_6 = arith.constant 0 : index
    %c0_7 = arith.constant 0 : index
    %6 = vector.load %arg2[%c0_5, %c0_6, %c0_7] : memref<6x1x8xf32, #tpu.memory_space<vmem>>, vector<1x1x8xf32>
    %7 = vector.shape_cast %6 : vector<1x1x8xf32> to vector<1x8xf32>
    %8 = vector.broadcast %7 : vector<1x8xf32> to vector<9x8xf32>
    %9 = arith.mulf %5, %8 : vector<9x8xf32>
    %c0_8 = arith.constant 0 : index
    %c0_9 = arith.constant 0 : index
    %c0_10 = arith.constant 0 : index
    %10 = vector.load %arg3[%c0_8, %c0_9, %c0_10] : memref<6x1x8xf32, #tpu.memory_space<vmem>>, vector<1x1x8xf32>
    %11 = vector.shape_cast %10 : vector<1x1x8xf32> to vector<1x8xf32>
    %12 = vector.broadcast %11 : vector<1x8xf32> to vector<9x8xf32>
    %13 = arith.addf %9, %12 : vector<9x8xf32>
    %cst_11 = arith.constant 0.000000e+00 : f32
    %14 = vector.broadcast %cst_11 : f32 to vector<9x8xf32>
    %15 = arith.maximumf %13, %14 : vector<9x8xf32>
    %c0_12 = arith.constant 0 : index
    %c0_13 = arith.constant 0 : index
    %c0_14 = arith.constant 0 : index
    %16 = vector.load %arg4[%c0_12, %c0_13, %c0_14] : memref<6x9x8xf32, #tpu.memory_space<vmem>>, vector<1x9x8xf32>
    %17 = vector.shape_cast %16 : vector<1x9x8xf32> to vector<9x8xf32>
    %18 = vector.shape_cast %15 : vector<9x8xf32> to vector<1x9x8xf32>
    tpu.vector_store %arg4[%c0_12, %c0_13, %c0_14], %18 {strides = array<i32>} : memref<6x9x8xf32, #tpu.memory_space<vmem>>, vector<1x9x8xf32>,
    %c1 = arith.constant 1 : index
    %c0_15 = arith.constant 0 : index
    %c0_16 = arith.constant 0 : index
    %19 = vector.load %arg0[%c1, %c0_15, %c0_16] : memref<6x9x36xf32, #tpu.memory_space<vmem>>, vector<1x9x36xf32>
    %20 = vector.shape_cast %19 : vector<1x9x36xf32> to vector<9x36xf32>
    %21 = arith.truncf %20 : vector<9x36xf32> to vector<9x36xbf16>
    %c1_17 = arith.constant 1 : index
    %c0_18 = arith.constant 0 : index
    %c0_19 = arith.constant 0 : index
    %22 = vector.load %arg1[%c1_17, %c0_18, %c0_19] : memref<6x36x8xbf16, #tpu.memory_space<vmem>>, vector<1x36x8xbf16>
    %23 = vector.shape_cast %22 : vector<1x36x8xbf16> to vector<36x8xbf16>
    %cst_20 = arith.constant dense<0.000000e+00> : vector<9x8xf32>
    %24 = tpu.matmul %21, %23, %cst_20 {dimension_numbers = #tpu.dot_dimension_numbers<[1], [0], [0], [1], [0, 0, 1, 1], [], []>} : vector<9x36xbf16>, vector<36x8xbf16>, vector<9x8xf32> -> vector<9x8xf32>
    %c1_21 = arith.constant 1 : index
    %c0_22 = arith.constant 0 : index
    %c0_23 = arith.constant 0 : index
    %25 = vector.load %arg2[%c1_21, %c0_22, %c0_23] : memref<6x1x8xf32, #tpu.memory_space<vmem>>, vector<1x1x8xf32>
    %26 = vector.shape_cast %25 : vector<1x1x8xf32> to vector<1x8xf32>
    %27 = vector.broadcast %26 : vector<1x8xf32> to vector<9x8xf32>
    %28 = arith.mulf %24, %27 : vector<9x8xf32>
    %c1_24 = arith.constant 1 : index
    %c0_25 = arith.constant 0 : index
    %c0_26 = arith.constant 0 : index
    %29 = vector.load %arg3[%c1_24, %c0_25, %c0_26] : memref<6x1x8xf32, #tpu.memory_space<vmem>>, vector<1x1x8xf32>
    %30 = vector.shape_cast %29 : vector<1x1x8xf32> to vector<1x8xf32>
    %31 = vector.broadcast %30 : vector<1x8xf32> to vector<9x8xf32>
    %32 = arith.addf %28, %31 : vector<9x8xf32>
    %cst_27 = arith.constant 0.000000e+00 : f32
    %33 = vector.broadcast %cst_27 : f32 to vector<9x8xf32>
    %34 = arith.maximumf %32, %33 : vector<9x8xf32>
    %c1_28 = arith.constant 1 : index
    %c0_29 = arith.constant 0 : index
    %c0_30 = arith.constant 0 : index
    %35 = vector.load %arg4[%c1_28, %c0_29, %c0_30] : memref<6x9x8xf32, #tpu.memory_space<vmem>>, vector<1x9x8xf32>
    %36 = vector.shape_cast %35 : vector<1x9x8xf32> to vector<9x8xf32>
    %37 = vector.shape_cast %34 : vector<9x8xf32> to vector<1x9x8xf32>
    tpu.vector_store %arg4[%c1_28, %c0_29, %c0_30], %37 {strides = array<i32>} : memref<6x9x8xf32, #tpu.memory_space<vmem>>, vector<1x9x8xf32>,
    %c2 = arith.constant 2 : index
    %c0_31 = arith.constant 0 : index
    %c0_32 = arith.constant 0 : index
    %38 = vector.load %arg0[%c2, %c0_31, %c0_32] : memref<6x9x36xf32, #tpu.memory_space<vmem>>, vector<1x9x36xf32>
    %39 = vector.shape_cast %38 : vector<1x9x36xf32> to vector<9x36xf32>
    %40 = arith.truncf %39 : vector<9x36xf32> to vector<9x36xbf16>
    %c2_33 = arith.constant 2 : index
    %c0_34 = arith.constant 0 : index
    %c0_35 = arith.constant 0 : index
    %41 = vector.load %arg1[%c2_33, %c0_34, %c0_35] : memref<6x36x8xbf16, #tpu.memory_space<vmem>>, vector<1x36x8xbf16>
    %42 = vector.shape_cast %41 : vector<1x36x8xbf16> to vector<36x8xbf16>
    %cst_36 = arith.constant dense<0.000000e+00> : vector<9x8xf32>
    %43 = tpu.matmul %40, %42, %cst_36 {dimension_numbers = #tpu.dot_dimension_numbers<[1], [0], [0], [1], [0, 0, 1, 1], [], []>} : vector<9x36xbf16>, vector<36x8xbf16>, vector<9x8xf32> -> vector<9x8xf32>
    %c2_37 = arith.constant 2 : index
    %c0_38 = arith.constant 0 : index
    %c0_39 = arith.constant 0 : index
    %44 = vector.load %arg2[%c2_37, %c0_38, %c0_39] : memref<6x1x8xf32, #tpu.memory_space<vmem>>, vector<1x1x8xf32>
    %45 = vector.shape_cast %44 : vector<1x1x8xf32> to vector<1x8xf32>
    %46 = vector.broadcast %45 : vector<1x8xf32> to vector<9x8xf32>
    %47 = arith.mulf %43, %46 : vector<9x8xf32>
    %c2_40 = arith.constant 2 : index
    %c0_41 = arith.constant 0 : index
    %c0_42 = arith.constant 0 : index
    %48 = vector.load %arg3[%c2_40, %c0_41, %c0_42] : memref<6x1x8xf32, #tpu.memory_space<vmem>>, vector<1x1x8xf32>
    %49 = vector.shape_cast %48 : vector<1x1x8xf32> to vector<1x8xf32>
    %50 = vector.broadcast %49 : vector<1x8xf32> to vector<9x8xf32>
    %51 = arith.addf %47, %50 : vector<9x8xf32>
    %cst_43 = arith.constant 0.000000e+00 : f32
    %52 = vector.broadcast %cst_43 : f32 to vector<9x8xf32>
    %53 = arith.maximumf %51, %52 : vector<9x8xf32>
    %c2_44 = arith.constant 2 : index
    %c0_45 = arith.constant 0 : index
    %c0_46 = arith.constant 0 : index
    %54 = vector.load %arg4[%c2_44, %c0_45, %c0_46] : memref<6x9x8xf32, #tpu.memory_space<vmem>>, vector<1x9x8xf32>
    %55 = vector.shape_cast %54 : vector<1x9x8xf32> to vector<9x8xf32>
    %56 = vector.shape_cast %53 : vector<9x8xf32> to vector<1x9x8xf32>
    tpu.vector_store %arg4[%c2_44, %c0_45, %c0_46], %56 {strides = array<i32>} : memref<6x9x8xf32, #tpu.memory_space<vmem>>, vector<1x9x8xf32>,
    %c3 = arith.constant 3 : index
    %c0_47 = arith.constant 0 : index
    %c0_48 = arith.constant 0 : index
    %57 = vector.load %arg0[%c3, %c0_47, %c0_48] : memref<6x9x36xf32, #tpu.memory_space<vmem>>, vector<1x9x36xf32>
    %58 = vector.shape_cast %57 : vector<1x9x36xf32> to vector<9x36xf32>
    %59 = arith.truncf %58 : vector<9x36xf32> to vector<9x36xbf16>
    %c3_49 = arith.constant 3 : index
    %c0_50 = arith.constant 0 : index
    %c0_51 = arith.constant 0 : index
    %60 = vector.load %arg1[%c3_49, %c0_50, %c0_51] : memref<6x36x8xbf16, #tpu.memory_space<vmem>>, vector<1x36x8xbf16>
    %61 = vector.shape_cast %60 : vector<1x36x8xbf16> to vector<36x8xbf16>
    %cst_52 = arith.constant dense<0.000000e+00> : vector<9x8xf32>
    %62 = tpu.matmul %59, %61, %cst_52 {dimension_numbers = #tpu.dot_dimension_numbers<[1], [0], [0], [1], [0, 0, 1, 1], [], []>} : vector<9x36xbf16>, vector<36x8xbf16>, vector<9x8xf32> -> vector<9x8xf32>
    %c3_53 = arith.constant 3 : index
    %c0_54 = arith.constant 0 : index
    %c0_55 = arith.constant 0 : index
    %63 = vector.load %arg2[%c3_53, %c0_54, %c0_55] : memref<6x1x8xf32, #tpu.memory_space<vmem>>, vector<1x1x8xf32>
    %64 = vector.shape_cast %63 : vector<1x1x8xf32> to vector<1x8xf32>
    %65 = vector.broadcast %64 : vector<1x8xf32> to vector<9x8xf32>
    %66 = arith.mulf %62, %65 : vector<9x8xf32>
    %c3_56 = arith.constant 3 : index
    %c0_57 = arith.constant 0 : index
    %c0_58 = arith.constant 0 : index
    %67 = vector.load %arg3[%c3_56, %c0_57, %c0_58] : memref<6x1x8xf32, #tpu.memory_space<vmem>>, vector<1x1x8xf32>
    %68 = vector.shape_cast %67 : vector<1x1x8xf32> to vector<1x8xf32>
    %69 = vector.broadcast %68 : vector<1x8xf32> to vector<9x8xf32>
    %70 = arith.addf %66, %69 : vector<9x8xf32>
    %cst_59 = arith.constant 0.000000e+00 : f32
    %71 = vector.broadcast %cst_59 : f32 to vector<9x8xf32>
    %72 = arith.maximumf %70, %71 : vector<9x8xf32>
    %c3_60 = arith.constant 3 : index
    %c0_61 = arith.constant 0 : index
    %c0_62 = arith.constant 0 : index
    %73 = vector.load %arg4[%c3_60, %c0_61, %c0_62] : memref<6x9x8xf32, #tpu.memory_space<vmem>>, vector<1x9x8xf32>
    %74 = vector.shape_cast %73 : vector<1x9x8xf32> to vector<9x8xf32>
    %75 = vector.shape_cast %72 : vector<9x8xf32> to vector<1x9x8xf32>
    tpu.vector_store %arg4[%c3_60, %c0_61, %c0_62], %75 {strides = array<i32>} : memref<6x9x8xf32, #tpu.memory_space<vmem>>, vector<1x9x8xf32>,
    %c4 = arith.constant 4 : index
    %c0_63 = arith.constant 0 : index
    %c0_64 = arith.constant 0 : index
    %76 = vector.load %arg0[%c4, %c0_63, %c0_64] : memref<6x9x36xf32, #tpu.memory_space<vmem>>, vector<1x9x36xf32>
    %77 = vector.shape_cast %76 : vector<1x9x36xf32> to vector<9x36xf32>
    %78 = arith.truncf %77 : vector<9x36xf32> to vector<9x36xbf16>
    %c4_65 = arith.constant 4 : index
    %c0_66 = arith.constant 0 : index
    %c0_67 = arith.constant 0 : index
    %79 = vector.load %arg1[%c4_65, %c0_66, %c0_67] : memref<6x36x8xbf16, #tpu.memory_space<vmem>>, vector<1x36x8xbf16>
    %80 = vector.shape_cast %79 : vector<1x36x8xbf16> to vector<36x8xbf16>
    %cst_68 = arith.constant dense<0.000000e+00> : vector<9x8xf32>
    %81 = tpu.matmul %78, %80, %cst_68 {dimension_numbers = #tpu.dot_dimension_numbers<[1], [0], [0], [1], [0, 0, 1, 1], [], []>} : vector<9x36xbf16>, vector<36x8xbf16>, vector<9x8xf32> -> vector<9x8xf32>
    %c4_69 = arith.constant 4 : index
    %c0_70 = arith.constant 0 : index
    %c0_71 = arith.constant 0 : index
    %82 = vector.load %arg2[%c4_69, %c0_70, %c0_71] : memref<6x1x8xf32, #tpu.memory_space<vmem>>, vector<1x1x8xf32>
    %83 = vector.shape_cast %82 : vector<1x1x8xf32> to vector<1x8xf32>
    %84 = vector.broadcast %83 : vector<1x8xf32> to vector<9x8xf32>
    %85 = arith.mulf %81, %84 : vector<9x8xf32>
    %c4_72 = arith.constant 4 : index
    %c0_73 = arith.constant 0 : index
    %c0_74 = arith.constant 0 : index
    %86 = vector.load %arg3[%c4_72, %c0_73, %c0_74] : memref<6x1x8xf32, #tpu.memory_space<vmem>>, vector<1x1x8xf32>
    %87 = vector.shape_cast %86 : vector<1x1x8xf32> to vector<1x8xf32>
    %88 = vector.broadcast %87 : vector<1x8xf32> to vector<9x8xf32>
    %89 = arith.addf %85, %88 : vector<9x8xf32>
    %cst_75 = arith.constant 0.000000e+00 : f32
    %90 = vector.broadcast %cst_75 : f32 to vector<9x8xf32>
    %91 = arith.maximumf %89, %90 : vector<9x8xf32>
    %c4_76 = arith.constant 4 : index
    %c0_77 = arith.constant 0 : index
    %c0_78 = arith.constant 0 : index
    %92 = vector.load %arg4[%c4_76, %c0_77, %c0_78] : memref<6x9x8xf32, #tpu.memory_space<vmem>>, vector<1x9x8xf32>
    %93 = vector.shape_cast %92 : vector<1x9x8xf32> to vector<9x8xf32>
    %94 = vector.shape_cast %91 : vector<9x8xf32> to vector<1x9x8xf32>
    tpu.vector_store %arg4[%c4_76, %c0_77, %c0_78], %94 {strides = array<i32>} : memref<6x9x8xf32, #tpu.memory_space<vmem>>, vector<1x9x8xf32>,
    %c5 = arith.constant 5 : index
    %c0_79 = arith.constant 0 : index
    %c0_80 = arith.constant 0 : index
    %95 = vector.load %arg0[%c5, %c0_79, %c0_80] : memref<6x9x36xf32, #tpu.memory_space<vmem>>, vector<1x9x36xf32>
    %96 = vector.shape_cast %95 : vector<1x9x36xf32> to vector<9x36xf32>
    %97 = arith.truncf %96 : vector<9x36xf32> to vector<9x36xbf16>
    %c5_81 = arith.constant 5 : index
    %c0_82 = arith.constant 0 : index
    %c0_83 = arith.constant 0 : index
    %98 = vector.load %arg1[%c5_81, %c0_82, %c0_83] : memref<6x36x8xbf16, #tpu.memory_space<vmem>>, vector<1x36x8xbf16>
    %99 = vector.shape_cast %98 : vector<1x36x8xbf16> to vector<36x8xbf16>
    %cst_84 = arith.constant dense<0.000000e+00> : vector<9x8xf32>
    %100 = tpu.matmul %97, %99, %cst_84 {dimension_numbers = #tpu.dot_dimension_numbers<[1], [0], [0], [1], [0, 0, 1, 1], [], []>} : vector<9x36xbf16>, vector<36x8xbf16>, vector<9x8xf32> -> vector<9x8xf32>
    %c5_85 = arith.constant 5 : index
    %c0_86 = arith.constant 0 : index
    %c0_87 = arith.constant 0 : index
    %101 = vector.load %arg2[%c5_85, %c0_86, %c0_87] : memref<6x1x8xf32, #tpu.memory_space<vmem>>, vector<1x1x8xf32>
    %102 = vector.shape_cast %101 : vector<1x1x8xf32> to vector<1x8xf32>
    %103 = vector.broadcast %102 : vector<1x8xf32> to vector<9x8xf32>
    %104 = arith.mulf %100, %103 : vector<9x8xf32>
    %c5_88 = arith.constant 5 : index
    %c0_89 = arith.constant 0 : index
    %c0_90 = arith.constant 0 : index
    %105 = vector.load %arg3[%c5_88, %c0_89, %c0_90] : memref<6x1x8xf32, #tpu.memory_space<vmem>>, vector<1x1x8xf32>
    %106 = vector.shape_cast %105 : vector<1x1x8xf32> to vector<1x8xf32>
    %107 = vector.broadcast %106 : vector<1x8xf32> to vector<9x8xf32>
    %108 = arith.addf %104, %107 : vector<9x8xf32>
    %cst_91 = arith.constant 0.000000e+00 : f32
    %109 = vector.broadcast %cst_91 : f32 to vector<9x8xf32>
    %110 = arith.maximumf %108, %109 : vector<9x8xf32>
    %c5_92 = arith.constant 5 : index
    %c0_93 = arith.constant 0 : index
    %c0_94 = arith.constant 0 : index
    %111 = vector.load %arg4[%c5_92, %c0_93, %c0_94] : memref<6x9x8xf32, #tpu.memory_space<vmem>>, vector<1x9x8xf32>
    %112 = vector.shape_cast %111 : vector<1x9x8xf32> to vector<9x8xf32>
    %113 = vector.shape_cast %110 : vector<9x8xf32> to vector<1x9x8xf32>
    tpu.vector_store %arg4[%c5_92, %c0_93, %c0_94], %113 {strides = array<i32>} : memref<6x9x8xf32, #tpu.memory_space<vmem>>, vector<1x9x8xf32>,
    return
  }
}

module attributes {stable_mosaic.version = 11 : i64} {
  func.func @_fused_tail_kernel(%arg0: memref<6x72xf32, #tpu.memory_space<vmem>>, %arg1: memref<1x3xf32, #tpu.memory_space<vmem>>, %arg2: memref<72x96xbf16, #tpu.memory_space<vmem>>, %arg3: memref<1x96xf32, #tpu.memory_space<vmem>>, %arg4: memref<1x96xf32, #tpu.memory_space<vmem>>, %arg5: memref<96x192xbf16, #tpu.memory_space<vmem>>, %arg6: memref<1x192xf32, #tpu.memory_space<vmem>>, %arg7: memref<192x768xbf16, #tpu.memory_space<vmem>>, %arg8: memref<1x768xf32, #tpu.memory_space<vmem>>, %arg9: memref<3x128xbf16, #tpu.memory_space<vmem>>, %arg10: memref<1x128xf32, #tpu.memory_space<vmem>>, %arg11: memref<1x128xf32, #tpu.memory_space<vmem>>, %arg12: memref<2x128x128xbf16, #tpu.memory_space<vmem>>, %arg13: memref<2x128x128xbf16, #tpu.memory_space<vmem>>, %arg14: memref<128x128xbf16, #tpu.memory_space<vmem>>, %arg15: memref<1x128xf32, #tpu.memory_space<vmem>>, %arg16: memref<128x128xbf16, #tpu.memory_space<vmem>>, %arg17: memref<1x128xf32, #tpu.memory_space<vmem>>, %arg18: memref<128x128xbf16, #tpu.memory_space<vmem>>, %arg19: memref<1x128xf32, #tpu.memory_space<vmem>>, %arg20: memref<128x128xbf16, #tpu.memory_space<vmem>>, %arg21: memref<1x128xf32, #tpu.memory_space<vmem>>, %arg22: memref<128x64xbf16, #tpu.memory_space<vmem>>, %arg23: memref<1x64xf32, #tpu.memory_space<vmem>>, %arg24: memref<64x32xbf16, #tpu.memory_space<vmem>>, %arg25: memref<1x32xf32, #tpu.memory_space<vmem>>, %arg26: memref<32x16xbf16, #tpu.memory_space<vmem>>, %arg27: memref<1x16xf32, #tpu.memory_space<vmem>>, %arg28: memref<16x8xbf16, #tpu.memory_space<vmem>>, %arg29: memref<1x8xf32, #tpu.memory_space<vmem>>, %arg30: memref<8x16xbf16, #tpu.memory_space<vmem>>, %arg31: memref<1x16xf32, #tpu.memory_space<vmem>>, %arg32: memref<1x16xf32, #tpu.memory_space<vmem>>, %arg33: memref<1x128xf32, #tpu.memory_space<vmem>>) attributes {dimension_semantics = [], scalar_prefetch = 0 : i64, scratch_operands = 0 : i64, tpu.core_type = #tpu.core_type<tc>} {
    %c0 = arith.constant 0 : index
    %c0_0 = arith.constant 0 : index
    %0 = vector.load %arg0[%c0, %c0_0] : memref<6x72xf32, #tpu.memory_space<vmem>>, vector<6x72xf32>
    %1 = arith.truncf %0 : vector<6x72xf32> to vector<6x72xbf16>
    %c0_1 = arith.constant 0 : index
    %c0_2 = arith.constant 0 : index
    %2 = vector.load %arg2[%c0_1, %c0_2] : memref<72x96xbf16, #tpu.memory_space<vmem>>, vector<72x96xbf16>
    %cst = arith.constant dense<0.000000e+00> : vector<6x96xf32>
    %3 = tpu.matmul %1, %2, %cst {dimension_numbers = #tpu.dot_dimension_numbers<[1], [0], [0], [1], [0, 0, 1, 1], [], []>} : vector<6x72xbf16>, vector<72x96xbf16>, vector<6x96xf32> -> vector<6x96xf32>
    %c0_3 = arith.constant 0 : index
    %c0_4 = arith.constant 0 : index
    %4 = vector.load %arg3[%c0_3, %c0_4] : memref<1x96xf32, #tpu.memory_space<vmem>>, vector<1x96xf32>
    %5 = vector.broadcast %4 : vector<1x96xf32> to vector<6x96xf32>
    %6 = arith.mulf %3, %5 : vector<6x96xf32>
    %c0_5 = arith.constant 0 : index
    %c0_6 = arith.constant 0 : index
    %7 = vector.load %arg4[%c0_5, %c0_6] : memref<1x96xf32, #tpu.memory_space<vmem>>, vector<1x96xf32>
    %8 = vector.broadcast %7 : vector<1x96xf32> to vector<6x96xf32>
    %9 = arith.addf %6, %8 : vector<6x96xf32>
    %cst_7 = arith.constant 0.000000e+00 : f32
    %10 = vector.broadcast %cst_7 : f32 to vector<6x96xf32>
    %11 = arith.maximumf %9, %10 : vector<6x96xf32>
    %12 = arith.truncf %11 : vector<6x96xf32> to vector<6x96xbf16>
    %c0_8 = arith.constant 0 : index
    %c0_9 = arith.constant 0 : index
    %13 = vector.load %arg5[%c0_8, %c0_9] : memref<96x192xbf16, #tpu.memory_space<vmem>>, vector<96x192xbf16>
    %cst_10 = arith.constant dense<0.000000e+00> : vector<6x192xf32>
    %14 = tpu.matmul %12, %13, %cst_10 {dimension_numbers = #tpu.dot_dimension_numbers<[1], [0], [0], [1], [0, 0, 1, 1], [], []>} : vector<6x96xbf16>, vector<96x192xbf16>, vector<6x192xf32> -> vector<6x192xf32>
    %c0_11 = arith.constant 0 : index
    %c0_12 = arith.constant 0 : index
    %15 = vector.load %arg6[%c0_11, %c0_12] : memref<1x192xf32, #tpu.memory_space<vmem>>, vector<1x192xf32>
    %16 = vector.broadcast %15 : vector<1x192xf32> to vector<6x192xf32>
    %17 = arith.addf %14, %16 : vector<6x192xf32>
    %cst_13 = arith.constant 0.000000e+00 : f32
    %18 = vector.broadcast %cst_13 : f32 to vector<6x192xf32>
    %19 = arith.maximumf %17, %18 : vector<6x192xf32>
    %20 = arith.truncf %19 : vector<6x192xf32> to vector<6x192xbf16>
    %c0_14 = arith.constant 0 : index
    %c0_15 = arith.constant 0 : index
    %21 = vector.load %arg7[%c0_14, %c0_15] : memref<192x768xbf16, #tpu.memory_space<vmem>>, vector<192x768xbf16>
    %cst_16 = arith.constant dense<0.000000e+00> : vector<6x768xf32>
    %22 = tpu.matmul %20, %21, %cst_16 {dimension_numbers = #tpu.dot_dimension_numbers<[1], [0], [0], [1], [0, 0, 1, 1], [], []>} : vector<6x192xbf16>, vector<192x768xbf16>, vector<6x768xf32> -> vector<6x768xf32>
    %c0_17 = arith.constant 0 : index
    %c0_18 = arith.constant 0 : index
    %23 = vector.load %arg8[%c0_17, %c0_18] : memref<1x768xf32, #tpu.memory_space<vmem>>, vector<1x768xf32>
    %24 = vector.broadcast %23 : vector<1x768xf32> to vector<6x768xf32>
    %25 = arith.addf %22, %24 : vector<6x768xf32>
    %c0_19 = arith.constant 0 : index
    %c0_20 = arith.constant 0 : index
    %26 = vector.load %arg1[%c0_19, %c0_20] : memref<1x3xf32, #tpu.memory_space<vmem>>, vector<1x3xf32>
    %27 = arith.truncf %26 : vector<1x3xf32> to vector<1x3xbf16>
    %c0_21 = arith.constant 0 : index
    %c0_22 = arith.constant 0 : index
    %28 = vector.load %arg9[%c0_21, %c0_22] : memref<3x128xbf16, #tpu.memory_space<vmem>>, vector<3x128xbf16>
    %cst_23 = arith.constant dense<0.000000e+00> : vector<1x128xf32>
    %29 = tpu.matmul %27, %28, %cst_23 {dimension_numbers = #tpu.dot_dimension_numbers<[1], [0], [0], [1], [0, 0, 1, 1], [], []>} : vector<1x3xbf16>, vector<3x128xbf16>, vector<1x128xf32> -> vector<1x128xf32>
    %c0_24 = arith.constant 0 : index
    %c0_25 = arith.constant 0 : index
    %30 = vector.load %arg10[%c0_24, %c0_25] : memref<1x128xf32, #tpu.memory_space<vmem>>, vector<1x128xf32>
    %31 = arith.addf %29, %30 : vector<1x128xf32>
    %cst_26 = arith.constant 0.000000e+00 : f32
    %32 = vector.broadcast %cst_26 : f32 to vector<1x128xf32>
    %33 = arith.maximumf %31, %32 : vector<1x128xf32>
    %34 = vector.extract_strided_slice %25 {offsets = [0, 0], sizes = [1, 128], strides = [1, 1]} : vector<6x768xf32> to vector<1x128xf32>
    %35 = arith.maximumf %33, %34 : vector<1x128xf32>
    %36 = vector.extract_strided_slice %25 {offsets = [1, 128], sizes = [1, 128], strides = [1, 1]} : vector<6x768xf32> to vector<1x128xf32>
    %37 = arith.maximumf %35, %36 : vector<1x128xf32>
    %38 = vector.extract_strided_slice %25 {offsets = [2, 256], sizes = [1, 128], strides = [1, 1]} : vector<6x768xf32> to vector<1x128xf32>
    %39 = arith.maximumf %37, %38 : vector<1x128xf32>
    %40 = vector.extract_strided_slice %25 {offsets = [3, 384], sizes = [1, 128], strides = [1, 1]} : vector<6x768xf32> to vector<1x128xf32>
    %41 = arith.maximumf %39, %40 : vector<1x128xf32>
    %42 = vector.extract_strided_slice %25 {offsets = [4, 512], sizes = [1, 128], strides = [1, 1]} : vector<6x768xf32> to vector<1x128xf32>
    %43 = arith.maximumf %41, %42 : vector<1x128xf32>
    %44 = vector.extract_strided_slice %25 {offsets = [5, 640], sizes = [1, 128], strides = [1, 1]} : vector<6x768xf32> to vector<1x128xf32>
    %45 = arith.maximumf %43, %44 : vector<1x128xf32>
    %c0_27 = arith.constant 0 : index
    %c0_28 = arith.constant 0 : index
    %46 = vector.load %arg11[%c0_27, %c0_28] : memref<1x128xf32, #tpu.memory_space<vmem>>, vector<1x128xf32>
    %47 = arith.truncf %46 : vector<1x128xf32> to vector<1x128xbf16>
    %c0_29 = arith.constant 0 : index
    %c0_30 = arith.constant 0 : index
    %c0_31 = arith.constant 0 : index
    %48 = vector.load %arg12[%c0_29, %c0_30, %c0_31] : memref<2x128x128xbf16, #tpu.memory_space<vmem>>, vector<1x128x128xbf16>
    %49 = vector.shape_cast %48 : vector<1x128x128xbf16> to vector<128x128xbf16>
    %cst_32 = arith.constant dense<0.000000e+00> : vector<1x128xf32>
    %50 = tpu.matmul %47, %49, %cst_32 {dimension_numbers = #tpu.dot_dimension_numbers<[1], [0], [0], [1], [0, 0, 1, 1], [], []>} : vector<1x128xbf16>, vector<128x128xbf16>, vector<1x128xf32> -> vector<1x128xf32>
    %51 = arith.addf %45, %50 : vector<1x128xf32>
    %52 = arith.truncf %51 : vector<1x128xf32> to vector<1x128xbf16>
    %c0_33 = arith.constant 0 : index
    %c0_34 = arith.constant 0 : index
    %c0_35 = arith.constant 0 : index
    %53 = vector.load %arg13[%c0_33, %c0_34, %c0_35] : memref<2x128x128xbf16, #tpu.memory_space<vmem>>, vector<1x128x128xbf16>
    %54 = vector.shape_cast %53 : vector<1x128x128xbf16> to vector<128x128xbf16>
    %cst_36 = arith.constant dense<0.000000e+00> : vector<1x128xf32>
    %55 = tpu.matmul %52, %54, %cst_36 {dimension_numbers = #tpu.dot_dimension_numbers<[1], [0], [0], [1], [0, 0, 1, 1], [], []>} : vector<1x128xbf16>, vector<128x128xbf16>, vector<1x128xf32> -> vector<1x128xf32>
    %cst_37 = arith.constant 0.000000e+00 : f32
    %56 = vector.broadcast %cst_37 : f32 to vector<1x128xf32>
    %57 = arith.maximumf %55, %56 : vector<1x128xf32>
    %58 = arith.truncf %57 : vector<1x128xf32> to vector<1x128xbf16>
    %c1 = arith.constant 1 : index
    %c0_38 = arith.constant 0 : index
    %c0_39 = arith.constant 0 : index
    %59 = vector.load %arg12[%c1, %c0_38, %c0_39] : memref<2x128x128xbf16, #tpu.memory_space<vmem>>, vector<1x128x128xbf16>
    %60 = vector.shape_cast %59 : vector<1x128x128xbf16> to vector<128x128xbf16>
    %cst_40 = arith.constant dense<0.000000e+00> : vector<1x128xf32>
    %61 = tpu.matmul %58, %60, %cst_40 {dimension_numbers = #tpu.dot_dimension_numbers<[1], [0], [0], [1], [0, 0, 1, 1], [], []>} : vector<1x128xbf16>, vector<128x128xbf16>, vector<1x128xf32> -> vector<1x128xf32>
    %62 = arith.addf %45, %61 : vector<1x128xf32>
    %63 = arith.truncf %62 : vector<1x128xf32> to vector<1x128xbf16>
    %c1_41 = arith.constant 1 : index
    %c0_42 = arith.constant 0 : index
    %c0_43 = arith.constant 0 : index
    %64 = vector.load %arg13[%c1_41, %c0_42, %c0_43] : memref<2x128x128xbf16, #tpu.memory_space<vmem>>, vector<1x128x128xbf16>
    %65 = vector.shape_cast %64 : vector<1x128x128xbf16> to vector<128x128xbf16>
    %cst_44 = arith.constant dense<0.000000e+00> : vector<1x128xf32>
    %66 = tpu.matmul %63, %65, %cst_44 {dimension_numbers = #tpu.dot_dimension_numbers<[1], [0], [0], [1], [0, 0, 1, 1], [], []>} : vector<1x128xbf16>, vector<128x128xbf16>, vector<1x128xf32> -> vector<1x128xf32>
    %cst_45 = arith.constant 0.000000e+00 : f32
    %67 = vector.broadcast %cst_45 : f32 to vector<1x128xf32>
    %68 = arith.maximumf %66, %67 : vector<1x128xf32>
    %c0_46 = arith.constant 0 : index
    %c0_47 = arith.constant 0 : index
    %69 = vector.load %arg33[%c0_46, %c0_47] : memref<1x128xf32, #tpu.memory_space<vmem>>, vector<1x128xf32>
    tpu.vector_store %arg33[%c0_46, %c0_47], %68 {strides = array<i32>} : memref<1x128xf32, #tpu.memory_space<vmem>>, vector<1x128xf32>,
    %70 = arith.truncf %68 : vector<1x128xf32> to vector<1x128xbf16>
    %c0_48 = arith.constant 0 : index
    %c0_49 = arith.constant 0 : index
    %71 = vector.load %arg14[%c0_48, %c0_49] : memref<128x128xbf16, #tpu.memory_space<vmem>>, vector<128x128xbf16>
    %cst_50 = arith.constant dense<0.000000e+00> : vector<1x128xf32>
    %72 = tpu.matmul %70, %71, %cst_50 {dimension_numbers = #tpu.dot_dimension_numbers<[1], [0], [0], [1], [0, 0, 1, 1], [], []>} : vector<1x128xbf16>, vector<128x128xbf16>, vector<1x128xf32> -> vector<1x128xf32>
    %c0_51 = arith.constant 0 : index
    %c0_52 = arith.constant 0 : index
    %73 = vector.load %arg15[%c0_51, %c0_52] : memref<1x128xf32, #tpu.memory_space<vmem>>, vector<1x128xf32>
    %74 = arith.addf %72, %73 : vector<1x128xf32>
    %75 = arith.addf %45, %74 : vector<1x128xf32>
    %76 = arith.truncf %75 : vector<1x128xf32> to vector<1x128xbf16>
    %c0_53 = arith.constant 0 : index
    %c0_54 = arith.constant 0 : index
    %77 = vector.load %arg16[%c0_53, %c0_54] : memref<128x128xbf16, #tpu.memory_space<vmem>>, vector<128x128xbf16>
    %cst_55 = arith.constant dense<0.000000e+00> : vector<1x128xf32>
    %78 = tpu.matmul %76, %77, %cst_55 {dimension_numbers = #tpu.dot_dimension_numbers<[1], [0], [0], [1], [0, 0, 1, 1], [], []>} : vector<1x128xbf16>, vector<128x128xbf16>, vector<1x128xf32> -> vector<1x128xf32>
    %c0_56 = arith.constant 0 : index
    %c0_57 = arith.constant 0 : index
    %79 = vector.load %arg17[%c0_56, %c0_57] : memref<1x128xf32, #tpu.memory_space<vmem>>, vector<1x128xf32>
    %80 = arith.addf %78, %79 : vector<1x128xf32>
    %cst_58 = arith.constant 0.000000e+00 : f32
    %81 = vector.broadcast %cst_58 : f32 to vector<1x128xf32>
    %82 = arith.maximumf %80, %81 : vector<1x128xf32>
    %83 = arith.truncf %82 : vector<1x128xf32> to vector<1x128xbf16>
    %c0_59 = arith.constant 0 : index
    %c0_60 = arith.constant 0 : index
    %84 = vector.load %arg18[%c0_59, %c0_60] : memref<128x128xbf16, #tpu.memory_space<vmem>>, vector<128x128xbf16>
    %cst_61 = arith.constant dense<0.000000e+00> : vector<1x128xf32>
    %85 = tpu.matmul %83, %84, %cst_61 {dimension_numbers = #tpu.dot_dimension_numbers<[1], [0], [0], [1], [0, 0, 1, 1], [], []>} : vector<1x128xbf16>, vector<128x128xbf16>, vector<1x128xf32> -> vector<1x128xf32>
    %c0_62 = arith.constant 0 : index
    %c0_63 = arith.constant 0 : index
    %86 = vector.load %arg19[%c0_62, %c0_63] : memref<1x128xf32, #tpu.memory_space<vmem>>, vector<1x128xf32>
    %87 = arith.addf %85, %86 : vector<1x128xf32>
    %cst_64 = arith.constant 0.000000e+00 : f32
    %88 = vector.broadcast %cst_64 : f32 to vector<1x128xf32>
    %89 = arith.maximumf %87, %88 : vector<1x128xf32>
    %90 = arith.truncf %89 : vector<1x128xf32> to vector<1x128xbf16>
    %c0_65 = arith.constant 0 : index
    %c0_66 = arith.constant 0 : index
    %91 = vector.load %arg20[%c0_65, %c0_66] : memref<128x128xbf16, #tpu.memory_space<vmem>>, vector<128x128xbf16>
    %cst_67 = arith.constant dense<0.000000e+00> : vector<1x128xf32>
    %92 = tpu.matmul %90, %91, %cst_67 {dimension_numbers = #tpu.dot_dimension_numbers<[1], [0], [0], [1], [0, 0, 1, 1], [], []>} : vector<1x128xbf16>, vector<128x128xbf16>, vector<1x128xf32> -> vector<1x128xf32>
    %c0_68 = arith.constant 0 : index
    %c0_69 = arith.constant 0 : index
    %93 = vector.load %arg21[%c0_68, %c0_69] : memref<1x128xf32, #tpu.memory_space<vmem>>, vector<1x128xf32>
    %94 = arith.addf %92, %93 : vector<1x128xf32>
    %cst_70 = arith.constant 0.000000e+00 : f32
    %95 = vector.broadcast %cst_70 : f32 to vector<1x128xf32>
    %96 = arith.maximumf %94, %95 : vector<1x128xf32>
    %97 = arith.truncf %96 : vector<1x128xf32> to vector<1x128xbf16>
    %c0_71 = arith.constant 0 : index
    %c0_72 = arith.constant 0 : index
    %98 = vector.load %arg22[%c0_71, %c0_72] : memref<128x64xbf16, #tpu.memory_space<vmem>>, vector<128x64xbf16>
    %cst_73 = arith.constant dense<0.000000e+00> : vector<1x64xf32>
    %99 = tpu.matmul %97, %98, %cst_73 {dimension_numbers = #tpu.dot_dimension_numbers<[1], [0], [0], [1], [0, 0, 1, 1], [], []>} : vector<1x128xbf16>, vector<128x64xbf16>, vector<1x64xf32> -> vector<1x64xf32>
    %c0_74 = arith.constant 0 : index
    %c0_75 = arith.constant 0 : index
    %100 = vector.load %arg23[%c0_74, %c0_75] : memref<1x64xf32, #tpu.memory_space<vmem>>, vector<1x64xf32>
    %101 = arith.addf %99, %100 : vector<1x64xf32>
    %cst_76 = arith.constant 0.000000e+00 : f32
    %102 = vector.broadcast %cst_76 : f32 to vector<1x64xf32>
    %103 = arith.maximumf %101, %102 : vector<1x64xf32>
    %104 = arith.truncf %103 : vector<1x64xf32> to vector<1x64xbf16>
    %c0_77 = arith.constant 0 : index
    %c0_78 = arith.constant 0 : index
    %105 = vector.load %arg24[%c0_77, %c0_78] : memref<64x32xbf16, #tpu.memory_space<vmem>>, vector<64x32xbf16>
    %cst_79 = arith.constant dense<0.000000e+00> : vector<1x32xf32>
    %106 = tpu.matmul %104, %105, %cst_79 {dimension_numbers = #tpu.dot_dimension_numbers<[1], [0], [0], [1], [0, 0, 1, 1], [], []>} : vector<1x64xbf16>, vector<64x32xbf16>, vector<1x32xf32> -> vector<1x32xf32>
    %c0_80 = arith.constant 0 : index
    %c0_81 = arith.constant 0 : index
    %107 = vector.load %arg25[%c0_80, %c0_81] : memref<1x32xf32, #tpu.memory_space<vmem>>, vector<1x32xf32>
    %108 = arith.addf %106, %107 : vector<1x32xf32>
    %cst_82 = arith.constant 0.000000e+00 : f32
    %109 = vector.broadcast %cst_82 : f32 to vector<1x32xf32>
    %110 = arith.maximumf %108, %109 : vector<1x32xf32>
    %111 = arith.truncf %110 : vector<1x32xf32> to vector<1x32xbf16>
    %c0_83 = arith.constant 0 : index
    %c0_84 = arith.constant 0 : index
    %112 = vector.load %arg26[%c0_83, %c0_84] : memref<32x16xbf16, #tpu.memory_space<vmem>>, vector<32x16xbf16>
    %cst_85 = arith.constant dense<0.000000e+00> : vector<1x16xf32>
    %113 = tpu.matmul %111, %112, %cst_85 {dimension_numbers = #tpu.dot_dimension_numbers<[1], [0], [0], [1], [0, 0, 1, 1], [], []>} : vector<1x32xbf16>, vector<32x16xbf16>, vector<1x16xf32> -> vector<1x16xf32>
    %c0_86 = arith.constant 0 : index
    %c0_87 = arith.constant 0 : index
    %114 = vector.load %arg27[%c0_86, %c0_87] : memref<1x16xf32, #tpu.memory_space<vmem>>, vector<1x16xf32>
    %115 = arith.addf %113, %114 : vector<1x16xf32>
    %cst_88 = arith.constant 0.000000e+00 : f32
    %116 = vector.broadcast %cst_88 : f32 to vector<1x16xf32>
    %117 = arith.maximumf %115, %116 : vector<1x16xf32>
    %118 = arith.truncf %117 : vector<1x16xf32> to vector<1x16xbf16>
    %c0_89 = arith.constant 0 : index
    %c0_90 = arith.constant 0 : index
    %119 = vector.load %arg28[%c0_89, %c0_90] : memref<16x8xbf16, #tpu.memory_space<vmem>>, vector<16x8xbf16>
    %cst_91 = arith.constant dense<0.000000e+00> : vector<1x8xf32>
    %120 = tpu.matmul %118, %119, %cst_91 {dimension_numbers = #tpu.dot_dimension_numbers<[1], [0], [0], [1], [0, 0, 1, 1], [], []>} : vector<1x16xbf16>, vector<16x8xbf16>, vector<1x8xf32> -> vector<1x8xf32>
    %c0_92 = arith.constant 0 : index
    %c0_93 = arith.constant 0 : index
    %121 = vector.load %arg29[%c0_92, %c0_93] : memref<1x8xf32, #tpu.memory_space<vmem>>, vector<1x8xf32>
    %122 = arith.addf %120, %121 : vector<1x8xf32>
    %cst_94 = arith.constant 0.000000e+00 : f32
    %123 = vector.broadcast %cst_94 : f32 to vector<1x8xf32>
    %124 = arith.maximumf %122, %123 : vector<1x8xf32>
    %125 = arith.truncf %124 : vector<1x8xf32> to vector<1x8xbf16>
    %c0_95 = arith.constant 0 : index
    %c0_96 = arith.constant 0 : index
    %126 = vector.load %arg30[%c0_95, %c0_96] : memref<8x16xbf16, #tpu.memory_space<vmem>>, vector<8x16xbf16>
    %cst_97 = arith.constant dense<0.000000e+00> : vector<1x16xf32>
    %127 = tpu.matmul %125, %126, %cst_97 {dimension_numbers = #tpu.dot_dimension_numbers<[1], [0], [0], [1], [0, 0, 1, 1], [], []>} : vector<1x8xbf16>, vector<8x16xbf16>, vector<1x16xf32> -> vector<1x16xf32>
    %c0_98 = arith.constant 0 : index
    %c0_99 = arith.constant 0 : index
    %128 = vector.load %arg31[%c0_98, %c0_99] : memref<1x16xf32, #tpu.memory_space<vmem>>, vector<1x16xf32>
    %129 = arith.addf %127, %128 : vector<1x16xf32>
    %c0_100 = arith.constant 0 : index
    %c0_101 = arith.constant 0 : index
    %130 = vector.load %arg32[%c0_100, %c0_101] : memref<1x16xf32, #tpu.memory_space<vmem>>, vector<1x16xf32>
    tpu.vector_store %arg32[%c0_100, %c0_101], %129 {strides = array<i32>} : memref<1x16xf32, #tpu.memory_space<vmem>>, vector<1x16xf32>,
    return
  }
}

</mosaic_0001>

<bundles_post_ra>
// kernel: brain_forward.3
= control target key start
LH: loop header
LB: loop body
LE: loop exit
PB: predicated region body
PF: predicated region fallthrough
CT: control target
= control target key end

     0   :  { %vm57_vm0 = vcmask 1044480   ;;  %vm58_vm1 = vcmask 1045504   ;;  %v1205_v1 = vmov 65535   ;;  %vm44_vm2 = vcmask 220160   ;;  %s1728_s1 = inlined_call_operand.vmem [shape: bf16[6,27,4], index: 1, kind: input, shape index: {}]   ;;  %s1729_s0 = inlined_call_operand.vmem [shape: f32[6,49,27], index: 0, kind: input, shape index: {}]   ;;  %s1730_s2 = inlined_call_operand.vmem [shape: f32[6,1,4], index: 2, kind: input, shape index: {}]   ;;  %s1731_s3 = inlined_call_operand.vmem [shape: f32[6,1,4], index: 3, kind: input, shape index: {}]   ;;  %s1732_s4 = inlined_call_operand.vmem [shape: f32[6,49,4], index: 4, kind: output, shape index: {}]  }
   0x1   :  { %v1193_v0 = vld [vmem:[%s1728_s1] sm:$0xff]   ;;  %v59_v2 = vsel %vm57_vm0, 4294967295, %v1205_v1  ;;  %v1194_v3 = vld [vmem:[%s1728_s1 + $0x10] sm:$0xff]   ;;  %v1195_v5 = vld [vmem:[%s1728_s1 + $0x8] sm:$0x3f]   ;;  %vm163_vm3 = vcmask 31744  }
   0x2   :  { %v1237_v4 = vsel %vm58_vm1, %v59_v2, 0  ;;  %1120 = vmatprep.subr.bf16.mxu0 %v1193_v0  ;;  %1132 = vmatprep.subr.bf16.mxu1 %v1194_v3  ;;  %v1196_v6 = vld [vmem:[%s1728_s1 + $0x18] sm:$0x3f]   ;;  %v18_v8 = vld [vmem:[%s1729_s0] sm:$0xff]  ;;  %v19_v9 = vld [vmem:[%s1729_s0 + $0x8] sm:$0xff]  ;;  %vm170_vm4 = vcmask 24576  }
   0x3   :  { %1121 = vmatpush3.bf16.msra.mxu0 %v1193_v0  ;;  %1133 = vmatpush3.bf16.msra.mxu1 %v1194_v3  ;;  %v62_v7 = vand.u32 %v1195_v5, %v1237_v4  ;;  %v944_v10 = vld [vmem:[%s1729_s0 + $0x38] sm:$0xff]  ;;  %v213_v11 = vand.u32 %v1196_v6, %v1237_v4  ;;  %v25_v12 = vpack.c.bf16 %v19_v9, %v18_v8  ;;  %v945_v13 = vld [vmem:[%s1729_s0 + $0x40] sm:$0xff]  ;;  %v20_v14 = vld [vmem:[%s1729_s0 + $0x10] sm:$0xff] }
   0x4   :  { %v21_v15 = vld [vmem:[%s1729_s0 + $0x18] sm:$0xff]  ;;  %v180_v16 = vpack.c.bf16 %v945_v13, %v944_v10  ;;  %v946_v18 = vld [vmem:[%s1729_s0 + $0x48] sm:$0xff]  ;;  %v947_v19 = vld [vmem:[%s1729_s0 + $0x50] sm:$0xff] }
   0x5   :  { %1122 = vmatprep.subr.bf16.mxu0 %v62_v7  ;;  %v26_v17 = vpack.c.bf16 %v21_v15, %v20_v14  ;;  %1134 = vmatprep.subr.bf16.mxu1 %v213_v11  ;;  %v181_v20 = vpack.c.bf16 %v947_v19, %v946_v18  ;;  %v1197_v21 = vld [vmem:[%s1728_s1 + $0x20] sm:$0xff]   ;;  %v1198_v22 = vld [vmem:[%s1728_s1 + $0x30] sm:$0xff]   ;;  %v23_v24 = vld [vmem:[%s1729_s0 + $0x28] sm:$0xff] }
   0x6   :  { %1124 = vmatprep.mubr.msk.bf16.mxu0 %vm44_vm2, %v25_v12  ;;  %v22_v23 = vld [vmem:[%s1729_s0 + $0x20] sm:$0xff]  ;;  %1136 = vmatprep.mubr.msk.bf16.mxu1 %vm44_vm2, %v180_v16  ;;  %v948_v25 = vld [vmem:[%s1729_s0 + $0x58] sm:$0xff]  ;;  %v24_v29 = vld [vmem:[%s1729_s0 + $0x30] sm:$0x1] }
   0x7   :  { %1123 = vmatpush3.bf16.msra.mxu0 %v62_v7  ;;  %1135 = vmatpush3.bf16.msra.mxu1 %v213_v11  ;;  %v949_v26 = vld [vmem:[%s1729_s0 + $0x60] sm:$0xff]  ;;  %v27_v27 = vpack.c.bf16 %v23_v24, %v22_v23  ;;  %v950_v30 = vld [vmem:[%s1729_s0 + $0x68] sm:$0x1]  ;;  %v1200_v32 = vld [vmem:[%s1728_s1 + $0x38] sm:$0x3f]   ;;  %v28_v38 = vpack.c.bf16 %v24_v29, %v24_v29 }
   0x8   :  { %1144 = vmatprep.subr.bf16.mxu0 %v1197_v21  ;;  %1156 = vmatprep.subr.bf16.mxu1 %v1198_v22  ;;  %v182_v28 = vpack.c.bf16 %v949_v26, %v948_v25  ;;  %v1199_v31 = vld [vmem:[%s1728_s1 + $0x28] sm:$0x3f]   ;;  %v972_v33 = vld [vmem:[%s1729_s0 + $0x70] sm:$0xff]  ;;  %v973_v35 = vld [vmem:[%s1729_s0 + $0x78] sm:$0xff]  ;;  %v517_v39 = vand.u32 %v1200_v32, %v1237_v4  ;;  %v183_v40 = vpack.c.bf16 %v950_v30, %v950_v30 }
   0x9   :  { %v365_v34 = vand.u32 %v1199_v31, %v1237_v4  ;;  %v1000_v36 = vld [vmem:[%s1729_s0 + $0xa8] sm:$0xff]  ;;  %v1001_v37 = vld [vmem:[%s1729_s0 + $0xb0] sm:$0xff]  ;;  %v332_v41 = vpack.c.bf16 %v973_v35, %v972_v33  ;;  %v1201_v43 = vld [vmem:[%s1728_s1 + $0x40] sm:$0xff]  }
   0xa   :  { %1125 = vmatmul.mubr.msk.bf16.vlgmr.msra.gmra.mrb[0].mxu0 %vm44_vm2, %v26_v17  ;;  %1137 = vmatmul.mubr.msk.bf16.vlgmr.msra.gmra.mrb[0].mxu1 %vm44_vm2, %v181_v20  ;;  %v484_v42 = vpack.c.bf16 %v1001_v37, %v1000_v36  ;;  %v1202_v44 = vld [vmem:[%s1728_s1 + $0x50] sm:$0xff]   ;;  %v974_v45 = vld [vmem:[%s1729_s0 + $0x80] sm:$0xff]  ;;  %v975_v46 = vld [vmem:[%s1729_s0 + $0x88] sm:$0xff] }
   0xb   :  { %1145 = vmatpush3.bf16.msra.mxu0 %v1197_v21  ;;  %1157 = vmatpush3.bf16.msra.mxu1 %v1198_v22  ;;  %v1002_v47 = vld [vmem:[%s1729_s0 + $0xb8] sm:$0xff]  ;;  %v1003_v48 = vld [vmem:[%s1729_s0 + $0xc0] sm:$0xff]  ;;  %v976_v49 = vld [vmem:[%s1729_s0 + $0x90] sm:$0xff]  ;;  %v333_v52 = vpack.c.bf16 %v975_v46, %v974_v45 }
   0xc   :  { %1128 = vmatprep.mubr.msk.bf16.mxu0 %vm44_vm2, %v27_v27  ;;  %1140 = vmatprep.mubr.msk.bf16.mxu1 %vm44_vm2, %v182_v28  ;;  %v977_v50 = vld [vmem:[%s1729_s0 + $0x98] sm:$0xff]  ;;  %v1203_v51 = vld [vmem:[%s1728_s1 + $0x48] sm:$0x3f]   ;;  %v1005_v54 = vld [vmem:[%s1729_s0 + $0xd0] sm:$0xff]  ;;  %v485_v56 = vpack.c.bf16 %v1003_v48, %v1002_v47 }
   0xd   :  { %1146 = vmatprep.subr.bf16.mxu0 %v365_v34  ;;  %1158 = vmatprep.subr.bf16.mxu1 %v517_v39  ;;  %v1004_v53 = vld [vmem:[%s1729_s0 + $0xc8] sm:$0xff]  ;;  %v1204_v55 = vld [vmem:[%s1728_s1 + $0x58] sm:$0x3f]   ;;  %v334_v57 = vpack.c.bf16 %v977_v50, %v976_v49  ;;  %v669_v59 = vand.u32 %v1203_v51, %v1237_v4  ;;  %v978_v61 = vld [vmem:[%s1729_s0 + $0xa0] sm:$0x1] }
   0xe   :  { %v486_v58 = vpack.c.bf16 %v1005_v54, %v1004_v53  ;;  %v821_v60 = vand.u32 %v1204_v55, %v1237_v4  ;;  %v1006_v62 = vld [vmem:[%s1729_s0 + $0xd8] sm:$0x1]  ;;  %v1028_v63 = vld [vmem:[%s1729_s0 + $0xe0] sm:$0xff]  ;;  %v1029_v0 = vld [vmem:[%s1729_s0 + $0xe8] sm:$0xff]  ;;  %v335_v3 = vpack.c.bf16 %v978_v61, %v978_v61 }
   0xf   :  { %1147 = vmatpush3.bf16.msra.mxu0 %v365_v34  ;;  %1159 = vmatpush3.bf16.msra.mxu1 %v517_v39  ;;  %v1056_v1 = vld [vmem:[%s1729_s0 + $0x118] sm:$0xff]  ;;  %v1057_v2 = vld [vmem:[%s1729_s0 + $0x120] sm:$0xff]  ;;  %v487_v4 = vpack.c.bf16 %v1006_v62, %v1006_v62  ;;  %v636_v5 = vpack.c.bf16 %v1029_v0, %v1028_v63  ;;  %v1030_v7 = vld [vmem:[%s1729_s0 + $0xf0] sm:$0xff] }
  0x10   :  { %1168 = vmatprep.subr.bf16.mxu0 %v1201_v43  ;;  %1180 = vmatprep.subr.bf16.mxu1 %v1202_v44  ;;  %v788_v6 = vpack.c.bf16 %v1057_v2, %v1056_v1  ;;  %v1031_v8 = vld [vmem:[%s1729_s0 + $0xf8] sm:$0xff]  ;;  %v1058_v9 = vld [vmem:[%s1729_s0 + $0x128] sm:$0xff]  ;;  %v1059_v10 = vld [vmem:[%s1729_s0 + $0x130] sm:$0xff] }
  0x11   :  { %v1032_v11 = vld [vmem:[%s1729_s0 + $0x100] sm:$0xff]  ;;  %v1033_v12 = vld [vmem:[%s1729_s0 + $0x108] sm:$0xff]  ;;  %v1060_v13 = vld [vmem:[%s1729_s0 + $0x138] sm:$0xff]  ;;  %v637_v15 = vpack.c.bf16 %v1031_v8, %v1030_v7  ;;  %v789_v16 = vpack.c.bf16 %v1059_v10, %v1058_v9 }
  0x12   :  { %1129 = vmatmul.mubr.msk.bf16.gmra.mrb[4].mxu0 %vm44_vm2, %v28_v38  ;;  %1141 = vmatmul.mubr.msk.bf16.gmra.mrb[4].mxu1 %vm44_vm2, %v183_v40  ;;  %v1061_v14 = vld [vmem:[%s1729_s0 + $0x140] sm:$0xff]  ;;  %v638_v17 = vpack.c.bf16 %v1033_v12, %v1032_v11  ;;  %v1034_v19 = vld [vmem:[%s1729_s0 + $0x110] sm:$0x1]  ;;  %v1062_v20 = vld [vmem:[%s1729_s0 + $0x148] sm:$0x1] }
  0x13   :  { %1148 = vmatprep.mubr.msk.bf16.mxu0 %vm44_vm2, %v332_v41  ;;  %1160 = vmatprep.mubr.msk.bf16.mxu1 %vm44_vm2, %v484_v42  ;;  %v790_v18 = vpack.c.bf16 %v1061_v14, %v1060_v13  ;;  %v639_v21 = vpack.c.bf16 %v1034_v19, %v1034_v19  ;;  %v791_v22 = vpack.c.bf16 %v1062_v20, %v1062_v20  ;;  %v942_v23 = vld [vmem:[%s1730_s2] ss:$0 sm:$0xff]  ;;  %v1431_v24 = vld [vmem:[%s1730_s2 + $0x1] ss:$0 sm:$0xff]  ;;  %v1508_v20 = vld [vmem:[%s1730_s2 + $0x3] ss:$0 sm:$0xff] }
  0x14   :  { %v1436_v26 = vld [vmem:[%s1731_s3] ss:$0 sm:$0xff]  ;;  %v1441_v29 = vld [vmem:[%s1731_s3 + $0x1] ss:$0 sm:$0xff] }
  0x1a   :  { %1149 = vmatmul.mubr.msk.bf16.vlgmr.msra.gmra.mrb[8].mxu0 %vm44_vm2, %v333_v52  ;;  %1161 = vmatmul.mubr.msk.bf16.vlgmr.msra.gmra.mrb[8].mxu1 %vm44_vm2, %v485_v56 }
  0x1b   :  { %1169 = vmatpush3.bf16.msra.mxu0 %v1201_v43  ;;  %1181 = vmatpush3.bf16.msra.mxu1 %v1202_v44 }
  0x1c   :  { %1152 = vmatprep.mubr.msk.bf16.mxu0 %vm44_vm2, %v334_v57  ;;  %1164 = vmatprep.mubr.msk.bf16.mxu1 %vm44_vm2, %v486_v58 }
  0x1d   :  { %1170 = vmatprep.subr.bf16.mxu0 %v669_v59  ;;  %1182 = vmatprep.subr.bf16.mxu1 %v821_v60 }
  0x1f   :  { %1171 = vmatpush3.bf16.msra.mxu0 %v669_v59  ;;  %1183 = vmatpush3.bf16.msra.mxu1 %v821_v60 }
  0x22   :  { %1153 = vmatmul.mubr.msk.bf16.gmra.mrb[12].mxu0 %vm44_vm2, %v335_v3  ;;  %1165 = vmatmul.mubr.msk.bf16.gmra.mrb[12].mxu1 %vm44_vm2, %v487_v4 }
  0x23   :  { %1172 = vmatprep.mubr.msk.bf16.mxu0 %vm44_vm2, %v636_v5  ;;  %1184 = vmatprep.mubr.msk.bf16.mxu1 %vm44_vm2, %v788_v6 }
  0x2a   :  { %1173 = vmatmul.mubr.msk.bf16.vlgmr.msra.gmra.mrb[16].mxu0 %vm44_vm2, %v637_v15  ;;  %1185 = vmatmul.mubr.msk.bf16.vlgmr.msra.gmra.mrb[16].mxu1 %vm44_vm2, %v789_v16 }
  0x2b   :  { %1176 = vmatprep.mubr.msk.bf16.mxu0 %vm44_vm2, %v638_v17  ;;  %1188 = vmatprep.mubr.msk.bf16.mxu1 %vm44_vm2, %v790_v18  ;;  %v1498_v17 = vld [vmem:[%s1730_s2 + $0x2] ss:$0 sm:$0xff] }
  0x32   :  { %1177 = vmatmul.mubr.msk.bf16.gmra.mrb[20].mxu0 %vm44_vm2, %v639_v21  ;;  %1189 = vmatmul.mubr.msk.bf16.gmra.mrb[20].mxu1 %vm44_vm2, %v791_v22 }
  0xdd   :  { %v1126_v25 = vpop.f32.mrb[0].mxu0  ;;  %v1138_v28 = vpop.f32.mrb[0].mxu1 }
  0xde   :  { %v137_v27 = vmul.f32 %v1126_v25, %v942_v23  ;;  %v98_v30 = vpop.f32.mrb[1].mxu0  ;;  %v289_v31 = vmul.f32 %v1138_v28, %v1431_v24  ;;  %v249_v33 = vpop.f32.mrb[1].mxu1 }
  0xdf   :  { %v135_v32 = vmul.f32 %v942_v23, %v98_v30  ;;  %v1127_v34 = vpop.f32.mrb[2].mxu0  ;;  %v287_v36 = vmul.f32 %v1431_v24, %v249_v33  ;;  %v1139_v38 = vpop.f32.mrb[2].mxu1 }
  0xe0   :  { %v151_v35 = vadd.f32 %v1436_v26, %v137_v27  ;;  %v138_v37 = vmul.f32 %v1127_v34, %v942_v23  ;;  %v101_v39 = vpop.f32.mrb[3].mxu0  ;;  %v304_v40 = vadd.f32 %v1441_v29, %v289_v31  ;;  %v290_v42 = vmul.f32 %v1139_v38, %v1431_v24  ;;  %v252_v44 = vpop.f32.mrb[3].mxu1  ;;  %v1531_v27 = vld [vmem:[%s1731_s3 + $0x3] ss:$0 sm:$0xff] }
  0xe1   :  { %v149_v41 = vadd.f32 %v1436_v26, %v135_v32  ;;  %v136_v43 = vmul.f32 %v942_v23, %v101_v39  ;;  %v302_v46 = vadd.f32 %v1441_v29, %v287_v36  ;;  %v288_v48 = vmul.f32 %v1431_v24, %v252_v44 }
  0xe2   :  { %v158_v45 = vmax.f32 %v151_v35, 0.0  ;;  %v152_v47 = vadd.f32 %v1436_v26, %v138_v37  ;;  %v311_v49 = vmax.f32 %v304_v40, 0.0  ;;  %v305_v51 = vadd.f32 %v1441_v29, %v290_v42 }
  0xe3   :  { %v156_v50 = vmax.f32 %v149_v41, 0.0  ;;  %v150_v52 = vadd.f32 %v1436_v26, %v136_v43  ;;  %v309_v53 = vmax.f32 %v302_v46, 0.0  ;;  %v303_v55 = vadd.f32 %v1441_v29, %v288_v48 }
  0xe4   :  { %166 = vst.msk [vmem:[%s1732_s4 + $0x10] sm:$0xff] %vm163_vm3, %v158_v45  ;;  %v159_v54 = vmax.f32 %v152_v47, 0.0  ;;  %967 = vst.msk [vmem:[%s1732_s4 + $0x48] sm:$0xff] %vm163_vm3, %v311_v49  ;;  %v312_v56 = vmax.f32 %v305_v51, 0.0 }
  0xe5   :  { %164 = vst.msk [vmem:[%s1732_s4] sm:$0xff] %vm163_vm3, %v156_v50  ;;  %v157_v57 = vmax.f32 %v150_v52, 0.0  ;;  %v1130_v58 = vpop.f32.mrb[4].mxu0  ;;  %965 = vst.msk [vmem:[%s1732_s4 + $0x38] sm:$0xff] %vm163_vm3, %v309_v53  ;;  %v310_v59 = vmax.f32 %v303_v55, 0.0  ;;  %v1142_v61 = vpop.f32.mrb[4].mxu1 }
  0xe6   :  { %167 = vst.msk [vmem:[%s1732_s4 + $0x18] sm:$0xff] %vm163_vm3, %v159_v54  ;;  %v141_v60 = vmul.f32 %v1130_v58, %v942_v23  ;;  %v114_v62 = vpop.f32.mrb[5].mxu0  ;;  %968 = vst.msk [vmem:[%s1732_s4 + $0x50] sm:$0xff] %vm163_vm3, %v312_v56  ;;  %v293_v63 = vmul.f32 %v1142_v61, %v1431_v24  ;;  %v265_v1 = vpop.f32.mrb[5].mxu1 }
  0xe7   :  { %165 = vst.msk [vmem:[%s1732_s4 + $0x8] sm:$0xff] %vm163_vm3, %v157_v57  ;;  %v139_v0 = vmul.f32 %v942_v23, %v114_v62  ;;  %v1131_v2 = vpop.f32.mrb[6].mxu0  ;;  %966 = vst.msk [vmem:[%s1732_s4 + $0x40] sm:$0xff] %vm163_vm3, %v310_v59  ;;  %v291_v4 = vmul.f32 %v1431_v24, %v265_v1  ;;  %v1143_v5 = vpop.f32.mrb[6].mxu1 }
  0xe8   :  { %v155_v3 = vadd.f32 %v1436_v26, %v141_v60  ;;  %v117_v6 = vpop.f32.mrb[7].mxu0  ;;  %v308_v7 = vadd.f32 %v1441_v29, %v293_v63  ;;  %v268_v10 = vpop.f32.mrb[7].mxu1 }
  0xe9   :  { %v153_v8 = vadd.f32 %v1436_v26, %v139_v0  ;;  %v140_v9 = vmul.f32 %v942_v23, %v117_v6  ;;  %v306_v12 = vadd.f32 %v1441_v29, %v291_v4  ;;  %v292_v13 = vmul.f32 %v1431_v24, %v268_v10  ;;  %v1521_v23 = vld [vmem:[%s1731_s3 + $0x2] ss:$0 sm:$0xff] }
  0xea   :  { %v162_v11 = vmax.f32 %v155_v3, 0.0  ;;  %v315_v14 = vmax.f32 %v308_v7, 0.0 }
  0xeb   :  { %v160_v15 = vmax.f32 %v153_v8, 0.0  ;;  %v154_v16 = vadd.f32 %v1436_v26, %v140_v9  ;;  %v313_v18 = vmax.f32 %v306_v12, 0.0  ;;  %v307_v19 = vadd.f32 %v1441_v29, %v292_v13 }
  0xec   :  { %171 = vst.msk [vmem:[%s1732_s4 + $0x30] sm:$0x1] %vm170_vm4, %v162_v11  ;;  %971 = vst.msk [vmem:[%s1732_s4 + $0x68] sm:$0x1] %vm170_vm4, %v315_v14 }
  0xed   :  { %168 = vst.msk [vmem:[%s1732_s4 + $0x20] sm:$0xff] %vm163_vm3, %v160_v15  ;;  %v161_v21 = vmax.f32 %v154_v16, 0.0  ;;  %v1150_v22 = vpop.f32.mrb[8].mxu0  ;;  %969 = vst.msk [vmem:[%s1732_s4 + $0x58] sm:$0xff] %vm163_vm3, %v313_v18  ;;  %v314_v24 = vmax.f32 %v307_v19, 0.0  ;;  %v1162_v26 = vpop.f32.mrb[8].mxu1 }
  0xee   :  { %v441_v25 = vmul.f32 %v1150_v22, %v1498_v17  ;;  %v401_v28 = vpop.f32.mrb[9].mxu0  ;;  %v593_v29 = vmul.f32 %v1162_v26, %v1508_v20  ;;  %v553_v31 = vpop.f32.mrb[9].mxu1  ;;  %v1602_v15 = vld [vmem:[%s1730_s2 + $0x4] ss:$0 sm:$0xff]  ;;  %v1612_v18 = vld [vmem:[%s1730_s2 + $0x5] ss:$0 sm:$0xff] }
  0xef   :  { %169 = vst.msk [vmem:[%s1732_s4 + $0x28] sm:$0xff] %vm163_vm3, %v161_v21  ;;  %v439_v30 = vmul.f32 %v1498_v17, %v401_v28  ;;  %v1151_v32 = vpop.f32.mrb[10].mxu0  ;;  %970 = vst.msk [vmem:[%s1732_s4 + $0x60] sm:$0xff] %vm163_vm3, %v314_v24  ;;  %v591_v34 = vmul.f32 %v1508_v20, %v553_v31  ;;  %v1163_v36 = vpop.f32.mrb[10].mxu1  ;;  %v1625_v21 = vld [vmem:[%s1731_s3 + $0x4] ss:$0 sm:$0xff] }
  0xf0   :  { %v456_v33 = vadd.f32 %v1521_v23, %v441_v25  ;;  %v442_v35 = vmul.f32 %v1151_v32, %v1498_v17  ;;  %v404_v37 = vpop.f32.mrb[11].mxu0  ;;  %v608_v38 = vadd.f32 %v1531_v27, %v593_v29  ;;  %v594_v40 = vmul.f32 %v1163_v36, %v1508_v20  ;;  %v556_v42 = vpop.f32.mrb[11].mxu1  ;;  %v1635_v25 = vld [vmem:[%s1731_s3 + $0x5] ss:$0 sm:$0xff] }
  0xf1   :  { %v454_v39 = vadd.f32 %v1521_v23, %v439_v30  ;;  %v440_v41 = vmul.f32 %v1498_v17, %v404_v37  ;;  %v606_v44 = vadd.f32 %v1531_v27, %v591_v34  ;;  %v592_v46 = vmul.f32 %v1508_v20, %v556_v42 }
  0xf2   :  { %v463_v43 = vmax.f32 %v456_v33, 0.0  ;;  %v457_v45 = vadd.f32 %v1521_v23, %v442_v35  ;;  %v615_v47 = vmax.f32 %v608_v38, 0.0  ;;  %v609_v49 = vadd.f32 %v1531_v27, %v594_v40 }
  0xf3   :  { %v461_v48 = vmax.f32 %v454_v39, 0.0  ;;  %v455_v50 = vadd.f32 %v1521_v23, %v440_v41  ;;  %v613_v51 = vmax.f32 %v606_v44, 0.0  ;;  %v607_v53 = vadd.f32 %v1531_v27, %v592_v46 }
  0xf4   :  { %995 = vst.msk [vmem:[%s1732_s4 + $0x80] sm:$0xff] %vm163_vm3, %v463_v43  ;;  %v464_v52 = vmax.f32 %v457_v45, 0.0  ;;  %1023 = vst.msk [vmem:[%s1732_s4 + $0xb8] sm:$0xff] %vm163_vm3, %v615_v47  ;;  %v616_v54 = vmax.f32 %v609_v49, 0.0 }
  0xf5   :  { %993 = vst.msk [vmem:[%s1732_s4 + $0x70] sm:$0xff] %vm163_vm3, %v461_v48  ;;  %v462_v55 = vmax.f32 %v455_v50, 0.0  ;;  %v1154_v56 = vpop.f32.mrb[12].mxu0  ;;  %1021 = vst.msk [vmem:[%s1732_s4 + $0xa8] sm:$0xff] %vm163_vm3, %v613_v51  ;;  %v614_v57 = vmax.f32 %v607_v53, 0.0  ;;  %v1166_v59 = vpop.f32.mrb[12].mxu1 }
  0xf6   :  { %996 = vst.msk [vmem:[%s1732_s4 + $0x88] sm:$0xff] %vm163_vm3, %v464_v52  ;;  %v445_v58 = vmul.f32 %v1154_v56, %v1498_v17  ;;  %v417_v60 = vpop.f32.mrb[13].mxu0  ;;  %1024 = vst.msk [vmem:[%s1732_s4 + $0xc0] sm:$0xff] %vm163_vm3, %v616_v54  ;;  %v597_v61 = vmul.f32 %v1166_v59, %v1508_v20  ;;  %v569_v63 = vpop.f32.mrb[13].mxu1 }
  0xf7   :  { %994 = vst.msk [vmem:[%s1732_s4 + $0x78] sm:$0xff] %vm163_vm3, %v462_v55  ;;  %v443_v62 = vmul.f32 %v1498_v17, %v417_v60  ;;  %v1155_v0 = vpop.f32.mrb[14].mxu0  ;;  %1022 = vst.msk [vmem:[%s1732_s4 + $0xb0] sm:$0xff] %vm163_vm3, %v614_v57  ;;  %v595_v2 = vmul.f32 %v1508_v20, %v569_v63  ;;  %v1167_v3 = vpop.f32.mrb[14].mxu1 }
  0xf8   :  { %v460_v1 = vadd.f32 %v1521_v23, %v445_v58  ;;  %v420_v4 = vpop.f32.mrb[15].mxu0  ;;  %v612_v5 = vadd.f32 %v1531_v27, %v597_v61  ;;  %v572_v8 = vpop.f32.mrb[15].mxu1 }
  0xf9   :  { %v458_v6 = vadd.f32 %v1521_v23, %v443_v62  ;;  %v444_v7 = vmul.f32 %v1498_v17, %v420_v4  ;;  %v610_v10 = vadd.f32 %v1531_v27, %v595_v2  ;;  %v596_v11 = vmul.f32 %v1508_v20, %v572_v8 }
  0xfa   :  { %v467_v9 = vmax.f32 %v460_v1, 0.0  ;;  %v619_v12 = vmax.f32 %v612_v5, 0.0 }
  0xfb   :  { %v465_v13 = vmax.f32 %v458_v6, 0.0  ;;  %v459_v14 = vadd.f32 %v1521_v23, %v444_v7  ;;  %v617_v16 = vmax.f32 %v610_v10, 0.0  ;;  %v611_v17 = vadd.f32 %v1531_v27, %v596_v11 }
  0xfc   :  { %999 = vst.msk [vmem:[%s1732_s4 + $0xa0] sm:$0x1] %vm170_vm4, %v467_v9  ;;  %1027 = vst.msk [vmem:[%s1732_s4 + $0xd8] sm:$0x1] %vm170_vm4, %v619_v12 }
  0xfd   :  { %997 = vst.msk [vmem:[%s1732_s4 + $0x90] sm:$0xff] %vm163_vm3, %v465_v13  ;;  %v466_v19 = vmax.f32 %v459_v14, 0.0  ;;  %v1174_v20 = vpop.f32.mrb[16].mxu0  ;;  %1025 = vst.msk [vmem:[%s1732_s4 + $0xc8] sm:$0xff] %vm163_vm3, %v617_v16  ;;  %v618_v22 = vmax.f32 %v611_v17, 0.0  ;;  %v1186_v24 = vpop.f32.mrb[16].mxu1 }
  0xfe   :  { %v745_v23 = vmul.f32 %v1174_v20, %v1602_v15  ;;  %v705_v26 = vpop.f32.mrb[17].mxu0  ;;  %v897_v27 = vmul.f32 %v1186_v24, %v1612_v18  ;;  %v857_v29 = vpop.f32.mrb[17].mxu1 }
  0xff   :  { %998 = vst.msk [vmem:[%s1732_s4 + $0x98] sm:$0xff] %vm163_vm3, %v466_v19  ;;  %v743_v28 = vmul.f32 %v1602_v15, %v705_v26  ;;  %v1175_v30 = vpop.f32.mrb[18].mxu0  ;;  %1026 = vst.msk [vmem:[%s1732_s4 + $0xd0] sm:$0xff] %vm163_vm3, %v618_v22  ;;  %v895_v32 = vmul.f32 %v1612_v18, %v857_v29  ;;  %v1187_v34 = vpop.f32.mrb[18].mxu1 }
 0x100   :  { %v760_v31 = vadd.f32 %v1625_v21, %v745_v23  ;;  %v746_v33 = vmul.f32 %v1175_v30, %v1602_v15  ;;  %v708_v35 = vpop.f32.mrb[19].mxu0  ;;  %v912_v36 = vadd.f32 %v1635_v25, %v897_v27  ;;  %v898_v38 = vmul.f32 %v1187_v34, %v1612_v18  ;;  %v860_v40 = vpop.f32.mrb[19].mxu1 }
 0x101   :  { %v758_v37 = vadd.f32 %v1625_v21, %v743_v28  ;;  %v744_v39 = vmul.f32 %v1602_v15, %v708_v35  ;;  %v910_v42 = vadd.f32 %v1635_v25, %v895_v32  ;;  %v896_v44 = vmul.f32 %v1612_v18, %v860_v40 }
 0x102   :  { %v767_v41 = vmax.f32 %v760_v31, 0.0  ;;  %v761_v43 = vadd.f32 %v1625_v21, %v746_v33  ;;  %v919_v45 = vmax.f32 %v912_v36, 0.0  ;;  %v913_v47 = vadd.f32 %v1635_v25, %v898_v38 }
 0x103   :  { %v765_v46 = vmax.f32 %v758_v37, 0.0  ;;  %v759_v48 = vadd.f32 %v1625_v21, %v744_v39  ;;  %v917_v49 = vmax.f32 %v910_v42, 0.0  ;;  %v911_v51 = vadd.f32 %v1635_v25, %v896_v44 }
 0x104   :  { %1051 = vst.msk [vmem:[%s1732_s4 + $0xf0] sm:$0xff] %vm163_vm3, %v767_v41  ;;  %v768_v50 = vmax.f32 %v761_v43, 0.0  ;;  %1079 = vst.msk [vmem:[%s1732_s4 + $0x128] sm:$0xff] %vm163_vm3, %v919_v45  ;;  %v920_v52 = vmax.f32 %v913_v47, 0.0 }
 0x105   :  { %1049 = vst.msk [vmem:[%s1732_s4 + $0xe0] sm:$0xff] %vm163_vm3, %v765_v46  ;;  %v766_v53 = vmax.f32 %v759_v48, 0.0  ;;  %v1178_v54 = vpop.f32.mrb[20].mxu0  ;;  %1077 = vst.msk [vmem:[%s1732_s4 + $0x118] sm:$0xff] %vm163_vm3, %v917_v49  ;;  %v918_v55 = vmax.f32 %v911_v51, 0.0  ;;  %v1190_v57 = vpop.f32.mrb[20].mxu1 }
 0x106   :  { %1052 = vst.msk [vmem:[%s1732_s4 + $0xf8] sm:$0xff] %vm163_vm3, %v768_v50  ;;  %v749_v56 = vmul.f32 %v1178_v54, %v1602_v15  ;;  %v721_v58 = vpop.f32.mrb[21].mxu0  ;;  %1080 = vst.msk [vmem:[%s1732_s4 + $0x130] sm:$0xff] %vm163_vm3, %v920_v52  ;;  %v901_v59 = vmul.f32 %v1190_v57, %v1612_v18  ;;  %v873_v61 = vpop.f32.mrb[21].mxu1 }
 0x107   :  { %1050 = vst.msk [vmem:[%s1732_s4 + $0xe8] sm:$0xff] %vm163_vm3, %v766_v53  ;;  %v747_v60 = vmul.f32 %v1602_v15, %v721_v58  ;;  %v1179_v62 = vpop.f32.mrb[22].mxu0  ;;  %1078 = vst.msk [vmem:[%s1732_s4 + $0x120] sm:$0xff] %vm163_vm3, %v918_v55  ;;  %v899_v0 = vmul.f32 %v1612_v18, %v873_v61  ;;  %v1191_v1 = vpop.f32.mrb[22].mxu1 }
 0x108   :  { %v764_v63 = vadd.f32 %v1625_v21, %v749_v56  ;;  %v724_v2 = vpop.f32.mrb[23].mxu0  ;;  %v916_v3 = vadd.f32 %v1635_v25, %v901_v59  ;;  %v876_v6 = vpop.f32.mrb[23].mxu1 }
 0x109   :  { %v762_v4 = vadd.f32 %v1625_v21, %v747_v60  ;;  %v748_v5 = vmul.f32 %v1602_v15, %v724_v2  ;;  %v914_v8 = vadd.f32 %v1635_v25, %v899_v0  ;;  %v900_v9 = vmul.f32 %v1612_v18, %v876_v6 }
 0x10a   :  { %v771_v7 = vmax.f32 %v764_v63, 0.0  ;;  %v923_v10 = vmax.f32 %v916_v3, 0.0 }
 0x10b   :  { %v769_v11 = vmax.f32 %v762_v4, 0.0  ;;  %v763_v12 = vadd.f32 %v1625_v21, %v748_v5  ;;  %v921_v13 = vmax.f32 %v914_v8, 0.0  ;;  %v915_v14 = vadd.f32 %v1635_v25, %v900_v9 }
 0x10c   :  { %1055 = vst.msk [vmem:[%s1732_s4 + $0x110] sm:$0x1] %vm170_vm4, %v771_v7  ;;  %1083 = vst.msk [vmem:[%s1732_s4 + $0x148] sm:$0x1] %vm170_vm4, %v923_v10 }
 0x10d   :  { %1053 = vst.msk [vmem:[%s1732_s4 + $0x100] sm:$0xff] %vm163_vm3, %v769_v11  ;;  %v770_v15 = vmax.f32 %v763_v12, 0.0  ;;  %1081 = vst.msk [vmem:[%s1732_s4 + $0x138] sm:$0xff] %vm163_vm3, %v921_v13  ;;  %v922_v16 = vmax.f32 %v915_v14, 0.0 }
 0x10f   :  { %1054 = vst.msk [vmem:[%s1732_s4 + $0x108] sm:$0xff] %vm163_vm3, %v770_v15  ;;  %1082 = vst.msk [vmem:[%s1732_s4 + $0x140] sm:$0xff] %vm163_vm3, %v922_v16 }

// kernel: brain_forward.4
= control target key start
LH: loop header
LB: loop body
LE: loop exit
PB: predicated region body
PF: predicated region fallthrough
CT: control target
= control target key end

     0   :  { %v798_v0 = vmov 0.0   ;;  %vm799_vm0 = vmmov 0   ;;  %vm45_vm1 = vcmask 1041408   ;;  %vm41_vm2 = vcmask 293888   ;;  %s1041_s1 = inlined_call_operand.vmem [shape: bf16[6,36,8], index: 1, kind: input, shape index: {}]   ;;  %s1042_s0 = inlined_call_operand.vmem [shape: f32[6,9,36], index: 0, kind: input, shape index: {}]   ;;  %s1043_s2 = inlined_call_operand.vmem [shape: f32[6,1,8], index: 2, kind: input, shape index: {}]   ;;  %s1044_s3 = inlined_call_operand.vmem [shape: f32[6,1,8], index: 3, kind: input, shape index: {}]   ;;  %s1045_s4 = inlined_call_operand.vmem [shape: f32[6,9,8], index: 4, kind: output, shape index: {}]  }
   0x1   :  { %718 = vmatprep.subr.bf16.mxu0 %v798_v0  ;;  %728 = vmatprep.subr.bf16.mxu1 %v798_v0  ;;  %v780_v1 = vld [vmem:[%s1041_s1] sm:$0xff]   ;;  %v781_v2 = vld [vmem:[%s1041_s1 + $0x14] sm:$0xff]   ;;  %v782_v3 = vld [vmem:[%s1041_s1 + $0x8] sm:$0xff]   ;;  %vm110_vm3 = vcmask 64512   ;;  %vm112_vm4 = vcmask 57344  }
   0x2   :  { %724 = vmatprep.mubr.msk.bf16.mxu0 %vm799_vm0, %v798_v0  ;;  %734 = vmatprep.mubr.msk.bf16.mxu1 %vm799_vm0, %v798_v0  ;;  %v783_v4 = vld [vmem:[%s1041_s1 + $0x1c] sm:$0xff]   ;;  %v784_v5 = vld [vmem:[%s1041_s1 + $0x10] ss:$0 sps:$4 sm:$0x33]   ;;  %v19_v8 = vld [vmem:[%s1042_s0 + $0x8] sm:$0x1] }
   0x3   :  { %719 = vmatpush3.bf16.msra.mxu0 %v780_v1  ;;  %729 = vmatpush3.bf16.msra.mxu1 %v781_v2  ;;  %v785_v6 = vld [vmem:[%s1041_s1 + $0x24] ss:$0 sps:$4 sm:$0x33]   ;;  %v609_v9 = vld [vmem:[%s1042_s0 + $0x10] sm:$0xff]  ;;  %v610_v10 = vld [vmem:[%s1042_s0 + $0x18] sm:$0x1] }
   0x4   :  { %720 = vmatprep.subr.bf16.mxu0 %v798_v0  ;;  %730 = vmatprep.subr.bf16.mxu1 %v798_v0  ;;  %v18_v7 = vld [vmem:[%s1042_s0] sm:$0xff]  ;;  %v47_v11 = vsel %vm45_vm1, %v784_v5, 0  ;;  %v143_v12 = vsel %vm45_vm1, %v785_v6, 0  ;;  %v117_v14 = vpack.c.bf16 %v610_v10, %v609_v9  ;;  %v786_v15 = vld [vmem:[%s1041_s1 + $0x28] sm:$0xff]   ;;  %v788_v17 = vld [vmem:[%s1041_s1 + $0x30] sm:$0xff]  }
   0x5   :  { %v20_v13 = vpack.c.bf16 %v19_v8, %v18_v7  ;;  %v787_v16 = vld [vmem:[%s1041_s1 + $0x3c] sm:$0xff]   ;;  %v790_v18 = vld [vmem:[%s1041_s1 + $0x38] ss:$0 sps:$4 sm:$0x33]   ;;  %v789_v19 = vld [vmem:[%s1041_s1 + $0x44] sm:$0xff]  }
   0x6   :  { %v791_v20 = vld [vmem:[%s1041_s1 + $0x4c] ss:$0 sps:$4 sm:$0x33]   ;;  %v626_v21 = vld [vmem:[%s1042_s0 + $0x20] sm:$0xff]  ;;  %v627_v22 = vld [vmem:[%s1042_s0 + $0x28] sm:$0x1] }
   0x7   :  { %721 = vmatpush3.bf16.msra.mxu0 %v782_v3  ;;  %731 = vmatpush3.bf16.msra.mxu1 %v783_v4  ;;  %v240_v23 = vsel %vm45_vm1, %v790_v18, 0  ;;  %v643_v24 = vld [vmem:[%s1042_s0 + $0x30] sm:$0xff]  ;;  %v644_v25 = vld [vmem:[%s1042_s0 + $0x38] sm:$0x1]  ;;  %v337_v26 = vsel %vm45_vm1, %v791_v20, 0  ;;  %v214_v27 = vpack.c.bf16 %v627_v22, %v626_v21  ;;  %v793_v30 = vld [vmem:[%s1041_s1 + $0x64] sm:$0xff]  }
   0x8   :  { %722 = vmatprep.subr.bf16.mxu0 %v798_v0  ;;  %732 = vmatprep.subr.bf16.mxu1 %v798_v0  ;;  %v311_v28 = vpack.c.bf16 %v644_v25, %v643_v24  ;;  %v792_v29 = vld [vmem:[%s1041_s1 + $0x50] sm:$0xff]   ;;  %v794_v31 = vld [vmem:[%s1041_s1 + $0x58] sm:$0xff]   ;;  %v796_v33 = vld [vmem:[%s1041_s1 + $0x60] ss:$0 sps:$4 sm:$0x33]  }
   0x9   :  { %v795_v32 = vld [vmem:[%s1041_s1 + $0x6c] sm:$0xff]   ;;  %v797_v34 = vld [vmem:[%s1041_s1 + $0x74] ss:$0 sps:$4 sm:$0x33]   ;;  %v660_v35 = vld [vmem:[%s1042_s0 + $0x40] sm:$0xff]  ;;  %v434_v37 = vsel %vm45_vm1, %v796_v33, 0 }
   0xa   :  { %v661_v36 = vld [vmem:[%s1042_s0 + $0x48] sm:$0x1]  ;;  %v677_v38 = vld [vmem:[%s1042_s0 + $0x50] sm:$0xff]  ;;  %v678_v39 = vld [vmem:[%s1042_s0 + $0x58] sm:$0x1]  ;;  %v531_v40 = vsel %vm45_vm1, %v797_v34, 0 }
   0xb   :  { %723 = vmatpush3.bf16.msra.mxu0 %v47_v11  ;;  %733 = vmatpush3.bf16.msra.mxu1 %v143_v12  ;;  %v408_v41 = vpack.c.bf16 %v661_v36, %v660_v35  ;;  %v505_v42 = vpack.c.bf16 %v678_v39, %v677_v38  ;;  %v607_v43 = vld [vmem:[%s1043_s2] ss:$0 sm:$0xff]  ;;  %v621_v44 = vld [vmem:[%s1043_s2 + $0x1] ss:$0 sm:$0xff]  ;;  %v638_v3 = vld [vmem:[%s1043_s2 + $0x2] ss:$0 sm:$0xff] }
   0xc   :  { %738 = vmatprep.subr.bf16.mxu0 %v798_v0  ;;  %748 = vmatprep.subr.bf16.mxu1 %v798_v0  ;;  %v608_v46 = vld [vmem:[%s1044_s3] ss:$0 sm:$0xff]  ;;  %v623_v49 = vld [vmem:[%s1044_s3 + $0x1] ss:$0 sm:$0xff]  ;;  %v655_v4 = vld [vmem:[%s1043_s2 + $0x3] ss:$0 sm:$0xff] }
   0xd   :  { %v640_v6 = vld [vmem:[%s1044_s3 + $0x2] ss:$0 sm:$0xff]  ;;  %v657_v9 = vld [vmem:[%s1044_s3 + $0x3] ss:$0 sm:$0xff]  ;;  %v691_v33 = vld [vmem:[%s1044_s3 + $0x5] ss:$0 sm:$0xff] }
   0xe   :  { %725 = vmatmul.mubr.msk.bf16.vlgmr.msra.gmra.mrb[0].mxu0 %vm41_vm2, %v20_v13  ;;  %735 = vmatmul.mubr.msk.bf16.vlgmr.msra.gmra.mrb[0].mxu1 %vm41_vm2, %v117_v14 }
   0xf   :  { %739 = vmatpush3.bf16.msra.mxu0 %v786_v15  ;;  %749 = vmatpush3.bf16.msra.mxu1 %v787_v16 }
  0x10   :  { %740 = vmatprep.subr.bf16.mxu0 %v798_v0  ;;  %750 = vmatprep.subr.bf16.mxu1 %v798_v0 }
  0x11   :  { %744 = vmatprep.mubr.msk.bf16.mxu0 %vm799_vm0, %v798_v0  ;;  %754 = vmatprep.mubr.msk.bf16.mxu1 %vm799_vm0, %v798_v0 }
  0x13   :  { %741 = vmatpush3.bf16.msra.mxu0 %v788_v17  ;;  %751 = vmatpush3.bf16.msra.mxu1 %v789_v19 }
  0x14   :  { %742 = vmatprep.subr.bf16.mxu0 %v798_v0  ;;  %752 = vmatprep.subr.bf16.mxu1 %v798_v0 }
  0x17   :  { %743 = vmatpush3.bf16.msra.mxu0 %v240_v23  ;;  %753 = vmatpush3.bf16.msra.mxu1 %v337_v26 }
  0x18   :  { %758 = vmatprep.subr.bf16.mxu0 %v798_v0  ;;  %768 = vmatprep.subr.bf16.mxu1 %v798_v0 }
  0x1a   :  { %745 = vmatmul.mubr.msk.bf16.vlgmr.msra.gmra.mrb[4].mxu0 %vm41_vm2, %v214_v27  ;;  %755 = vmatmul.mubr.msk.bf16.vlgmr.msra.gmra.mrb[4].mxu1 %vm41_vm2, %v311_v28  ;;  %v672_v27 = vld [vmem:[%s1043_s2 + $0x4] ss:$0 sm:$0xff]  ;;  %v689_v28 = vld [vmem:[%s1043_s2 + $0x5] ss:$0 sm:$0xff] }
  0x1b   :  { %759 = vmatpush3.bf16.msra.mxu0 %v792_v29  ;;  %769 = vmatpush3.bf16.msra.mxu1 %v793_v30  ;;  %v674_v30 = vld [vmem:[%s1044_s3 + $0x4] ss:$0 sm:$0xff] }
  0x1c   :  { %760 = vmatprep.subr.bf16.mxu0 %v798_v0  ;;  %770 = vmatprep.subr.bf16.mxu1 %v798_v0 }
  0x1d   :  { %764 = vmatprep.mubr.msk.bf16.mxu0 %vm799_vm0, %v798_v0  ;;  %774 = vmatprep.mubr.msk.bf16.mxu1 %vm799_vm0, %v798_v0 }
  0x1f   :  { %761 = vmatpush3.bf16.msra.mxu0 %v794_v31  ;;  %771 = vmatpush3.bf16.msra.mxu1 %v795_v32 }
  0x20   :  { %762 = vmatprep.subr.bf16.mxu0 %v798_v0  ;;  %772 = vmatprep.subr.bf16.mxu1 %v798_v0 }
  0x23   :  { %763 = vmatpush3.bf16.msra.mxu0 %v434_v37  ;;  %773 = vmatpush3.bf16.msra.mxu1 %v531_v40 }
  0x26   :  { %765 = vmatmul.mubr.msk.bf16.vlgmr.msra.gmra.mrb[8].mxu0 %vm41_vm2, %v408_v41  ;;  %775 = vmatmul.mubr.msk.bf16.vlgmr.msra.gmra.mrb[8].mxu1 %vm41_vm2, %v505_v42 }
  0xe1   :  { %v83_v45 = vpop.f32.mrb[0].mxu0  ;;  %v179_v48 = vpop.f32.mrb[0].mxu1 }
  0xe2   :  { %v97_v47 = vmul.f32 %v607_v43, %v83_v45  ;;  %v726_v50 = vpop.f32.mrb[1].mxu0  ;;  %v194_v51 = vmul.f32 %v621_v44, %v179_v48  ;;  %v736_v52 = vpop.f32.mrb[1].mxu1 }
  0xe3   :  { %v86_v53 = vpop.f32.mrb[2].mxu0  ;;  %v182_v56 = vpop.f32.mrb[2].mxu1 }
  0xe4   :  { %v106_v54 = vadd.f32 %v608_v46, %v97_v47  ;;  %v98_v55 = vmul.f32 %v607_v43, %v86_v53  ;;  %v727_v57 = vpop.f32.mrb[3].mxu0  ;;  %v204_v58 = vadd.f32 %v623_v49, %v194_v51  ;;  %v195_v59 = vmul.f32 %v621_v44, %v182_v56  ;;  %v737_v60 = vpop.f32.mrb[3].mxu1 }
  0xe6   :  { %v108_v61 = vmax.f32 %v106_v54, 0.0  ;;  %v107_v62 = vadd.f32 %v608_v46, %v98_v55  ;;  %v206_v63 = vmax.f32 %v204_v58, 0.0  ;;  %v205_v0 = vadd.f32 %v623_v49, %v195_v59 }
  0xe8   :  { %111 = vst.msk [vmem:[%s1045_s4] sm:$0xff] %vm110_vm3, %v108_v61  ;;  %v109_v1 = vmax.f32 %v107_v62, 0.0  ;;  %624 = vst.msk [vmem:[%s1045_s4 + $0x10] sm:$0xff] %vm110_vm3, %v206_v63  ;;  %v207_v2 = vmax.f32 %v205_v0, 0.0 }
  0xea   :  { %113 = vst.msk [vmem:[%s1045_s4 + $0x8] sm:$0x1] %vm112_vm4, %v109_v1  ;;  %625 = vst.msk [vmem:[%s1045_s4 + $0x18] sm:$0x1] %vm112_vm4, %v207_v2 }
  0xed   :  { %v276_v5 = vpop.f32.mrb[4].mxu0  ;;  %v373_v8 = vpop.f32.mrb[4].mxu1 }
  0xee   :  { %v291_v7 = vmul.f32 %v638_v3, %v276_v5  ;;  %v746_v10 = vpop.f32.mrb[5].mxu0  ;;  %v388_v11 = vmul.f32 %v655_v4, %v373_v8  ;;  %v756_v12 = vpop.f32.mrb[5].mxu1 }
  0xef   :  { %v279_v13 = vpop.f32.mrb[6].mxu0  ;;  %v376_v16 = vpop.f32.mrb[6].mxu1 }
  0xf0   :  { %v301_v14 = vadd.f32 %v640_v6, %v291_v7  ;;  %v292_v15 = vmul.f32 %v638_v3, %v279_v13  ;;  %v747_v17 = vpop.f32.mrb[7].mxu0  ;;  %v398_v18 = vadd.f32 %v657_v9, %v388_v11  ;;  %v389_v19 = vmul.f32 %v655_v4, %v376_v16  ;;  %v757_v20 = vpop.f32.mrb[7].mxu1 }
  0xf2   :  { %v303_v21 = vmax.f32 %v301_v14, 0.0  ;;  %v302_v22 = vadd.f32 %v640_v6, %v292_v15  ;;  %v400_v23 = vmax.f32 %v398_v18, 0.0  ;;  %v399_v24 = vadd.f32 %v657_v9, %v389_v19 }
  0xf4   :  { %641 = vst.msk [vmem:[%s1045_s4 + $0x20] sm:$0xff] %vm110_vm3, %v303_v21  ;;  %v304_v25 = vmax.f32 %v302_v22, 0.0  ;;  %658 = vst.msk [vmem:[%s1045_s4 + $0x30] sm:$0xff] %vm110_vm3, %v400_v23  ;;  %v401_v26 = vmax.f32 %v399_v24, 0.0 }
  0xf6   :  { %642 = vst.msk [vmem:[%s1045_s4 + $0x28] sm:$0x1] %vm112_vm4, %v304_v25  ;;  %659 = vst.msk [vmem:[%s1045_s4 + $0x38] sm:$0x1] %vm112_vm4, %v401_v26 }
  0xf9   :  { %v470_v29 = vpop.f32.mrb[8].mxu0  ;;  %v567_v32 = vpop.f32.mrb[8].mxu1 }
  0xfa   :  { %v485_v31 = vmul.f32 %v672_v27, %v470_v29  ;;  %v766_v34 = vpop.f32.mrb[9].mxu0  ;;  %v582_v35 = vmul.f32 %v689_v28, %v567_v32  ;;  %v776_v36 = vpop.f32.mrb[9].mxu1 }
  0xfb   :  { %v473_v37 = vpop.f32.mrb[10].mxu0  ;;  %v570_v40 = vpop.f32.mrb[10].mxu1 }
  0xfc   :  { %v495_v38 = vadd.f32 %v674_v30, %v485_v31  ;;  %v486_v39 = vmul.f32 %v672_v27, %v473_v37  ;;  %v767_v41 = vpop.f32.mrb[11].mxu0  ;;  %v592_v42 = vadd.f32 %v691_v33, %v582_v35  ;;  %v583_v43 = vmul.f32 %v689_v28, %v570_v40  ;;  %v777_v44 = vpop.f32.mrb[11].mxu1 }
  0xfe   :  { %v497_v45 = vmax.f32 %v495_v38, 0.0  ;;  %v496_v46 = vadd.f32 %v674_v30, %v486_v39  ;;  %v594_v47 = vmax.f32 %v592_v42, 0.0  ;;  %v593_v48 = vadd.f32 %v691_v33, %v583_v43 }
 0x100   :  { %675 = vst.msk [vmem:[%s1045_s4 + $0x40] sm:$0xff] %vm110_vm3, %v497_v45  ;;  %v498_v49 = vmax.f32 %v496_v46, 0.0  ;;  %692 = vst.msk [vmem:[%s1045_s4 + $0x50] sm:$0xff] %vm110_vm3, %v594_v47  ;;  %v595_v50 = vmax.f32 %v593_v48, 0.0 }
 0x102   :  { %676 = vst.msk [vmem:[%s1045_s4 + $0x48] sm:$0x1] %vm112_vm4, %v498_v49  ;;  %693 = vst.msk [vmem:[%s1045_s4 + $0x58] sm:$0x1] %vm112_vm4, %v595_v50 }

// kernel: brain_forward.5
= control target key start
LH: loop header
LB: loop body
LE: loop exit
PB: predicated region body
PF: predicated region fallthrough
CT: control target
= control target key end

     0   :  { %s3159_s6 = smov 1   ;;  %s3160_s10 = smov 2   ;;  %s3716_s0 = inlined_call_operand.smem [shape: u32[34], index: -1, kind: input, shape index: {}] }
   0x1   :  { %s3206_s5 = sld [smem:[%s3716_s0]]   ;;  %s3161_s14 = smov 3  }
   0x2   :  { %s3211_s9 = sld [smem:[%s3716_s0 + %s3159_s6]]   ;;  %s3162_s18 = smov 4  }
   0x3   :  { %s3216_s13 = sld [smem:[%s3716_s0 + %s3160_s10]]   ;;  %s3163_s22 = smov 5  }
   0x4   :  { %s3221_s17 = sld [smem:[%s3716_s0 + %s3161_s14]]   ;;  %s3164_s26 = smov 6  }
   0x5   :  { %s3226_s21 = sld [smem:[%s3716_s0 + %s3162_s18]]   ;;  %s3165_s30 = smov 7  }
   0x6   :  { %s3231_s25 = sld [smem:[%s3716_s0 + %s3163_s22]]   ;;  %s3166_s4 = smov 8  }
   0x7   :  { %s3236_s29 = sld [smem:[%s3716_s0 + %s3164_s26]]   ;;  %s3167_s10 = smov 9  }
   0x8   :  { %s3241_s3 = sld [smem:[%s3716_s0 + %s3165_s30]]   ;;  %s3168_s15 = smov 10  }
   0x9   :  { %s3246_s8 = sld [smem:[%s3716_s0 + %s3166_s4]]   ;;  %s3169_s20 = smov 11  }
   0xa   :  { %s3251_s14 = sld [smem:[%s3716_s0 + %s3167_s10]]   ;;  %s3170_s26 = smov 12  }
   0xb   :  { %s3256_s19 = sld [smem:[%s3716_s0 + %s3168_s15]]   ;;  %s3171_s1 = smov 13  }
   0xc   :  { %s3261_s24 = sld [smem:[%s3716_s0 + %s3169_s20]]   ;;  %s3172_s7 = smov 14  }
   0xd   :  { %s3266_s30 = sld [smem:[%s3716_s0 + %s3170_s26]]   ;;  %s3173_s15 = smov 15  }
   0xe   :  { %s3271_s6 = sld [smem:[%s3716_s0 + %s3171_s1]]   ;;  %s3174_s22 = smov 16  }
   0xf   :  { %s3276_s12 = sld [smem:[%s3716_s0 + %s3172_s7]]   ;;  %s3175_s28 = smov 17  }
  0x10   :  { %s3281_s20 = sld [smem:[%s3716_s0 + %s3173_s15]]   ;;  %s3176_s7 = smov 18  }
  0x11   :  { %s3286_s27 = sld [smem:[%s3716_s0 + %s3174_s22]]   ;;  %s3177_s15 = smov 19  }
  0x12   :  { %s3291_s4 = sld [smem:[%s3716_s0 + %s3175_s28]]   ;;  %s3178_s22 = smov 20  }
  0x13   :  { %s3179_s28 = smov 21  }
  0x15   :  { %3724 = sst [smem:[#allocation8_spill]] %s3276_s12 }
  0x16   :  { %3725 = sst [smem:[#allocation9_spill]] %s3281_s20 }
  0x17   :  { %3726 = sst [smem:[#allocation10_spill]] %s3286_s27 }
  0x18   :  { %3727 = sst [smem:[#allocation11_spill]] %s3291_s4 }
  0x19   :  { %s3296_s12 = sld [smem:[%s3716_s0 + %s3176_s7]]   ;;  %s3180_s7 = smov 22  }
  0x1a   :  { %s3301_s20 = sld [smem:[%s3716_s0 + %s3177_s15]]   ;;  %s3181_s15 = smov 23  }
  0x1b   :  { %s3306_s27 = sld [smem:[%s3716_s0 + %s3178_s22]]   ;;  %s3182_s22 = smov 24  }
  0x1c   :  { %s3311_s4 = sld [smem:[%s3716_s0 + %s3179_s28]]   ;;  %s3183_s28 = smov 25  }
  0x1f   :  { %3728 = sst [smem:[#allocation12_spill]] %s3296_s12 }
  0x20   :  { %3729 = sst [smem:[#allocation13_spill]] %s3301_s20 }
  0x21   :  { %3730 = sst [smem:[#allocation14_spill]] %s3306_s27 }
  0x22   :  { %3731 = sst [smem:[#allocation15_spill]] %s3311_s4 }
  0x23   :  { %s3316_s12 = sld [smem:[%s3716_s0 + %s3180_s7]]   ;;  %s3184_s7 = smov 26  }
  0x24   :  { %s3321_s20 = sld [smem:[%s3716_s0 + %s3181_s15]]   ;;  %s3185_s15 = smov 27  }
  0x25   :  { %s3326_s27 = sld [smem:[%s3716_s0 + %s3182_s22]]   ;;  %s3186_s22 = smov 28  }
  0x26   :  { %s3331_s4 = sld [smem:[%s3716_s0 + %s3183_s28]]   ;;  %s3187_s28 = smov 29  }
  0x29   :  { %3732 = sst [smem:[#allocation16_spill]] %s3316_s12 }
  0x2a   :  { %3733 = sst [smem:[#allocation17_spill]] %s3321_s20 }
  0x2b   :  { %3734 = sst [smem:[#allocation18_spill]] %s3326_s27 }
  0x2c   :  { %3735 = sst [smem:[#allocation19_spill]] %s3331_s4 }
  0x2d   :  { %s3336_s12 = sld [smem:[%s3716_s0 + %s3184_s7]]   ;;  %s3188_s7 = smov 30  }
  0x2e   :  { %s3341_s20 = sld [smem:[%s3716_s0 + %s3185_s15]]   ;;  %s3189_s15 = smov 31  }
  0x2f   :  { %s3346_s27 = sld [smem:[%s3716_s0 + %s3186_s22]]   ;;  %s3190_s22 = smov 32  }
  0x30   :  { %s3351_s4 = sld [smem:[%s3716_s0 + %s3187_s28]]   ;;  %s3191_s28 = smov 33  }
  0x33   :  { %3736 = sst [smem:[#allocation20_spill]] %s3336_s12 }
  0x34   :  { %3737 = sst [smem:[#allocation21_spill]] %s3341_s20 }
  0x35   :  { %3738 = sst [smem:[#allocation22_spill]] %s3346_s27 }
  0x36   :  { %3739 = sst [smem:[#allocation23_spill]] %s3351_s4 }
  0x37   :  { %s3356_s12 = sld [smem:[%s3716_s0 + %s3188_s7]]  }
  0x38   :  { %s3361_s20 = sld [smem:[%s3716_s0 + %s3189_s15]]  }
  0x39   :  { %s3366_s27 = sld [smem:[%s3716_s0 + %s3190_s22]]  }
  0x3a   :  { %s3371_s4 = sld [smem:[%s3716_s0 + %s3191_s28]]  }
  0x3b   :  { %73 = vsyncpa [#allocation3], 0  ;;  %v2901_v0 = vld [vmem:[%s3216_s13] sm:$0xff]   ;;  %v3192_v1 = vmov 0.0   ;;  %v2902_v2 = vld [vmem:[%s3216_s13 + $0x8] sm:$0xff]   ;;  %vm3193_vm0 = vmmov 0  }
  0x3c   :  { %2630 = vmatprep.subr.bf16.mxu0 %v3192_v1  ;;  %2640 = vmatprep.mubr.msk.bf16.mxu0 %vm3193_vm0, %v3192_v1  ;;  %v2903_v3 = vld [vmem:[%s3216_s13 + $0x10] sm:$0xff]   ;;  %v2906_v4 = vld [vmem:[%s3231_s25 + $0x4] ss:$8 sps:$4 sm:$0xff]   ;;  %v2908_v5 = vld [vmem:[%s3231_s25] ss:$8 sps:$4 sm:$0xff]   ;;  %vm182_vm1 = vcmask 1043456  }
  0x3d   :  { %2631 = vmatpush3.bf16.msra.mxu0 %v2901_v0  ;;  %332 = vmatprep.subr.bf16.mxu1 %v2906_v4  ;;  %v2909_v6 = vld [vmem:[%s3231_s25 + $0x14] ss:$8 sps:$4 sm:$0xff]   ;;  %v2911_v8 = vld [vmem:[%s3231_s25 + $0x10] ss:$8 sps:$4 sm:$0xff]   ;;  %v2905_v9 = vld [vmem:[%s3216_s13 + $0x20] ss:$0 sps:$4 sm:$0xff]  }
  0x3e   :  { %2632 = vmatprep.subr.bf16.mxu0 %v3192_v1  ;;  %v2904_v7 = vld [vmem:[%s3216_s13 + $0x18] sm:$0xff]   ;;  %333 = vmatpush1.bf16.msra.mxu1 %v2908_v5  ;;  %v2912_v10 = vld [vmem:[%s3231_s25 + $0x24] ss:$8 sps:$4 sm:$0xff]   ;;  %v2914_v11 = vld [vmem:[%s3231_s25 + $0x20] ss:$8 sps:$4 sm:$0xff]   ;;  %v184_v15 = vsel %vm182_vm1, %v2905_v9, 0 }
  0x3f   :  { %334 = vmatprep.subr.bf16.mxu1 %v2909_v6  ;;  %v2915_v12 = vld [vmem:[%s3231_s25 + $0x34] ss:$8 sps:$4 sm:$0xff]   ;;  %v140_v13 = vld [vmem:[%s3206_s5] sm:$0x3f]  ;;  %v2917_v14 = vld [vmem:[%s3231_s25 + $0x30] ss:$8 sps:$4 sm:$0xff]  }
  0x40   :  { %v141_v16 = vpack.c.bf16 %v140_v13, %v140_v13  ;;  %vm178_vm2 = vcmask 588800  }
  0x41   :  { %2633 = vmatpush3.bf16.msra.mxu0 %v2902_v2 }
  0x42   :  { %2634 = vmatprep.subr.bf16.mxu0 %v3192_v1  ;;  %335 = vmatpush1.bf16.msra.mxu1 %v2911_v8 }
  0x43   :  { %336 = vmatprep.subr.bf16.mxu1 %v2912_v10 }
  0x45   :  { %2635 = vmatpush3.bf16.msra.mxu0 %v2903_v3 }
  0x46   :  { %2636 = vmatprep.subr.bf16.mxu0 %v3192_v1  ;;  %337 = vmatpush1.bf16.msra.mxu1 %v2914_v11 }
  0x47   :  { %338 = vmatprep.subr.bf16.mxu1 %v2915_v12 }
  0x49   :  { %2637 = vmatpush3.bf16.msra.mxu0 %v2904_v7 }
  0x4a   :  { %2638 = vmatprep.subr.bf16.mxu0 %v3192_v1  ;;  %339 = vmatpush1.bf16.msra.mxu1 %v2917_v14 }
  0x4d   :  { %2639 = vmatpush3.bf16.msra.mxu0 %v184_v15 }
  0x50   :  { %2641 = vmatmul.mubr.msk.bf16.vlgmr.msra.gmra.mrb[0].mxu0 %vm178_vm2, %v141_v16 }
  0x51   :  { %74 = vsyncpa [#allocation5], 0  ;;  %v2918_v17 = vld [vmem:[%s3231_s25 + $0x44] ss:$8 sps:$4 sm:$0xff]   ;;  %v2920_v18 = vld [vmem:[%s3231_s25 + $0x40] ss:$8 sps:$4 sm:$0xff]  }
  0x52   :  { %340 = vmatprep.subr.bf16.mxu1 %v2918_v17  ;;  %v2921_v19 = vld [vmem:[%s3231_s25 + $0x54] ss:$8 sps:$4 sm:$0xff]   ;;  %v2923_v20 = vld [vmem:[%s3231_s25 + $0x50] ss:$8 sps:$4 sm:$0xff]   ;;  %v3194_v21 = vmov 0   ;;  %vm328_vm3 = vcmask 785408  }
  0x53   :  { %341 = vmatpush1.bf16.msra.mxu1 %v2920_v18  ;;  %364 = vmatprep.mubr.bf16.mxu1 %v3194_v21  ;;  %v2924_v22 = vld [vmem:[%s3241_s3] ss:$24 sps:$4 sm:$0xff]   ;;  %v2926_v23 = vld [vmem:[%s3241_s3 + $0x4] ss:$24 sps:$4 sm:$0xff]   ;;  %v2932_v25 = vld [vmem:[%s3241_s3 + $0x34] ss:$24 sps:$4 sm:$0xff]   ;;  %v258_v18 = vlaneseq }
  0x54   :  { %342 = vmatprep.subr.bf16.mxu1 %v2921_v19  ;;  %v2929_v24 = vld [vmem:[%s3241_s3 + $0xc] ss:$24 sps:$4 sm:$0xff]   ;;  %845 = vmatprep.subr.bf16.mxu0 %v2926_v23  ;;  %v2930_v26 = vld [vmem:[%s3241_s3 + $0x30] ss:$24 sps:$4 sm:$0xff]   ;;  %v2936_v28 = vld [vmem:[%s3241_s3 + $0x60] ss:$24 sps:$4 sm:$0xff]  }
  0x55   :  { %846 = vmatpush1.bf16.msra.mxu0 %v2924_v22  ;;  %v2938_v27 = vld [vmem:[%s3241_s3 + $0x64] ss:$24 sps:$4 sm:$0xff]   ;;  %v2944_v29 = vld [vmem:[%s3241_s3 + $0x94] ss:$24 sps:$4 sm:$0xff]   ;;  %v2942_v30 = vld [vmem:[%s3241_s3 + $0x90] ss:$24 sps:$4 sm:$0xff]  }
  0x56   :  { %847 = vmatprep.subr.bf16.mxu0 %v2932_v25  ;;  %v2950_v31 = vld [vmem:[%s3241_s3 + $0xc4] ss:$24 sps:$4 sm:$0xff]   ;;  %v2948_v32 = vld [vmem:[%s3241_s3 + $0xc0] ss:$24 sps:$4 sm:$0xff]   ;;  %v2956_v33 = vld [vmem:[%s3241_s3 + $0xf4] ss:$24 sps:$4 sm:$0xff]  }
  0x57   :  { %343 = vmatpush1.bf16.msra.mxu1 %v2923_v20  ;;  %v2954_v34 = vld [vmem:[%s3241_s3 + $0xf0] ss:$24 sps:$4 sm:$0xff]   ;;  %v2962_v35 = vld [vmem:[%s3241_s3 + $0x124] ss:$24 sps:$4 sm:$0xff]   ;;  %v2960_v36 = vld [vmem:[%s3241_s3 + $0x120] ss:$24 sps:$4 sm:$0xff]  }
  0x58   :  { %886 = vmatprep.subr.bf16.mxu1 %v2929_v24  ;;  %v2968_v37 = vld [vmem:[%s3241_s3 + $0x154] ss:$24 sps:$4 sm:$0xff]   ;;  %v2966_v38 = vld [vmem:[%s3241_s3 + $0x150] ss:$24 sps:$4 sm:$0xff]   ;;  %v2974_v39 = vld [vmem:[%s3241_s3 + $0x184] ss:$24 sps:$4 sm:$0xff]  }
  0x59   :  { %848 = vmatpush1.bf16.msra.mxu0 %v2930_v26  ;;  %v2972_v40 = vld [vmem:[%s3241_s3 + $0x180] ss:$24 sps:$4 sm:$0xff]   ;;  %v2980_v41 = vld [vmem:[%s3241_s3 + $0x1b4] ss:$24 sps:$4 sm:$0xff]   ;;  %v2978_v42 = vld [vmem:[%s3241_s3 + $0x1b0] ss:$24 sps:$4 sm:$0xff]  }
  0x5a   :  { %849 = vmatprep.subr.bf16.mxu0 %v2938_v27  ;;  %v2323_v43 = vld [vmem:[%s3221_s17] ss:$0 sm:$0xff]  ;;  %v2935_v54 = vld [vmem:[%s3241_s3 + $0x3c] ss:$24 sps:$4 sm:$0xff]   ;;  %v2933_v55 = vld [vmem:[%s3241_s3 + $0x38] ss:$24 sps:$4 sm:$0xff]  }
  0x5b   :  { %v2324_v45 = vld [vmem:[%s3226_s21] ss:$0 sm:$0xff]  ;;  %v2941_v56 = vld [vmem:[%s3241_s3 + $0x6c] ss:$24 sps:$4 sm:$0xff]   ;;  %v2947_v58 = vld [vmem:[%s3241_s3 + $0x9c] ss:$24 sps:$4 sm:$0xff]  }
  0x5c   :  { %v2927_v52 = vld [vmem:[%s3241_s3 + $0x8] ss:$24 sps:$4 sm:$0xff]   ;;  %v2945_v59 = vld [vmem:[%s3241_s3 + $0x98] ss:$24 sps:$4 sm:$0xff]   ;;  %v2953_v60 = vld [vmem:[%s3241_s3 + $0xcc] ss:$24 sps:$4 sm:$0xff]  }
  0x5d   :  { %850 = vmatpush1.bf16.msra.mxu0 %v2936_v28  ;;  %v2939_v57 = vld [vmem:[%s3241_s3 + $0x68] ss:$24 sps:$4 sm:$0xff]   ;;  %v2959_v62 = vld [vmem:[%s3241_s3 + $0xfc] ss:$24 sps:$4 sm:$0xff]   ;;  %v2957_v63 = vld [vmem:[%s3241_s3 + $0xf8] ss:$24 sps:$4 sm:$0xff]  }
  0x5e   :  { %851 = vmatprep.subr.bf16.mxu0 %v2944_v29  ;;  %v2951_v61 = vld [vmem:[%s3241_s3 + $0xc8] ss:$24 sps:$4 sm:$0xff]   ;;  %v2965_v0 = vld [vmem:[%s3241_s3 + $0x12c] ss:$24 sps:$4 sm:$0xff]   ;;  %v2971_v3 = vld [vmem:[%s3241_s3 + $0x15c] ss:$24 sps:$4 sm:$0xff]  }
  0x5f   :  { %v2963_v2 = vld [vmem:[%s3241_s3 + $0x128] ss:$24 sps:$4 sm:$0xff]   ;;  %v2969_v4 = vld [vmem:[%s3241_s3 + $0x158] ss:$24 sps:$4 sm:$0xff]   ;;  %v2977_v5 = vld [vmem:[%s3241_s3 + $0x18c] ss:$24 sps:$4 sm:$0xff]  }
  0x60   :  { %v2975_v6 = vld [vmem:[%s3241_s3 + $0x188] ss:$24 sps:$4 sm:$0xff]   ;;  %v2983_v7 = vld [vmem:[%s3241_s3 + $0x1bc] ss:$24 sps:$4 sm:$0xff]   ;;  %v2981_v8 = vld [vmem:[%s3241_s3 + $0x1b8] ss:$24 sps:$4 sm:$0xff]  }
  0x61   :  { %852 = vmatpush1.bf16.msra.mxu0 %v2942_v30  ;;  %v2986_v9 = vld [vmem:[%s3241_s3 + $0x1e4] ss:$24 sps:$4 sm:$0xff]   ;;  %v2984_v10 = vld [vmem:[%s3241_s3 + $0x1e0] ss:$24 sps:$4 sm:$0xff]   ;;  %v2992_v13 = vld [vmem:[%s3241_s3 + $0x214] ss:$24 sps:$4 sm:$0xff]  }
  0x62   :  { %853 = vmatprep.subr.bf16.mxu0 %v2950_v31  ;;  %v2989_v11 = vld [vmem:[%s3241_s3 + $0x1ec] ss:$24 sps:$4 sm:$0xff]   ;;  %v2987_v12 = vld [vmem:[%s3241_s3 + $0x1e8] ss:$24 sps:$4 sm:$0xff]   ;;  %v2995_v15 = vld [vmem:[%s3241_s3 + $0x21c] ss:$24 sps:$4 sm:$0xff]  }
  0x63   :  { %v2990_v14 = vld [vmem:[%s3241_s3 + $0x210] ss:$24 sps:$4 sm:$0xff]   ;;  %v2998_v17 = vld [vmem:[%s3241_s3 + $0x14] ss:$24 sps:$4 sm:$0xff]   ;;  %v3451_v19 = vshrl.u32 %v258_v18, 7  ;;  %vm976_vm4 = vcmask 1040384  }
  0x64   :  { %v2993_v16 = vld [vmem:[%s3241_s3 + $0x218] ss:$24 sps:$4 sm:$0xff]   ;;  %v256_v21 = vld [vmem:[%s3236_s29] sm:$0x3]  ;;  %vm977_vm5 = vcmask 1041408   ;;  %v3195_v28 = vmov 65535  }
  0x65   :  { %854 = vmatpush1.bf16.msra.mxu0 %v2948_v32  ;;  %v260_v20 = vsub.s32 0, %v3451_v19  ;;  %v264_v22 = vsub.s32 1, %v3451_v19  ;;  %v978_v29 = vsel %vm976_vm4, 4294967295, %v3195_v28  ;;  %vm841_vm6 = vcmask 523264   ;;  %v3046_v18 = vld [vmem:[%s3271_s6 + $0x30] sm:$0xff]   ;;  %v3053_v28 = vld [vmem:[%s3266_s30 + $0x68] sm:$0xff]  }
  0x66   :  { %855 = vmatprep.subr.bf16.mxu0 %v2956_v33  ;;  %vm972_vm7 = vcmask 23552   ;;  %s3740_s0 = sld [smem:[#allocation8_spill]]  ;;  %s3741_s5 = sld [smem:[#allocation10_spill]]  ;;  %vm2104_vm8 = vcmask 261120   ;;  %vm2159_vm9 = vcmask 130048   ;;  %vm2207_vm10 = vcmask 64512  }
  0x67   :  { %v261_v23 = vrot.slane %v256_v21, %v260_v20  ;;  %v265_v24 = vrot.slane %v256_v21, %v264_v22  ;;  %v3047_v21 = vld [vmem:[%s3271_s6 + $0x38] sm:$0xff]   ;;  %s3743_s13 = sld [smem:[#allocation9_spill]]  ;;  %s3744_s17 = sld [smem:[#allocation14_spill]] }
  0x68   :  { %s3745_s21 = sld [smem:[#allocation11_spill]]  ;;  %s3746_s25 = sld [smem:[#allocation16_spill]] }
  0x69   :  { %856 = vmatpush1.bf16.msra.mxu0 %v2954_v34  ;;  %s3747_s29 = sld [smem:[#allocation13_spill]]  ;;  %s3755_s7 = sld [smem:[#allocation23_spill]] }
  0x6a   :  { %857 = vmatprep.subr.bf16.mxu0 %v2962_v35  ;;  %v970_v35 = vld [vmem:[%s3251_s14] sm:$0x3]  ;;  %s3750_s14 = sld [smem:[#allocation20_spill]] }
  0x6d   :  { %858 = vmatpush1.bf16.msra.mxu0 %v2960_v36  ;;  %v979_v36 = vsel %vm977_vm5, %v978_v29, 0  ;;  %v3054_v29 = vld [vmem:[%s3266_s30 + $0x70] sm:$0xff]  }
  0x6e   :  { %859 = vmatprep.subr.bf16.mxu0 %v2968_v37 }
  0x71   :  { %860 = vmatpush1.bf16.msra.mxu0 %v2966_v38  ;;  %v2996_v38 = vld [vmem:[%s3241_s3 + $0x10] ss:$24 sps:$4 sm:$0xff]  }
  0x72   :  { %861 = vmatprep.subr.bf16.mxu0 %v2974_v39 }
  0x75   :  { %862 = vmatpush1.bf16.msra.mxu0 %v2972_v40  ;;  %v3001_v40 = vld [vmem:[%s3241_s3 + $0x44] ss:$24 sps:$4 sm:$0xff]  }
  0x76   :  { %863 = vmatprep.subr.bf16.mxu0 %v2980_v41  ;;  %v981_v41 = vand.u32 %v979_v36, %v970_v35 }
  0x79   :  { %864 = vmatpush1.bf16.msra.mxu0 %v2978_v42  ;;  %v2999_v42 = vld [vmem:[%s3241_s3 + $0x40] ss:$24 sps:$4 sm:$0xff]  }
  0x7a   :  { %865 = vmatprep.subr.bf16.mxu0 %v2986_v9  ;;  %v3031_v9 = vld [vmem:[%s3241_s3 + $0x1f0] ss:$24 sps:$4 sm:$0xff]  }
  0x7d   :  { %866 = vmatpush1.bf16.msra.mxu0 %v2984_v10  ;;  %v3037_v10 = vld [vmem:[%s3241_s3 + $0x224] ss:$24 sps:$4 sm:$0xff]  }
  0x7e   :  { %867 = vmatprep.subr.bf16.mxu0 %v2992_v13  ;;  %v3041_v13 = vld [vmem:[%s3271_s6 + $0x8] sm:$0xff]  }
  0x81   :  { %868 = vmatpush1.bf16.msra.mxu0 %v2990_v14  ;;  %v3042_v14 = vld [vmem:[%s3271_s6 + $0x10] sm:$0xff]  }
  0x82   :  { %927 = vmatprep.subr.bf16.mxu0 %v2998_v17  ;;  %v3045_v17 = vld [vmem:[%s3271_s6 + $0x28] sm:$0xff]  }
 0x123   :  { %v220_v44 = vpop.f32.mrb[0].mxu0 }
 0x124   :  { %v233_v46 = vmul.f32 %v2323_v43, %v220_v44  ;;  %v2642_v47 = vpop.f32.mrb[1].mxu0  ;;  %v968_v43 = vld [vmem:[%s3211_s9] sm:$0x1]  ;;  %v3004_v44 = vld [vmem:[%s3241_s3 + $0x74] ss:$24 sps:$4 sm:$0xff]   ;;  %s3742_s9 = sld [smem:[#allocation12_spill]] }
 0x125   :  { %v223_v48 = vpop.f32.mrb[2].mxu0  ;;  %v3014_v47 = vld [vmem:[%s3266_s30] sm:$0xff]  }
 0x126   :  { %v241_v49 = vadd.f32 %v2324_v45, %v233_v46  ;;  %v2643_v50 = vpop.f32.mrb[3].mxu0  ;;  %v969_v45 = vpack.c.bf16 %v968_v43, %v968_v43  ;;  %v3002_v46 = vld [vmem:[%s3241_s3 + $0x70] ss:$24 sps:$4 sm:$0xff]   ;;  %v3007_v48 = vld [vmem:[%s3241_s3 + $0xa4] ss:$24 sps:$4 sm:$0xff]  }
 0x127   :  { %v3018_v50 = vld [vmem:[%s3266_s30 + $0x8] sm:$0xff]  }
 0x128   :  { %v242_v51 = vmax.f32 %v241_v49, 0.0  ;;  %v3005_v49 = vld [vmem:[%s3241_s3 + $0xa0] ss:$24 sps:$4 sm:$0xff]  }
 0x12a   :  { %v243_v53 = vpack.c.bf16 %v242_v51, %v242_v51  ;;  %v3010_v51 = vld [vmem:[%s3241_s3 + $0xd4] ss:$24 sps:$4 sm:$0xff]  }
 0x12c   :  { %2337 = vmatmul.mubr.msk.bf16.vlgmr.msra.gmra.mrb[0].mxu1 %vm328_vm3, %v243_v53  ;;  %v3022_v53 = vld [vmem:[%s3266_s30 + $0x10] sm:$0xff]  }
 0x12d   :  { %887 = vmatpush1.bf16.msra.mxu1 %v2927_v52  ;;  %v3008_v52 = vld [vmem:[%s3241_s3 + $0xd0] ss:$24 sps:$4 sm:$0xff]  }
 0x12e   :  { %888 = vmatprep.subr.bf16.mxu1 %v2935_v54  ;;  %v3013_v54 = vld [vmem:[%s3241_s3 + $0x104] ss:$24 sps:$4 sm:$0xff]  }
 0x131   :  { %889 = vmatpush1.bf16.msra.mxu1 %v2933_v55  ;;  %v3011_v55 = vld [vmem:[%s3241_s3 + $0x100] ss:$24 sps:$4 sm:$0xff]  }
 0x132   :  { %890 = vmatprep.subr.bf16.mxu1 %v2941_v56  ;;  %v3026_v56 = vld [vmem:[%s3266_s30 + $0x18] sm:$0xff]  }
 0x135   :  { %891 = vmatpush1.bf16.msra.mxu1 %v2939_v57  ;;  %v3017_v57 = vld [vmem:[%s3241_s3 + $0x134] ss:$24 sps:$4 sm:$0xff]  }
 0x136   :  { %892 = vmatprep.subr.bf16.mxu1 %v2947_v58  ;;  %v3015_v58 = vld [vmem:[%s3241_s3 + $0x130] ss:$24 sps:$4 sm:$0xff]  }
 0x139   :  { %893 = vmatpush1.bf16.msra.mxu1 %v2945_v59  ;;  %v3030_v59 = vld [vmem:[%s3266_s30 + $0x20] sm:$0xff]  }
 0x13a   :  { %894 = vmatprep.subr.bf16.mxu1 %v2953_v60  ;;  %v3021_v60 = vld [vmem:[%s3241_s3 + $0x164] ss:$24 sps:$4 sm:$0xff]  }
 0x13d   :  { %895 = vmatpush1.bf16.msra.mxu1 %v2951_v61  ;;  %v3019_v61 = vld [vmem:[%s3241_s3 + $0x160] ss:$24 sps:$4 sm:$0xff]  }
 0x13e   :  { %896 = vmatprep.subr.bf16.mxu1 %v2959_v62  ;;  %v3034_v62 = vld [vmem:[%s3266_s30 + $0x28] sm:$0xff]  }
 0x141   :  { %897 = vmatpush1.bf16.msra.mxu1 %v2957_v63  ;;  %v3025_v63 = vld [vmem:[%s3241_s3 + $0x194] ss:$24 sps:$4 sm:$0xff]  }
 0x142   :  { %898 = vmatprep.subr.bf16.mxu1 %v2965_v0  ;;  %v3023_v0 = vld [vmem:[%s3241_s3 + $0x190] ss:$24 sps:$4 sm:$0xff]  }
 0x145   :  { %899 = vmatpush1.bf16.msra.mxu1 %v2963_v2  ;;  %v3038_v2 = vld [vmem:[%s3266_s30 + $0x30] sm:$0xff]  }
 0x146   :  { %900 = vmatprep.subr.bf16.mxu1 %v2971_v3  ;;  %v3029_v3 = vld [vmem:[%s3241_s3 + $0x1c4] ss:$24 sps:$4 sm:$0xff]  }
 0x149   :  { %901 = vmatpush1.bf16.msra.mxu1 %v2969_v4  ;;  %v3027_v4 = vld [vmem:[%s3241_s3 + $0x1c0] ss:$24 sps:$4 sm:$0xff]  }
 0x14a   :  { %902 = vmatprep.subr.bf16.mxu1 %v2977_v5  ;;  %v3039_v5 = vld [vmem:[%s3266_s30 + $0x38] sm:$0xff]  }
 0x14d   :  { %903 = vmatpush1.bf16.msra.mxu1 %v2975_v6  ;;  %v1045_v6 = vld [vmem:[%s3261_s24] sm:$0x1]  ;;  %s3752_s24 = sld [smem:[#allocation19_spill]] }
 0x14e   :  { %904 = vmatprep.subr.bf16.mxu1 %v2983_v7  ;;  %v3033_v7 = vld [vmem:[%s3241_s3 + $0x1f4] ss:$24 sps:$4 sm:$0xff]  }
 0x151   :  { %905 = vmatpush1.bf16.msra.mxu1 %v2981_v8  ;;  %v1046_v8 = vpack.c.bf16 %v1045_v6, %v1045_v6 }
 0x152   :  { %906 = vmatprep.subr.bf16.mxu1 %v2989_v11  ;;  %v3035_v11 = vld [vmem:[%s3241_s3 + $0x220] ss:$24 sps:$4 sm:$0xff]   ;;  %s3748_s3 = sld [smem:[#allocation18_spill]] }
 0x155   :  { %907 = vmatpush1.bf16.msra.mxu1 %v2987_v12  ;;  %v3040_v12 = vld [vmem:[%s3271_s6] sm:$0xff]  }
 0x156   :  { %908 = vmatprep.subr.bf16.mxu1 %v2995_v15  ;;  %v3043_v15 = vld [vmem:[%s3271_s6 + $0x18] sm:$0xff]  }
 0x159   :  { %909 = vmatpush1.bf16.msra.mxu1 %v2993_v16  ;;  %v3044_v16 = vld [vmem:[%s3271_s6 + $0x20] sm:$0xff]  }
 0x15a   :  { %2644 = vmatprep.subr.bf16.mxu1 %v3192_v1 }
 0x1ff   :  { %v366_v25 = vpop.f32.mrb[0].mxu1 }
 0x200   :  { %v367_v26 = vadd.f32 %v366_v25, %v261_v23  ;;  %v368_v27 = vpop.f32.mrb[1].mxu1  ;;  %v3048_v23 = vld [vmem:[%s3266_s30 + $0x40] sm:$0xff]   ;;  %v3050_v25 = vld [vmem:[%s3266_s30 + $0x50] sm:$0xff]  }
 0x201   :  { %v369_v30 = vadd.f32 %v368_v27, %v265_v24  ;;  %v370_v31 = vpop.f32.mrb[2].mxu1  ;;  %v3049_v24 = vld [vmem:[%s3266_s30 + $0x48] sm:$0xff]   ;;  %v3052_v27 = vld [vmem:[%s3266_s30 + $0x60] sm:$0xff]  }
 0x202   :  { %v373_v32 = vmax.f32 %v367_v26, 0.0  ;;  %v371_v33 = vpop.f32.mrb[3].mxu1  ;;  %v3051_v26 = vld [vmem:[%s3266_s30 + $0x58] sm:$0xff]  }
 0x203   :  { %v374_v34 = vmax.f32 %v369_v30, 0.0 }
 0x204   :  { %v3462_v39 = vpack.c.bf16 %v373_v32, %v373_v32 }
 0x205   :  { %v376_v37 = vpack.c.bf16 %v374_v34, %v374_v34  ;;  %v449_v34 = vld [vmem:[%s3246_s8] sm:$0x3f]  ;;  %s3749_s8 = sld [smem:[#allocation15_spill]] }
 0x206   :  { %v454_v43 = vrot.slane %v449_v34, %v260_v20 }
 0x207   :  { %2410 = vmatprep.mubr.msk.bf16.mxu0 %vm841_vm6, %v376_v37  ;;  %2411 = vmatprep.mubr.msk.bf16.mxu1 %vm841_vm6, %v376_v37 }
 0x208   :  { %878 = vmatmul.mubr.bf16.vlgmr.msra.gmra.mrb[4].mxu0 %v3462_v39  ;;  %919 = vmatmul.mubr.bf16.vlgmr.msra.gmra.mrb[4].mxu1 %v3462_v39 }
 0x209   :  { %928 = vmatpush1.bf16.msra.mxu0 %v2996_v38  ;;  %2412 = vmatprep.mubr.msk.bf16.mxu0 %vm841_vm6, %v376_v37  ;;  %v461_v37 = vsub.s32 2, %v3451_v19 }
 0x20a   :  { %929 = vmatprep.subr.bf16.mxu0 %v3001_v40  ;;  %2645 = vmatpush3.bf16.msra.mxu1 %v981_v41  ;;  %v458_v40 = vrot.slane %v449_v34, %v264_v22  ;;  %v465_v41 = vsub.s32 3, %v3451_v19 }
 0x20b   :  { %2646 = vmatprep.mubr.msk.bf16.mxu1 %vm3193_vm0, %v3192_v1  ;;  %2650 = vmatprep.subr.bf16.mxu1 %v3192_v1 }
 0x20d   :  { %930 = vmatpush1.bf16.msra.mxu0 %v2999_v42  ;;  %v971_v42 = vld [vmem:[%s3256_s19] sm:$0x1]  ;;  %s3751_s19 = sld [smem:[#allocation17_spill]] }
 0x20e   :  { %931 = vmatprep.subr.bf16.mxu0 %v3004_v44  ;;  %v462_v44 = vrot.slane %v449_v34, %v461_v37  ;;  %v3066_v37 = vld [vmem:[%s3740_s0 + $0x10] sm:$0xff]  }
 0x210   :  { %2647 = vmatmul.mubr.msk.bf16.vlgmr.msra.gmra.mrb[8].mxu1 %vm972_vm7, %v969_v45 }
 0x211   :  { %932 = vmatpush1.bf16.msra.mxu0 %v3002_v46  ;;  %2651 = vmatpush3.bf16.msra.mxu1 %v3014_v47  ;;  %v466_v47 = vrot.slane %v449_v34, %v465_v41  ;;  %v3070_v41 = vld [vmem:[%s3740_s0 + $0x30] sm:$0xff]  }
 0x212   :  { %933 = vmatprep.subr.bf16.mxu0 %v3007_v48  ;;  %2652 = vmatprep.subr.bf16.mxu1 %v3192_v1 }
 0x213   :  { %2666 = vmatprep.mubr.msk.bf16.mxu1 %vm3193_vm0, %v3192_v1 }
 0x215   :  { %934 = vmatpush1.bf16.msra.mxu0 %v3005_v49  ;;  %2653 = vmatpush3.bf16.msra.mxu1 %v3018_v50 }
 0x216   :  { %935 = vmatprep.subr.bf16.mxu0 %v3010_v51  ;;  %2654 = vmatprep.subr.bf16.mxu1 %v3192_v1 }
 0x219   :  { %936 = vmatpush1.bf16.msra.mxu0 %v3008_v52  ;;  %2655 = vmatpush3.bf16.msra.mxu1 %v3022_v53 }
 0x21a   :  { %937 = vmatprep.subr.bf16.mxu0 %v3013_v54  ;;  %2656 = vmatprep.subr.bf16.mxu1 %v3192_v1 }
 0x21d   :  { %938 = vmatpush1.bf16.msra.mxu0 %v3011_v55  ;;  %2657 = vmatpush3.bf16.msra.mxu1 %v3026_v56 }
 0x21e   :  { %939 = vmatprep.subr.bf16.mxu0 %v3017_v57  ;;  %2658 = vmatprep.subr.bf16.mxu1 %v3192_v1 }
 0x221   :  { %940 = vmatpush1.bf16.msra.mxu0 %v3015_v58  ;;  %2659 = vmatpush3.bf16.msra.mxu1 %v3030_v59 }
 0x222   :  { %941 = vmatprep.subr.bf16.mxu0 %v3021_v60  ;;  %2660 = vmatprep.subr.bf16.mxu1 %v3192_v1 }
 0x225   :  { %942 = vmatpush1.bf16.msra.mxu0 %v3019_v61  ;;  %2661 = vmatpush3.bf16.msra.mxu1 %v3034_v62  ;;  %v469_v62 = vsub.s32 4, %v3451_v19 }
 0x226   :  { %943 = vmatprep.subr.bf16.mxu0 %v3025_v63  ;;  %2662 = vmatprep.subr.bf16.mxu1 %v3192_v1 }
 0x229   :  { %944 = vmatpush1.bf16.msra.mxu0 %v3023_v0  ;;  %2663 = vmatpush3.bf16.msra.mxu1 %v3038_v2  ;;  %v473_v0 = vsub.s32 5, %v3451_v19 }
 0x22a   :  { %945 = vmatprep.subr.bf16.mxu0 %v3029_v3  ;;  %2664 = vmatprep.subr.bf16.mxu1 %v3192_v1 }
 0x22d   :  { %946 = vmatpush1.bf16.msra.mxu0 %v3027_v4  ;;  %2665 = vmatpush3.bf16.msra.mxu1 %v3039_v5  ;;  %v470_v4 = vrot.slane %v449_v34, %v469_v62  ;;  %v474_v5 = vrot.slane %v449_v34, %v473_v0  ;;  %v3063_v34 = vld [vmem:[%s3271_s6 + $0x78] sm:$0xff]   ;;  %v3081_v62 = vld [vmem:[%s3742_s9 + $0x8] sm:$0xff]  }
 0x22e   :  { %947 = vmatprep.subr.bf16.mxu0 %v3033_v7  ;;  %2670 = vmatprep.subr.bf16.mxu1 %v3192_v1  ;;  %v3083_v0 = vld [vmem:[%s3742_s9 + $0x18] sm:$0xff]  }
 0x230   :  { %2667 = vmatmul.mubr.bf16.vlgmr.msra.gmra.mrb[12].mxu1 %v1046_v8 }
 0x231   :  { %948 = vmatpush1.bf16.msra.mxu0 %v3031_v9  ;;  %2686 = vmatprep.mubr.msk.bf16.mxu1 %vm3193_vm0, %v3192_v1 }
 0x232   :  { %949 = vmatprep.subr.bf16.mxu0 %v3037_v10  ;;  %2671 = vmatpush3.bf16.msra.mxu1 %v3040_v12 }
 0x233   :  { %2672 = vmatprep.subr.bf16.mxu1 %v3192_v1 }
 0x235   :  { %950 = vmatpush1.bf16.msra.mxu0 %v3035_v11 }
 0x236   :  { %2690 = vmatprep.subr.bf16.mxu0 %v3192_v1  ;;  %2673 = vmatpush3.bf16.msra.mxu1 %v3041_v13 }
 0x237   :  { %2674 = vmatprep.subr.bf16.mxu1 %v3192_v1 }
 0x238   :  { %960 = vmatmul.mubr.bf16.vlgmr.msra.gmra.mrb[8].mxu0 %v3462_v39 }
 0x239   :  { %2706 = vmatprep.mubr.msk.bf16.mxu0 %vm3193_vm0, %v3192_v1  ;;  %2691 = vmatpush3.bf16.msra.mxu0 %v3048_v23  ;;  %v3058_v23 = vld [vmem:[%s3271_s6 + $0x50] sm:$0xff]  }
 0x23a   :  { %2675 = vmatpush3.bf16.msra.mxu1 %v3042_v14  ;;  %2692 = vmatprep.subr.bf16.mxu0 %v3192_v1 }
 0x23b   :  { %2676 = vmatprep.subr.bf16.mxu1 %v3192_v1 }
 0x23d   :  { %2693 = vmatpush3.bf16.msra.mxu0 %v3049_v24  ;;  %v3059_v24 = vld [vmem:[%s3271_s6 + $0x58] sm:$0xff]  }
 0x23e   :  { %2677 = vmatpush3.bf16.msra.mxu1 %v3043_v15  ;;  %2694 = vmatprep.subr.bf16.mxu0 %v3192_v1 }
 0x23f   :  { %2678 = vmatprep.subr.bf16.mxu1 %v3192_v1 }
 0x241   :  { %2695 = vmatpush3.bf16.msra.mxu0 %v3050_v25  ;;  %v3060_v25 = vld [vmem:[%s3271_s6 + $0x60] sm:$0xff]  }
 0x242   :  { %2679 = vmatpush3.bf16.msra.mxu1 %v3044_v16  ;;  %2696 = vmatprep.subr.bf16.mxu0 %v3192_v1 }
 0x243   :  { %2680 = vmatprep.subr.bf16.mxu1 %v3192_v1 }
 0x245   :  { %2697 = vmatpush3.bf16.msra.mxu0 %v3051_v26  ;;  %v3061_v26 = vld [vmem:[%s3271_s6 + $0x68] sm:$0xff]  }
 0x246   :  { %2681 = vmatpush3.bf16.msra.mxu1 %v3045_v17  ;;  %2698 = vmatprep.subr.bf16.mxu0 %v3192_v1  ;;  %v3055_v17 = vld [vmem:[%s3266_s30 + $0x78] sm:$0xff]   ;;  %s3753_s30 = sld [smem:[#allocation22_spill]] }
 0x247   :  { %2682 = vmatprep.subr.bf16.mxu1 %v3192_v1 }
 0x249   :  { %2699 = vmatpush3.bf16.msra.mxu0 %v3052_v27  ;;  %v3062_v27 = vld [vmem:[%s3271_s6 + $0x70] sm:$0xff]  }
 0x24a   :  { %2683 = vmatpush3.bf16.msra.mxu1 %v3046_v18  ;;  %2700 = vmatprep.subr.bf16.mxu0 %v3192_v1  ;;  %v3056_v18 = vld [vmem:[%s3271_s6 + $0x40] sm:$0xff]  }
 0x24b   :  { %2684 = vmatprep.subr.bf16.mxu1 %v3192_v1 }
 0x24d   :  { %2701 = vmatpush3.bf16.msra.mxu0 %v3053_v28 }
 0x24e   :  { %2685 = vmatpush3.bf16.msra.mxu1 %v3047_v21  ;;  %2702 = vmatprep.subr.bf16.mxu0 %v3192_v1  ;;  %v3057_v21 = vld [vmem:[%s3271_s6 + $0x48] sm:$0xff]   ;;  %s3754_s6 = sld [smem:[#allocation21_spill]] }
 0x24f   :  { %2710 = vmatprep.subr.bf16.mxu1 %v3192_v1 }
 0x251   :  { %2703 = vmatpush3.bf16.msra.mxu0 %v3054_v29 }
 0x252   :  { %2704 = vmatprep.subr.bf16.mxu0 %v3192_v1 }
 0x255   :  { %2705 = vmatpush3.bf16.msra.mxu0 %v3055_v17  ;;  %v3092_v17 = vld [vmem:[%s3744_s17 + $0x20] sm:$0xff]  }
 0x256   :  { %2730 = vmatprep.subr.bf16.mxu0 %v3192_v1 }
 0x2db   :  { %v879_v30 = vpop.f32.mrb[4].mxu0  ;;  %v920_v31 = vpop.f32.mrb[4].mxu1 }
 0x2dc   :  { %v881_v32 = vpop.f32.mrb[5].mxu0  ;;  %v922_v33 = vpop.f32.mrb[5].mxu1  ;;  %v880_v51 = vadd.f32 %v879_v30, %v454_v43  ;;  %v921_v52 = vadd.f32 %v920_v31, %v462_v44 }
 0x2dd   :  { %v883_v35 = vpop.f32.mrb[6].mxu0  ;;  %v924_v36 = vpop.f32.mrb[6].mxu1  ;;  %v882_v46 = vadd.f32 %v881_v32, %v458_v40  ;;  %v923_v56 = vadd.f32 %v922_v33, %v466_v47  ;;  %v3069_v40 = vld [vmem:[%s3740_s0 + $0x28] sm:$0xff]  }
 0x2de   :  { %v884_v38 = vpop.f32.mrb[7].mxu0  ;;  %v925_v39 = vpop.f32.mrb[7].mxu1  ;;  %v1030_v57 = vrot.slane %v921_v52, 2  ;;  %v3064_v35 = vld [vmem:[%s3740_s0] sm:$0xff]   ;;  %v3065_v36 = vld [vmem:[%s3740_s0 + $0x8] sm:$0xff]   ;;  %v3075_v52 = vld [vmem:[%s3741_s5 + $0x18] sm:$0xff]  }
 0x2df   :  { %v1026_v55 = vrot.slane %v882_v46, 1  ;;  %v1034_v59 = vrot.slane %v923_v56, 3  ;;  %v3067_v38 = vld [vmem:[%s3740_s0 + $0x18] sm:$0xff]   ;;  %v3068_v39 = vld [vmem:[%s3740_s0 + $0x20] sm:$0xff]  }
 0x2e3   :  { %v1017_v45 = vpop.f32.mrb[8].mxu1 }
 0x2e4   :  { %v1018_v48 = vadd.f32 %v1017_v45, %v971_v42  ;;  %v2648_v49 = vpop.f32.mrb[9].mxu1 }
 0x2e5   :  { %v1020_v50 = vpop.f32.mrb[10].mxu1  ;;  %v3072_v49 = vld [vmem:[%s3741_s5] sm:$0xff]  }
 0x2e6   :  { %v1023_v53 = vmax.f32 %v1018_v48, 0.0  ;;  %v2649_v54 = vpop.f32.mrb[11].mxu1  ;;  %v3071_v48 = vld [vmem:[%s3740_s0 + $0x38] sm:$0xff]   ;;  %v3073_v50 = vld [vmem:[%s3741_s5 + $0x8] sm:$0xff]  }
 0x2e7   :  { %v3077_v54 = vld [vmem:[%s3741_s5 + $0x28] sm:$0xff]  }
 0x2e8   :  { %v1024_v22 = vmax.f32 %v1023_v53, %v880_v51  ;;  %v3074_v51 = vld [vmem:[%s3741_s5 + $0x10] sm:$0xff]   ;;  %v3076_v53 = vld [vmem:[%s3741_s5 + $0x20] sm:$0xff]  }
 0x2ea   :  { %v1028_v58 = vmax.f32 %v1024_v22, %v1026_v55 }
 0x2ec   :  { %v1032_v60 = vmax.f32 %v1028_v58, %v1030_v57 }
 0x2ee   :  { %v1036_v61 = vmax.f32 %v1032_v60, %v1034_v59  ;;  %v3078_v60 = vld [vmem:[%s3741_s5 + $0x30] sm:$0xff]  }
 0x303   :  { %v1145_v20 = vpop.f32.mrb[12].mxu1 }
 0x304   :  { %v2668_v63 = vpop.f32.mrb[13].mxu1 }
 0x305   :  { %v1148_v2 = vpop.f32.mrb[14].mxu1  ;;  %v3082_v63 = vld [vmem:[%s3742_s9 + $0x10] sm:$0xff]  }
 0x306   :  { %v2669_v3 = vpop.f32.mrb[15].mxu1  ;;  %v3084_v2 = vld [vmem:[%s3742_s9 + $0x20] sm:$0xff]  }
 0x307   :  { %v3085_v3 = vld [vmem:[%s3742_s9 + $0x28] sm:$0xff]  }
 0x30b   :  { %v961_v6 = vpop.f32.mrb[8].mxu0 }
 0x30c   :  { %v962_v7 = vadd.f32 %v961_v6, %v470_v4  ;;  %v963_v8 = vpop.f32.mrb[9].mxu0  ;;  %v1490_v4 = vld [vmem:[%s3743_s13] sm:$0x1] }
 0x30d   :  { %v964_v9 = vadd.f32 %v963_v8, %v474_v5  ;;  %v965_v10 = vpop.f32.mrb[10].mxu0 }
 0x30e   :  { %v1038_v11 = vrot.slane %v962_v7, 4  ;;  %v966_v12 = vpop.f32.mrb[11].mxu0 }
 0x30f   :  { %v1042_v13 = vrot.slane %v964_v9, 5  ;;  %v3086_v12 = vld [vmem:[%s3742_s9 + $0x30] sm:$0xff]  }
 0x310   :  { %v1040_v14 = vmax.f32 %v1036_v61, %v1038_v11  ;;  %v3079_v61 = vld [vmem:[%s3741_s5 + $0x38] sm:$0xff]  }
 0x312   :  { %v3560_v15 = vmax.f32 %v1040_v14, %v1042_v13  ;;  %v3087_v13 = vld [vmem:[%s3742_s9 + $0x38] sm:$0xff]   ;;  %v3088_v14 = vld [vmem:[%s3744_s17] sm:$0xff]  }
 0x314   :  { %v1151_v19 = vadd.f32 %v1145_v20, %v3560_v15  ;;  %v3080_v20 = vld [vmem:[%s3742_s9] sm:$0xff]  }
 0x316   :  { %v1152_v16 = vpack.c.bf16 %v1151_v19, %v1151_v19  ;;  %v3090_v19 = vld [vmem:[%s3744_s17 + $0x10] sm:$0xff]  }
 0x318   :  { %2687 = vmatmul.mubr.bf16.vlgmr.msra.gmra.mrb[16].mxu1 %v1152_v16  ;;  %v3091_v16 = vld [vmem:[%s3744_s17 + $0x18] sm:$0xff]  }
 0x319   :  { %2726 = vmatprep.mubr.msk.bf16.mxu1 %vm3193_vm0, %v3192_v1  ;;  %2711 = vmatpush3.bf16.msra.mxu1 %v3056_v18  ;;  %v3093_v18 = vld [vmem:[%s3744_s17 + $0x28] sm:$0xff]  }
 0x31a   :  { %2712 = vmatprep.subr.bf16.mxu1 %v3192_v1 }
 0x31d   :  { %2713 = vmatpush3.bf16.msra.mxu1 %v3057_v21  ;;  %v1597_v21 = vld [vmem:[%s3745_s21] sm:$0x1] }
 0x31e   :  { %2714 = vmatprep.subr.bf16.mxu1 %v3192_v1 }
 0x321   :  { %2715 = vmatpush3.bf16.msra.mxu1 %v3058_v23 }
 0x322   :  { %2716 = vmatprep.subr.bf16.mxu1 %v3192_v1 }
 0x325   :  { %2717 = vmatpush3.bf16.msra.mxu1 %v3059_v24 }
 0x326   :  { %2718 = vmatprep.subr.bf16.mxu1 %v3192_v1 }
 0x329   :  { %2719 = vmatpush3.bf16.msra.mxu1 %v3060_v25 }
 0x32a   :  { %2720 = vmatprep.subr.bf16.mxu1 %v3192_v1 }
 0x32d   :  { %2721 = vmatpush3.bf16.msra.mxu1 %v3061_v26 }
 0x32e   :  { %2722 = vmatprep.subr.bf16.mxu1 %v3192_v1 }
 0x331   :  { %2723 = vmatpush3.bf16.msra.mxu1 %v3062_v27 }
 0x332   :  { %2724 = vmatprep.subr.bf16.mxu1 %v3192_v1 }
 0x335   :  { %2725 = vmatpush3.bf16.msra.mxu1 %v3063_v34  ;;  %v3098_v34 = vld [vmem:[%s3746_s25 + $0x10] sm:$0xff]  }
 0x336   :  { %2750 = vmatprep.subr.bf16.mxu1 %v3192_v1 }
 0x3eb   :  { %v1251_v28 = vpop.f32.mrb[16].mxu1 }
 0x3ec   :  { %v1257_v29 = vmax.f32 %v1251_v28, 0.0  ;;  %v2688_v30 = vpop.f32.mrb[17].mxu1 }
 0x3ed   :  { %v1254_v31 = vpop.f32.mrb[18].mxu1  ;;  %v3094_v30 = vld [vmem:[%s3744_s17 + $0x30] sm:$0xff]  }
 0x3ee   :  { %v1258_v32 = vpack.c.bf16 %v1257_v29, %v1257_v29  ;;  %v2689_v33 = vpop.f32.mrb[19].mxu1  ;;  %v3095_v31 = vld [vmem:[%s3744_s17 + $0x38] sm:$0xff]  }
 0x3ef   :  { %v3097_v33 = vld [vmem:[%s3746_s25 + $0x8] sm:$0xff]  }
 0x3f0   :  { %2707 = vmatmul.mubr.bf16.vlgmr.msra.gmra.mrb[12].mxu0 %v1258_v32  ;;  %v3096_v32 = vld [vmem:[%s3746_s25] sm:$0xff]  }
 0x3f1   :  { %2746 = vmatprep.mubr.msk.bf16.mxu0 %vm3193_vm0, %v3192_v1  ;;  %2731 = vmatpush3.bf16.msra.mxu0 %v3064_v35  ;;  %v3099_v35 = vld [vmem:[%s3746_s25 + $0x18] sm:$0xff]  }
 0x3f2   :  { %2732 = vmatprep.subr.bf16.mxu0 %v3192_v1 }
 0x3f5   :  { %2733 = vmatpush3.bf16.msra.mxu0 %v3065_v36  ;;  %v3100_v36 = vld [vmem:[%s3746_s25 + $0x20] sm:$0xff]  }
 0x3f6   :  { %2734 = vmatprep.subr.bf16.mxu0 %v3192_v1 }
 0x3f9   :  { %2735 = vmatpush3.bf16.msra.mxu0 %v3066_v37  ;;  %v3101_v37 = vld [vmem:[%s3746_s25 + $0x28] sm:$0xff]  }
 0x3fa   :  { %2736 = vmatprep.subr.bf16.mxu0 %v3192_v1 }
 0x3fd   :  { %2737 = vmatpush3.bf16.msra.mxu0 %v3067_v38  ;;  %v1704_v38 = vld [vmem:[%s3747_s29] sm:$0x1] }
 0x3fe   :  { %2738 = vmatprep.subr.bf16.mxu0 %v3192_v1 }
 0x401   :  { %2739 = vmatpush3.bf16.msra.mxu0 %v3068_v39 }
 0x402   :  { %2740 = vmatprep.subr.bf16.mxu0 %v3192_v1 }
 0x405   :  { %2741 = vmatpush3.bf16.msra.mxu0 %v3069_v40 }
 0x406   :  { %2742 = vmatprep.subr.bf16.mxu0 %v3192_v1 }
 0x409   :  { %2743 = vmatpush3.bf16.msra.mxu0 %v3070_v41 }
 0x40a   :  { %2744 = vmatprep.subr.bf16.mxu0 %v3192_v1 }
 0x40d   :  { %2745 = vmatpush3.bf16.msra.mxu0 %v3071_v48  ;;  %v3104_v48 = vld [vmem:[%s3748_s3] sm:$0xff]  }
 0x40e   :  { %2770 = vmatprep.subr.bf16.mxu0 %v3192_v1 }
 0x4c3   :  { %v1358_v42 = vpop.f32.mrb[12].mxu0 }
 0x4c4   :  { %v1364_v43 = vadd.f32 %v1358_v42, %v3560_v15  ;;  %v2708_v44 = vpop.f32.mrb[13].mxu0 }
 0x4c5   :  { %v1361_v45 = vpop.f32.mrb[14].mxu0 }
 0x4c6   :  { %v1365_v46 = vpack.c.bf16 %v1364_v43, %v1364_v43  ;;  %v2709_v47 = vpop.f32.mrb[15].mxu0 }
 0x4c7   :  { %v3103_v47 = vld [vmem:[%s3746_s25 + $0x38] sm:$0xff]  }
 0x4c8   :  { %2727 = vmatmul.mubr.bf16.vlgmr.msra.gmra.mrb[20].mxu1 %v1365_v46  ;;  %v3102_v46 = vld [vmem:[%s3746_s25 + $0x30] sm:$0xff]  }
 0x4c9   :  { %2766 = vmatprep.mubr.msk.bf16.mxu1 %vm3193_vm0, %v3192_v1  ;;  %2751 = vmatpush3.bf16.msra.mxu1 %v3072_v49  ;;  %v3105_v49 = vld [vmem:[%s3748_s3 + $0x8] sm:$0xff]  }
 0x4ca   :  { %2752 = vmatprep.subr.bf16.mxu1 %v3192_v1 }
 0x4cd   :  { %2753 = vmatpush3.bf16.msra.mxu1 %v3073_v50  ;;  %v1811_v50 = vld [vmem:[%s3749_s8] sm:$0x1] }
 0x4ce   :  { %2754 = vmatprep.subr.bf16.mxu1 %v3192_v1 }
 0x4d1   :  { %2755 = vmatpush3.bf16.msra.mxu1 %v3074_v51 }
 0x4d2   :  { %2756 = vmatprep.subr.bf16.mxu1 %v3192_v1 }
 0x4d5   :  { %2757 = vmatpush3.bf16.msra.mxu1 %v3075_v52 }
 0x4d6   :  { %2758 = vmatprep.subr.bf16.mxu1 %v3192_v1 }
 0x4d9   :  { %2759 = vmatpush3.bf16.msra.mxu1 %v3076_v53 }
 0x4da   :  { %2760 = vmatprep.subr.bf16.mxu1 %v3192_v1 }
 0x4dd   :  { %2761 = vmatpush3.bf16.msra.mxu1 %v3077_v54 }
 0x4de   :  { %2762 = vmatprep.subr.bf16.mxu1 %v3192_v1 }
 0x4e1   :  { %2763 = vmatpush3.bf16.msra.mxu1 %v3078_v60  ;;  %v1918_v60 = vld [vmem:[%s3751_s19] sm:$0x1] }
 0x4e2   :  { %2764 = vmatprep.subr.bf16.mxu1 %v3192_v1 }
 0x4e5   :  { %2765 = vmatpush3.bf16.msra.mxu1 %v3079_v61 }
 0x4e6   :  { %2790 = vmatprep.subr.bf16.mxu1 %v3192_v1 }
 0x59b   :  { %v1465_v55 = vpop.f32.mrb[20].mxu1 }
 0x59c   :  { %v1471_v56 = vmax.f32 %v1465_v55, 0.0  ;;  %v2728_v22 = vpop.f32.mrb[21].mxu1 }
 0x59d   :  { %v1468_v57 = vpop.f32.mrb[22].mxu1 }
 0x59e   :  { %v1473_v58 = vpack.c.bf16 %v1471_v56, %v1471_v56  ;;  %1472 = vst [vmem:[#allocation4] sm:$0x1] %v1471_v56  ;;  %v2729_v59 = vpop.f32.mrb[23].mxu1  ;;  %v3106_v57 = vld [vmem:[%s3748_s3 + $0x10] sm:$0xff]  }
 0x59f   :  { %v3108_v59 = vld [vmem:[%s3750_s14] sm:$0xff]  }
 0x5a0   :  { %2747 = vmatmul.mubr.bf16.vlgmr.msra.gmra.mrb[16].mxu0 %v1473_v58  ;;  %v3107_v58 = vld [vmem:[%s3748_s3 + $0x18] sm:$0xff]  }
 0x5a1   :  { %2786 = vmatprep.mubr.msk.bf16.mxu0 %vm3193_vm0, %v3192_v1  ;;  %2771 = vmatpush3.bf16.msra.mxu0 %v3080_v20 }
 0x5a2   :  { %2772 = vmatprep.subr.bf16.mxu0 %v3192_v1 }
 0x5a5   :  { %2773 = vmatpush3.bf16.msra.mxu0 %v3081_v62 }
 0x5a6   :  { %2774 = vmatprep.subr.bf16.mxu0 %v3192_v1 }
 0x5a9   :  { %2775 = vmatpush3.bf16.msra.mxu0 %v3082_v63 }
 0x5aa   :  { %2776 = vmatprep.subr.bf16.mxu0 %v3192_v1 }
 0x5ad   :  { %2777 = vmatpush3.bf16.msra.mxu0 %v3083_v0 }
 0x5ae   :  { %2778 = vmatprep.subr.bf16.mxu0 %v3192_v1 }
 0x5b1   :  { %2779 = vmatpush3.bf16.msra.mxu0 %v3084_v2 }
 0x5b2   :  { %2780 = vmatprep.subr.bf16.mxu0 %v3192_v1 }
 0x5b5   :  { %2781 = vmatpush3.bf16.msra.mxu0 %v3085_v3 }
 0x5b6   :  { %2782 = vmatprep.subr.bf16.mxu0 %v3192_v1 }
 0x5b9   :  { %2783 = vmatpush3.bf16.msra.mxu0 %v3086_v12  ;;  %v3110_v12 = vld [vmem:[%s3753_s30] sm:$0xff]  }
 0x5ba   :  { %2784 = vmatprep.subr.bf16.mxu0 %v3192_v1 }
 0x5bd   :  { %2785 = vmatpush3.bf16.msra.mxu0 %v3087_v13 }
 0x5be   :  { %2810 = vmatprep.subr.bf16.mxu0 %v3192_v1 }
 0x673   :  { %v1573_v5 = vpop.f32.mrb[16].mxu0 }
 0x674   :  { %v1574_v6 = vadd.f32 %v1573_v5, %v1490_v4  ;;  %v2748_v7 = vpop.f32.mrb[17].mxu0  ;;  %v3109_v4 = vld [vmem:[%s3750_s14 + $0x8] sm:$0xff]   ;;  %v2017_v5 = vld [vmem:[%s3752_s24] sm:$0x1] }
 0x675   :  { %v1576_v8 = vpop.f32.mrb[18].mxu0 }
 0x676   :  { %v1579_v9 = vadd.f32 %v1574_v6, %v3560_v15  ;;  %v2749_v10 = vpop.f32.mrb[19].mxu0  ;;  %v3089_v15 = vld [vmem:[%s3744_s17 + $0x8] sm:$0xff]  }
 0x678   :  { %v1580_v11 = vpack.c.bf16 %v1579_v9, %v1579_v9 }
 0x67a   :  { %2767 = vmatmul.mubr.bf16.vlgmr.msra.gmra.mrb[24].mxu1 %v1580_v11 }
 0x67b   :  { %2806 = vmatprep.mubr.msk.bf16.mxu1 %vm3193_vm0, %v3192_v1  ;;  %2791 = vmatpush3.bf16.msra.mxu1 %v3088_v14  ;;  %v2205_v14 = vld [vmem:[%s3356_s12] sm:$0xf]  ;;  %s3196_s12 = smov [#allocation4]  }
 0x67c   :  { %2792 = vmatprep.subr.bf16.mxu1 %v3192_v1  ;;  %s2272_s10 = sshll.u32 %s3196_s12, 4  ;;  %s2273_s10 = int_to_ptr.vmem [resolvable:$true] %s2272_s10 }
 0x67d   :  { %s3111_s11 = scalar_lea.vmem %s2273_s10, 16  ;;  %s3115_s15 = scalar_lea.vmem %s2273_s10, 32 }
 0x67e   :  { %p3112_p0 = scmp.ne.s32.totalorder %s2273_s10, %s3111_s11  ;;  %p3116_p1 = scmp.lt.s32.totalorder %s2273_s10, %s2273_s10 }
 0x67f   :  { %2793 = vmatpush3.bf16.msra.mxu1 %v3089_v15  ;;  %v2212_v15 = vsel %vm182_vm1, %v2205_v14, 0  ;;  %p3117_p2 = scmp.lt.s32.totalorder %s3115_s15, %s3111_s11 }
 0x680   :  { %2794 = vmatprep.subr.bf16.mxu1 %v3192_v1 }
 0x681   :  { %p3118_p3 = por %p3117_p2, %p3116_p1 }
 0x683   :  { %2795 = vmatpush3.bf16.msra.mxu1 %v3090_v19  ;;  %v2091_v19 = vld [vmem:[%s3754_s6] sm:$0x1]  ;;  %p3119_p4 = pnand %p3118_p3, %p3112_p0 }
 0x684   :  { %2796 = vmatprep.subr.bf16.mxu1 %v3192_v1 }
 0x687   :  { %2797 = vmatpush3.bf16.msra.mxu1 %v3091_v16 }
 0x688   :  { %2798 = vmatprep.subr.bf16.mxu1 %v3192_v1 }
 0x68b   :  { %2799 = vmatpush3.bf16.msra.mxu1 %v3092_v17 }
 0x68c   :  { %2800 = vmatprep.subr.bf16.mxu1 %v3192_v1 }
 0x68f   :  { %2801 = vmatpush3.bf16.msra.mxu1 %v3093_v18 }
 0x690   :  { %2802 = vmatprep.subr.bf16.mxu1 %v3192_v1 }
 0x693   :  { %2803 = vmatpush3.bf16.msra.mxu1 %v3094_v30 }
 0x694   :  { %2804 = vmatprep.subr.bf16.mxu1 %v3192_v1 }
 0x697   :  { %2805 = vmatpush3.bf16.msra.mxu1 %v3095_v31 }
 0x698   :  { %2830 = vmatprep.subr.bf16.mxu1 %v3192_v1 }
 0x74d   :  { %v1680_v23 = vpop.f32.mrb[24].mxu1 }
 0x74e   :  { %v1681_v24 = vadd.f32 %v1680_v23, %v1597_v21  ;;  %v2768_v25 = vpop.f32.mrb[25].mxu1 }
 0x74f   :  { %v1683_v26 = vpop.f32.mrb[26].mxu1 }
 0x750   :  { %v1686_v27 = vmax.f32 %v1681_v24, 0.0  ;;  %v2769_v28 = vpop.f32.mrb[27].mxu1  ;;  %v2152_v26 = vld [vmem:[%s3755_s7] sm:$0x1] }
 0x752   :  { %v1687_v29 = vpack.c.bf16 %v1686_v27, %v1686_v27 }
 0x754   :  { %2787 = vmatmul.mubr.bf16.vlgmr.msra.gmra.mrb[20].mxu0 %v1687_v29 }
 0x755   :  { %2826 = vmatprep.mubr.msk.bf16.mxu0 %vm3193_vm0, %v3192_v1  ;;  %2811 = vmatpush3.bf16.msra.mxu0 %v3096_v32 }
 0x756   :  { %2812 = vmatprep.subr.bf16.mxu0 %v3192_v1 }
 0x759   :  { %2813 = vmatpush3.bf16.msra.mxu0 %v3097_v33 }
 0x75a   :  { %2814 = vmatprep.subr.bf16.mxu0 %v3192_v1 }
 0x75d   :  { %2815 = vmatpush3.bf16.msra.mxu0 %v3098_v34 }
 0x75e   :  { %2816 = vmatprep.subr.bf16.mxu0 %v3192_v1 }
 0x761   :  { %2817 = vmatpush3.bf16.msra.mxu0 %v3099_v35 }
 0x762   :  { %2818 = vmatprep.subr.bf16.mxu0 %v3192_v1 }
 0x765   :  { %2819 = vmatpush3.bf16.msra.mxu0 %v3100_v36 }
 0x766   :  { %2820 = vmatprep.subr.bf16.mxu0 %v3192_v1 }
 0x769   :  { %2821 = vmatpush3.bf16.msra.mxu0 %v3101_v37 }
 0x76a   :  { %2822 = vmatprep.subr.bf16.mxu0 %v3192_v1 }
 0x76d   :  { %2823 = vmatpush3.bf16.msra.mxu0 %v3102_v46 }
 0x76e   :  { %2824 = vmatprep.subr.bf16.mxu0 %v3192_v1 }
 0x771   :  { %2825 = vmatpush3.bf16.msra.mxu0 %v3103_v47 }
 0x772   :  { %2842 = vmatprep.subr.bf16.mxu0 %v3192_v1 }
 0x827   :  { %v1787_v39 = vpop.f32.mrb[20].mxu0 }
 0x828   :  { %v1788_v40 = vadd.f32 %v1787_v39, %v1704_v38  ;;  %v2788_v41 = vpop.f32.mrb[21].mxu0 }
 0x829   :  { %v1790_v42 = vpop.f32.mrb[22].mxu0 }
 0x82a   :  { %v1793_v43 = vmax.f32 %v1788_v40, 0.0  ;;  %v2789_v44 = vpop.f32.mrb[23].mxu0 }
 0x82c   :  { %v1794_v45 = vpack.c.bf16 %v1793_v43, %v1793_v43 }
 0x82e   :  { %2807 = vmatmul.mubr.bf16.vlgmr.msra.gmra.mrb[28].mxu1 %v1794_v45 }
 0x82f   :  { %2838 = vmatprep.mubr.msk.bf16.mxu1 %vm3193_vm0, %v3192_v1  ;;  %2831 = vmatpush3.bf16.msra.mxu1 %v3104_v48 }
 0x830   :  { %2832 = vmatprep.subr.bf16.mxu1 %v3192_v1 }
 0x833   :  { %2833 = vmatpush3.bf16.msra.mxu1 %v3105_v49 }
 0x834   :  { %2834 = vmatprep.subr.bf16.mxu1 %v3192_v1 }
 0x837   :  { %2835 = vmatpush3.bf16.msra.mxu1 %v3106_v57 }
 0x838   :  { %2836 = vmatprep.subr.bf16.mxu1 %v3192_v1 }
 0x83b   :  { %2837 = vmatpush3.bf16.msra.mxu1 %v3107_v58 }
 0x83c   :  { %2856 = vmatprep.subr.bf16.mxu1 %v3192_v1 }
 0x901   :  { %v1894_v51 = vpop.f32.mrb[28].mxu1 }
 0x902   :  { %v1895_v52 = vadd.f32 %v1894_v51, %v1811_v50  ;;  %v2808_v53 = vpop.f32.mrb[29].mxu1 }
 0x903   :  { %v1897_v54 = vpop.f32.mrb[30].mxu1 }
 0x904   :  { %v1900_v55 = vmax.f32 %v1895_v52, 0.0  ;;  %v2809_v56 = vpop.f32.mrb[31].mxu1 }
 0x906   :  { %v1901_v22 = vpack.c.bf16 %v1900_v55, %v1900_v55 }
 0x908   :  { %2827 = vmatmul.mubr.bf16.vlgmr.msra.gmra.mrb[24].mxu0 %v1901_v22 }
 0x909   :  { %2846 = vmatprep.mubr.msk.bf16.mxu0 %vm3193_vm0, %v3192_v1  ;;  %2843 = vmatpush3.bf16.msra.mxu0 %v3108_v59 }
 0x90a   :  { %2844 = vmatprep.subr.bf16.mxu0 %v3192_v1 }
 0x90d   :  { %2845 = vmatpush3.bf16.msra.mxu0 %v3109_v4 }
 0x90e   :  { %2850 = vmatprep.subr.bf16.mxu0 %v3192_v1 }
 0x9db   :  { %v2001_v61 = vpop.f32.mrb[24].mxu0 }
 0x9dc   :  { %v2002_v20 = vadd.f32 %v2001_v61, %v1918_v60  ;;  %v2828_v62 = vpop.f32.mrb[25].mxu0 }
 0x9dd   :  { %v2004_v63 = vpop.f32.mrb[26].mxu0 }
 0x9de   :  { %v2007_v0 = vmax.f32 %v2002_v20, 0.0  ;;  %v2829_v2 = vpop.f32.mrb[27].mxu0 }
 0x9e0   :  { %v2008_v3 = vpack.c.bf16 %v2007_v0, %v2007_v0 }
 0x9e2   :  { %2839 = vmatmul.mubr.msk.bf16.vlgmr.msra.gmra.mrb[32].mxu1 %vm841_vm6, %v2008_v3 }
 0x9e3   :  { %2858 = vmatprep.mubr.msk.bf16.mxu1 %vm3193_vm0, %v3192_v1  ;;  %2857 = vmatpush3.bf16.msra.mxu1 %v2212_v15 }
 0xab5   :  { %v2079_v6 = vpop.f32.mrb[32].mxu1 }
 0xab6   :  { %v2080_v7 = vadd.f32 %v2079_v6, %v2017_v5  ;;  %v2840_v8 = vpop.f32.mrb[33].mxu1 }
 0xab7   :  { %v2082_v9 = vpop.f32.mrb[34].mxu1 }
 0xab8   :  { %v2085_v10 = vmax.f32 %v2080_v7, 0.0  ;;  %v2841_v11 = vpop.f32.mrb[35].mxu1 }
 0xaba   :  { %v2086_v13 = vpack.c.bf16 %v2085_v10, %v2085_v10 }
 0xabc   :  { %2847 = vmatmul.mubr.msk.bf16.vlgmr.msra.gmra.mrb[28].mxu0 %vm2104_vm8, %v2086_v13 }
 0xabd   :  { %2851 = vmatpush3.bf16.msra.mxu0 %v3110_v12  ;;  %2852 = vmatprep.mubr.msk.bf16.mxu0 %vm3193_vm0, %v3192_v1 }
 0xb8f   :  { %v2142_v16 = vpop.f32.mrb[28].mxu0 }
 0xb90   :  { %v2143_v17 = vadd.f32 %v2142_v16, %v2091_v19  ;;  %v2848_v18 = vpop.f32.mrb[29].mxu0 }
 0xb91   :  { %v2145_v21 = vpop.f32.mrb[30].mxu0 }
 0xb92   :  { %v2148_v23 = vmax.f32 %v2143_v17, 0.0  ;;  %v2849_v24 = vpop.f32.mrb[31].mxu0 }
 0xb94   :  { %v2149_v25 = vpack.c.bf16 %v2148_v23, %v2148_v23 }
 0xb96   :  { %2853 = vmatmul.mubr.msk.bf16.vlgmr.msra.gmra.mrb[32].mxu0 %vm2159_vm9, %v2149_v25 }
 0xc69   :  { %v2197_v27 = vpop.f32.mrb[32].mxu0 }
 0xc6a   :  { %v2198_v28 = vadd.f32 %v2197_v27, %v2152_v26  ;;  %v2854_v29 = vpop.f32.mrb[33].mxu0 }
 0xc6b   :  { %v2200_v30 = vpop.f32.mrb[34].mxu0 }
 0xc6c   :  { %v2203_v1 = vmax.f32 %v2198_v28, 0.0  ;;  %v2855_v31 = vpop.f32.mrb[35].mxu0 }
 0xc6e   :  { %v2204_v32 = vpack.c.bf16 %v2203_v1, %v2203_v1 }
 0xc70   :  { %2859 = vmatmul.mubr.msk.bf16.vlgmr.msra.gmra.mrb[36].mxu1 %vm2207_vm10, %v2204_v32 }
 0xc71   :  { %3122 = shalt.err (!%p3119_p4)
}
 0xc72   :  { %s3123_s16 = scalar_lea.hbm %s3371_s4, 16 }
 0xc73   :  { %p3124_p5 = scmp.ne.s32.totalorder %s3371_s4, %s3123_s16  ;;  %p3127_p6 = scmp.lt.u32.totalorder %s3123_s16, %s3371_s4 }
 0xc75   :  { %p3129_p7 = pnand %p3127_p6, %p3124_p5 }
 0xc77   :  { %3132 = shalt.err (!%p3129_p7)
}
 0xc78   :  { %2275 = dma.vmem_to_hbm [thread:$0]  %s2273_s10, 16, %s3371_s4, [#allocation5]   ;;  %v2206_v33 = vld [vmem:[%s3361_s20] sm:$0x1]  ;;  %vm2254_vm11 = vcmask 122880  }
 0xc79   :  { %s3197_s18 = smov [#allocation2]  }
 0xc7a   :  { %s2262_s22 = sshll.u32 %s3197_s18, 4  ;;  %s2263_s22 = int_to_ptr.vmem [resolvable:$true] %s2262_s22 }
 0xc7b   :  { %s3133_s23 = scalar_lea.vmem %s2263_s22, 16  ;;  %s3137_s26 = scalar_lea.vmem %s2263_s22, 32 }
 0xc7c   :  { %p3134_p8 = scmp.ne.s32.totalorder %s2263_s22, %s3133_s23  ;;  %p3138_p9 = scmp.lt.s32.totalorder %s2263_s22, %s2263_s22 }
 0xc7d   :  { %p3139_p10 = scmp.lt.s32.totalorder %s3137_s26, %s3133_s23 }
 0xc7f   :  { %p3140_p11 = por %p3139_p10, %p3138_p9 }
 0xc81   :  { %p3141_p12 = pnand %p3140_p11, %p3134_p8 }
 0xd43   :  { %v2248_v34 = vpop.f32.mrb[36].mxu1 }
 0xd44   :  { %v2249_v35 = vadd.f32 %v2248_v34, %v2206_v33  ;;  %v2860_v36 = vpop.f32.mrb[37].mxu1 }
 0xd45   :  { %v2251_v37 = vpop.f32.mrb[38].mxu1 }
 0xd46   :  { %v2861_v38 = vpop.f32.mrb[39].mxu1  ;;  %2255 = vst.msk [vmem:[#allocation2] sm:$0x1] %vm2254_vm11, %v2249_v35 }
 0xd47   :  { %3144 = shalt.err (!%p3141_p12)
}
 0xd48   :  { %s3145_s20 = scalar_lea.hbm %s3366_s27, 16 }
 0xd49   :  { %p3146_p13 = scmp.ne.s32.totalorder %s3366_s27, %s3145_s20  ;;  %p3149_p0 = scmp.lt.u32.totalorder %s3145_s20, %s3366_s27 }
 0xd4b   :  { %p3151_p1 = pnand %p3149_p0, %p3146_p13 }
 0xd4d   :  { %3154 = shalt.err (!%p3151_p1)
}
 0xd4e   :  { %2265 = dma.vmem_to_hbm [thread:$0]  %s2263_s22, 16, %s3366_s27, [#allocation3]  }
 0xd4f   :  { %3155 = dma.done.wait [#allocation3], 16  }
 0xd50   :  { %3156 = vsyncadd [#allocation3], 4294967280 }
 0xd51   :  { %3157 = dma.done.wait [#allocation5], 16  }
 0xd52   :  { %3158 = vsyncadd [#allocation5], 4294967280 }
 0xd53   :  { %2282 = vsyncpa [#allocation3], 1 }
 0xd54   :  { %2283 = vsyncpa [#allocation5], 1 }

</bundles_post_ra>
